<compile_context>
chip_gen: v7x
topology: tpu7x:2x2x1
jax: 0.10.0
libtpu: 0.0.40
codegen_flags: <defaults>
</compile_context>

<pallas_src>
import functools

import jax
import jax.numpy as jnp
from jax import lax
from jax.experimental import pallas as pl
from jax.experimental.pallas import tpu as pltpu

# ---------------- small test configuration ----------------
B = 2                 # batch / num_instances used
LATENT_DIM = 32       # latent_dim
HIDDEN = 32           # num_hidden_units_phi (hidden_dim)
TRACE_STEPS = 4       # tracing_steps
OUT_CH = 3            # out_channels
SIDE = 32             # img_sidelength == output_sidelength (was 8; bigger so the
                      # grid/tile sizes measure throughput, not fixed overhead)
N_PIX = SIDE * SIDE
TILE_N = 256          # pixel tile (lane axis inside the kernel; multiple of 128)
INIT_DEPTH = 0.05     # initial sphere-trace depth


# ---------------- Pallas kernel ----------------
def sof_forward_kernel(rays_ref, phi_ref, lstm_ref, rw_ref, rb_ref, out_ref,
                       *, trace_steps, hidden, out_ch, init_depth):
    """All per-pixel tensors are [channels, tile_n]: pixels on the lane axis."""
    H = hidden

    rays = rays_ref[0]                        # [6, TILE_N]
    ray_o = rays[0:3, :]                      # [3, TILE_N]
    ray_d = rays[3:6, :]                      # [3, TILE_N]
    tn = rays.shape[-1]

    # per-batch hypernetwork-generated phi weights (packed slab, see wrapper)
    pp = phi_ref[0]                           # [H, 6 + 2H]
    w1t = pp[:, 0:3]                          # [H, 3]
    w2t = pp[:, 3:3 + H]                      # [H, H]
    w3t = pp[:, 3 + H:3 + 2 * H]              # [H, H]
    b1 = pp[:, 3 + 2 * H:4 + 2 * H]           # [H, 1]
    b2 = pp[:, 4 + 2 * H:5 + 2 * H]           # [H, 1]
    b3 = pp[:, 5 + 2 * H:6 + 2 * H]           # [H, 1]

    # shared LSTM raymarcher params (packed slab, see wrapper)
    lp = lstm_ref[...]                        # [4H, 2H + 2]
    lw = lp[:, 0:2 * H]                       # [4H, 2H]  fused [[Wi],[Wh]]^T
    gate_b = lp[:, 2 * H:2 * H + 1]           # [4H, 1]
    wd_col = lp[0:H, 2 * H + 1:2 * H + 2]     # [H, 1]    depth head weight
    bd = lp[H:H + 1, 2 * H + 1:2 * H + 2]     # [1, 1]    depth head bias

    # phi layer-1 is linear in depth -> hoist the K=3 contraction out of the
    # trace loop:  phi1(o + d*dir) = relu(W1^T o + b1 + d * W1^T dir)
    A = jnp.dot(w1t, ray_o, preferred_element_type=jnp.float32) + b1    # [H, TN]
    Bv = jnp.dot(w1t, ray_d, preferred_element_type=jnp.float32)        # [H, TN]

    def phi_feat(depth):
        l1 = jnp.maximum(A + depth * Bv, 0.0)                           # VPU only
        l2 = jnp.maximum(
            jnp.dot(w2t, l1, preferred_element_type=jnp.float32) + b2, 0.0)
        l3 = jnp.maximum(
            jnp.dot(w3t, l2, preferred_element_type=jnp.float32) + b3, 0.0)
        return l3                                                        # [H, TN]

    def sigmoid_t(x):
        # sigmoid(x) == 0.5 * tanh(0.5 x) + 0.5  (exact identity, single EUP op)
        return 0.5 * jnp.tanh(0.5 * x) + 0.5

    def step(_, carry):
        depth, h, c = carry
        feat = phi_feat(depth)                                           # [H, TN]
        cat = jnp.concatenate([feat, h], axis=0)                         # [2H, TN]
        gates = (jnp.dot(lw, cat, preferred_element_type=jnp.float32)
                 + gate_b)                                               # [4H, TN]
        # sublane slices at 8-aligned offsets -> no lane relayouts
        i_g = sigmoid_t(gates[0:H, :])
        f_g = sigmoid_t(gates[H:2 * H, :])
        g_g = jnp.tanh(gates[2 * H:3 * H, :])
        o_g = sigmoid_t(gates[3 * H:4 * H, :])
        c = f_g * c + i_g * g_g
        h = o_g * jnp.tanh(c)
        # depth head: VPU multiply + sublane reduce (keeps the MXU path short)
        delta = jnp.sum(h * wd_col, axis=0, keepdims=True) + bd          # [1, TN]
        return depth + delta, h, c

    depth0 = jnp.full((1, tn), init_depth, dtype=jnp.float32)
    h0 = jnp.zeros((H, tn), dtype=jnp.float32)
    c0 = jnp.zeros((H, tn), dtype=jnp.float32)
    depth, _, _ = lax.fori_loop(0, trace_steps, step, (depth0, h0, c0),
                                unroll=True)

    # final surface features + FC pixel generator (FCBlock, outermost linear)
    v = phi_feat(depth)                                                  # [H, TN]
    rb = rb_ref[...]                                                     # [H, 4]
    x = jnp.maximum(
        jnp.dot(rw_ref[0], v, preferred_element_type=jnp.float32) + rb[:, 0:1], 0.0)
    x = jnp.maximum(
        jnp.dot(rw_ref[1], x, preferred_element_type=jnp.float32) + rb[:, 1:2], 0.0)
    x = jnp.maximum(
        jnp.dot(rw_ref[2], x, preferred_element_type=jnp.float32) + rb[:, 2:3], 0.0)
    # output projection is zero-padded to [H, H] in the wrapper; rows >= out_ch are 0
    rgb_full = (jnp.dot(rw_ref[3], x, preferred_element_type=jnp.float32)
                + rb[:, 3:4])                                            # [H, TN]

    # packed, lane-dense store: rows 0..out_ch-1 = rgb, row out_ch = depth
    out_ref[0] = jnp.concatenate([rgb_full[0:out_ch, :], depth], axis=0)


# ---------------- wrapper / pallas_call ----------------
def sof_forward(ray_o, ray_d, phi_params, lstm_params, rend_params,
                *, trace_steps, hidden, tile_n, init_depth=INIT_DEPTH):
    bsz, n_pix, _ = ray_o.shape
    H = hidden
    w1, b1, w2, b2, w3, b3 = phi_params           # w: [B, in, out], b: [B, 1, out]
    wi, wh, lb, wd, bd = lstm_params
    r1, rb1, r2, rb2, r3, rb3, ro, rbo = rend_params
    out_ch = ro.shape[1]

    tile_n = min(tile_n, n_pix)
    assert n_pix % tile_n == 0 and tile_n % 128 == 0, "tile must be lane-aligned"

    # ---- plain-JAX packing (free): 21 operands collapsed into 5 lane-dense ones
    def t(a):
        return jnp.transpose(a, (0, 2, 1))

    # rays: [B, 6, N] with pixels on the lane axis (ray_o rows 0-2, ray_d rows 3-5)
    rays = jnp.concatenate([t(ray_o), t(ray_d)], axis=1)
    # per-batch phi weights, pre-transposed so the kernel computes W^T @ x
    phi_pack = jnp.concatenate([t(w1), t(w2), t(w3), t(b1), t(b2), t(b3)], axis=2)
    # fused LSTM gate weight [[Wi],[Wh]]^T, gate bias column, depth head (wd, bd)
    lw_t = jnp.concatenate([wi, wh], axis=0).T                     # [4H, 2H]
    head_col = jnp.zeros((4 * H, 1), jnp.float32)
    head_col = head_col.at[0:H, 0].set(wd[0])
    head_col = head_col.at[H, 0].set(bd[0, 0])
    lstm_pack = jnp.concatenate([lw_t, lb.T, head_col], axis=1)    # [4H, 2H+2]
    # renderer: stacked transposed weights; last slab = zero-padded output proj
    ro_t_pad = jnp.zeros((H, H), jnp.float32).at[0:out_ch, :].set(ro.T)
    rend_wt = jnp.stack([r1.T, r2.T, r3.T, ro_t_pad], axis=0)      # [4, H, H]
    rbo_col = jnp.zeros((H, 1), jnp.float32).at[0:out_ch, 0].set(rbo[0])
    rend_b = jnp.concatenate([rb1.T, rb2.T, rb3.T, rbo_col], axis=1)  # [H, 4]

    kernel = functools.partial(sof_forward_kernel, trace_steps=trace_steps,
                               hidden=H, out_ch=out_ch, init_depth=init_depth)

    n_tiles = n_pix // tile_n
    grid = (n_tiles, bsz)          # pixel-tile axis leading: even 2-TC sharding
    pw = 6 + 2 * H

    in_specs = [
        pl.BlockSpec((1, 6, tile_n), lambda n, b: (b, 0, n)),      # rays
        pl.BlockSpec((1, H, pw), lambda n, b: (b, 0, 0)),          # phi slab (per-batch)
        pl.BlockSpec((4 * H, 2 * H + 2), lambda n, b: (0, 0)),     # LSTM slab (shared)
        pl.BlockSpec((4, H, H), lambda n, b: (0, 0, 0)),           # renderer weights
        pl.BlockSpec((H, 4), lambda n, b: (0, 0)),                 # renderer biases
    ]
    out_specs = pl.BlockSpec((1, out_ch + 1, tile_n), lambda n, b: (b, 0, n))
    out_shape = jax.ShapeDtypeStruct((bsz, out_ch + 1, n_pix), jnp.float32)

    # advisory cost estimate so XLA schedules hypernet/ray-setup around the call
    mm_flops_tile = 2 * tile_n * (
        2 * 3 * H                                              # A, Bv
        + trace_steps * (2 * H * H + (4 * H) * (2 * H) + H)    # loop matmuls + head
        + 2 * H * H                                            # final phi
        + 4 * H * H)                                           # renderer
    ce = pl.CostEstimate(
        flops=int(mm_flops_tile) * n_tiles * bsz,
        transcendentals=int(5 * H * tile_n * trace_steps) * n_tiles * bsz,
        bytes_accessed=4 * int(rays.size + phi_pack.size + lstm_pack.size
                               + rend_wt.size + rend_b.size
                               + bsz * (out_ch + 1) * n_pix))

    packed = pl.pallas_call(
        kernel,
        out_shape=out_shape,
        grid_spec=pltpu.PrefetchScalarGridSpec(
            num_scalar_prefetch=0, grid=grid,
            in_specs=in_specs, out_specs=out_specs),
        compiler_params=pltpu.CompilerParams(
            dimension_semantics=("parallel", "parallel")),
        cost_estimate=ce,
    )(rays, phi_pack, lstm_pack, rend_wt, rend_b)

    # unpack to the module's return layout (cheap XLA transposes)
    novel_views = jnp.transpose(packed[:, 0:out_ch, :], (0, 2, 1))   # [B, N, out_ch]
    depth_maps = jnp.transpose(packed[:, out_ch:out_ch + 1, :], (0, 2, 1))  # [B, N, 1]
    return novel_views, depth_maps


# ---------------- plain-JAX glue ----------------
def init_hyper_fc(key, latent_dim, hidden, in_ch=3):
    """One small hypernet per phi layer: Linear+ReLU+Linear -> (W, b) params."""
    layer_dims = [(in_ch, hidden), (hidden, hidden), (hidden, hidden)]
    keys = jax.random.split(key, len(layer_dims) * 4)
    params = []
    for i, (fi, fo) in enumerate(layer_dims):
        k0, k1, k2, k3 = keys[4 * i:4 * i + 4]
        A = jax.random.normal(k0, (latent_dim, latent_dim), jnp.float32) * 0.1
        a = jax.random.normal(k1, (latent_dim,), jnp.float32) * 0.1
        Bm = (jax.random.normal(k2, (latent_dim, fi * fo + fo), jnp.float32)
              * (1.0 / jnp.sqrt(float(latent_dim * fi))))
        cb = jax.random.normal(k3, (fi * fo + fo,), jnp.float32) * 0.01
        params.append((A, a, Bm, cb, fi, fo))
    return params


def hyper_phi(z, hyper_params):
    """phi = self.hyper_phi(z): per-batch weights of the 3-layer phi MLP."""
    out = []
    for A, a, Bm, cb, fi, fo in hyper_params:
        hz = jax.nn.relu(z @ A + a)
        p = hz @ Bm + cb
        W = p[:, :fi * fo].reshape(-1, fi, fo)
        b = p[:, fi * fo:].reshape(-1, 1, fo)
        out.append((W, b))
    (w1, b1), (w2, b2), (w3, b3) = out
    return w1, b1, w2, b2, w3, b3


def generate_rays(cam2world, intrinsics, uv, orthogonal=True):
    """Ray origins / directions in world space from pose, intrinsics, uv."""
    fx = intrinsics[:, 0:1, 0]
    fy = intrinsics[:, 1:2, 1]
    cx = intrinsics[:, 0:1, 2]
    cy = intrinsics[:, 1:2, 2]
    x = (uv[..., 0] - cx) / fx
    y = (uv[..., 1] - cy) / fy
    R = cam2world[:, :3, :3]
    tvec = cam2world[:, :3, 3]
    if orthogonal:
        cam_pts = jnp.stack([x, y, jnp.zeros_like(x)], axis=-1)
        dirs_cam = jnp.broadcast_to(jnp.array([0.0, 0.0, 1.0], jnp.float32),
                                    cam_pts.shape)
    else:
        cam_pts = jnp.zeros((x.shape[0], x.shape[1], 3), jnp.float32)
        dirs_cam = jnp.stack([x, y, jnp.ones_like(x)], axis=-1)
        dirs_cam = dirs_cam / jnp.linalg.norm(dirs_cam, axis=-1, keepdims=True)
    ray_o = jnp.einsum('bij,bnj->bni', R, cam_pts) + tvec[:, None, :]
    ray_d = jnp.einsum('bij,bnj->bni', R, dirs_cam)
    return ray_o.astype(jnp.float32), ray_d.astype(jnp.float32)


# ---------------- main ----------------
if __name__ == "__main__":
    key = jax.random.PRNGKey(0)
    k_z, k_hyper, k_lstm, k_rend = jax.random.split(key, 4)

    # latent codes (nn.Embedding, init N(0, 0.01)) -> z passed to forward()
    z = jax.random.normal(k_z, (B, LATENT_DIM), jnp.float32) * 0.01

    # camera pose (cam2world), intrinsics, uv grid
    pose = jnp.tile(jnp.eye(4, dtype=jnp.float32)[None], (B, 1, 1))
    pose = pose.at[:, :3, 3].set(jnp.array([0.0, 0.0, 1.1], jnp.float32))
    intrinsics = jnp.tile(jnp.array([[SIDE / 2, 0.0, SIDE / 2],
                                     [0.0, SIDE / 2, SIDE / 2],
                                     [0.0, 0.0, 1.0]], jnp.float32)[None],
                          (B, 1, 1))
    ii, jj = jnp.meshgrid(jnp.arange(SIDE), jnp.arange(SIDE), indexing='xy')
    uv = jnp.stack([ii.reshape(-1), jj.reshape(-1)], axis=-1).astype(jnp.float32)
    uv = jnp.tile(uv[None], (B, 1, 1))                      # [B, N_PIX, 2]

    # hyper_phi(z): per-batch phi MLP weights
    hyper_params = init_hyper_fc(k_hyper, LATENT_DIM, HIDDEN)
    phi_params = hyper_phi(z, hyper_params)

    # Raymarcher LSTM + depth head params (shared)
    ks = jax.random.split(k_lstm, 3)
    scale = 1.0 / jnp.sqrt(float(HIDDEN))
    wi = jax.random.normal(ks[0], (HIDDEN, 4 * HIDDEN), jnp.float32) * scale
    wh = jax.random.normal(ks[1], (HIDDEN, 4 * HIDDEN), jnp.float32) * scale
    lb = jnp.zeros((1, 4 * HIDDEN), jnp.float32)
    wd = jax.random.normal(ks[2], (1, HIDDEN), jnp.float32) * scale
    bd = jnp.zeros((1, 1), jnp.float32)
    lstm_params = (wi, wh, lb, wd, bd)

    # pixel generator (FCBlock) params (shared)
    kr = jax.random.split(k_rend, 4)

    def lin(k, fi, fo):
        return jax.random.normal(k, (fi, fo), jnp.float32) / jnp.sqrt(float(fi))

    r1, rb1 = lin(kr[0], HIDDEN, HIDDEN), jnp.zeros((1, HIDDEN), jnp.float32)
    r2, rb2 = lin(kr[1], HIDDEN, HIDDEN), jnp.zeros((1, HIDDEN), jnp.float32)
    r3, rb3 = lin(kr[2], HIDDEN, HIDDEN), jnp.zeros((1, HIDDEN), jnp.float32)
    ro, rbo = lin(kr[3], HIDDEN, OUT_CH), jnp.zeros((1, OUT_CH), jnp.float32)
    rend_params = (r1, rb1, r2, rb2, r3, rb3, ro, rbo)

    ray_o, ray_d = generate_rays(pose, intrinsics, uv, orthogonal=True)

    novel_views, depth_maps = sof_forward(
        ray_o, ray_d, phi_params, lstm_params, rend_params,
        trace_steps=TRACE_STEPS, hidden=HIDDEN, tile_n=TILE_N)
    jax.block_until_ready((novel_views, depth_maps))

    assert novel_views.shape == (B, N_PIX, OUT_CH)
    assert depth_maps.shape == (B, N_PIX, 1)
    assert bool(jnp.all(jnp.isfinite(novel_views)))
    assert bool(jnp.all(jnp.isfinite(depth_maps)))
    print("KERNEL_OK")
</pallas_src>

<mosaic_0001>
module attributes {stable_mosaic.version = 11 : i64} {
  func.func @sof_forward_kernel(%arg0: i32, %arg1: i32, %arg2: memref<1x6x256xf32, #tpu.memory_space<vmem>>, %arg3: memref<1x32x70xf32, #tpu.memory_space<vmem>>, %arg4: memref<128x66xf32, #tpu.memory_space<vmem>>, %arg5: memref<4x32x32xf32, #tpu.memory_space<vmem>>, %arg6: memref<32x4xf32, #tpu.memory_space<vmem>>, %arg7: memref<1x4x256xf32, #tpu.memory_space<vmem>>) attributes {dimension_semantics = [#tpu.dimension_semantics<parallel>, #tpu.dimension_semantics<parallel>], iteration_bounds = array<i64: 4, 2>, scalar_prefetch = 0 : i64, scratch_operands = 0 : i64, tpu.core_type = #tpu.core_type<tc>, window_params = [{transform_indices = @transform_0, window_bounds = array<i64: 1, 6, 256>}, {transform_indices = @transform_1, window_bounds = array<i64: 1, 32, 70>}, {pipeline_mode = #tpu.pipeline_mode<synchronous>, transform_indices = @transform_2, window_bounds = array<i64: 128, 66>}, {pipeline_mode = #tpu.pipeline_mode<synchronous>, transform_indices = @transform_3, window_bounds = array<i64: 4, 32, 32>}, {pipeline_mode = #tpu.pipeline_mode<synchronous>, transform_indices = @transform_4, window_bounds = array<i64: 32, 4>}, {transform_indices = @transform_5, window_bounds = array<i64: 1, 4, 256>}]} {
    %c0 = arith.constant 0 : index
    %c0_0 = arith.constant 0 : index
    %c0_1 = arith.constant 0 : index
    %0 = vector.load %arg2[%c0, %c0_0, %c0_1] : memref<1x6x256xf32, #tpu.memory_space<vmem>>, vector<1x6x256xf32>
    %1 = vector.shape_cast %0 : vector<1x6x256xf32> to vector<6x256xf32>
    %2 = vector.extract_strided_slice %1 {offsets = [0, 0], sizes = [3, 256], strides = [1, 1]} : vector<6x256xf32> to vector<3x256xf32>
    %3 = vector.extract_strided_slice %1 {offsets = [3, 0], sizes = [3, 256], strides = [1, 1]} : vector<6x256xf32> to vector<3x256xf32>
    %c0_2 = arith.constant 0 : index
    %c0_3 = arith.constant 0 : index
    %c0_4 = arith.constant 0 : index
    %4 = vector.load %arg3[%c0_2, %c0_3, %c0_4] : memref<1x32x70xf32, #tpu.memory_space<vmem>>, vector<1x32x70xf32>
    %5 = vector.shape_cast %4 : vector<1x32x70xf32> to vector<32x70xf32>
    %6 = vector.extract_strided_slice %5 {offsets = [0, 0], sizes = [32, 3], strides = [1, 1]} : vector<32x70xf32> to vector<32x3xf32>
    %7 = vector.extract_strided_slice %5 {offsets = [0, 3], sizes = [32, 32], strides = [1, 1]} : vector<32x70xf32> to vector<32x32xf32>
    %8 = vector.extract_strided_slice %5 {offsets = [0, 35], sizes = [32, 32], strides = [1, 1]} : vector<32x70xf32> to vector<32x32xf32>
    %9 = vector.extract_strided_slice %5 {offsets = [0, 67], sizes = [32, 1], strides = [1, 1]} : vector<32x70xf32> to vector<32x1xf32>
    %10 = vector.extract_strided_slice %5 {offsets = [0, 68], sizes = [32, 1], strides = [1, 1]} : vector<32x70xf32> to vector<32x1xf32>
    %11 = vector.extract_strided_slice %5 {offsets = [0, 69], sizes = [32, 1], strides = [1, 1]} : vector<32x70xf32> to vector<32x1xf32>
    %c0_5 = arith.constant 0 : index
    %c0_6 = arith.constant 0 : index
    %12 = vector.load %arg4[%c0_5, %c0_6] : memref<128x66xf32, #tpu.memory_space<vmem>>, vector<128x66xf32>
    %13 = vector.extract_strided_slice %12 {offsets = [0, 0], sizes = [128, 64], strides = [1, 1]} : vector<128x66xf32> to vector<128x64xf32>
    %14 = vector.extract_strided_slice %12 {offsets = [0, 64], sizes = [128, 1], strides = [1, 1]} : vector<128x66xf32> to vector<128x1xf32>
    %15 = vector.extract_strided_slice %12 {offsets = [0, 65], sizes = [32, 1], strides = [1, 1]} : vector<128x66xf32> to vector<32x1xf32>
    %16 = vector.extract_strided_slice %12 {offsets = [32, 65], sizes = [1, 1], strides = [1, 1]} : vector<128x66xf32> to vector<1x1xf32>
    %cst = arith.constant dense<0.000000e+00> : vector<32x256xf32>
    %17 = tpu.matmul %6, %2, %cst {dimension_numbers = #tpu.dot_dimension_numbers<[1], [0], [0], [1], [0, 0, 1, 1], [], []>} : vector<32x3xf32>, vector<3x256xf32>, vector<32x256xf32> -> vector<32x256xf32>
    %18 = vector.broadcast %9 : vector<32x1xf32> to vector<32x256xf32>
    %19 = arith.addf %17, %18 : vector<32x256xf32>
    %cst_7 = arith.constant dense<0.000000e+00> : vector<32x256xf32>
    %20 = tpu.matmul %6, %3, %cst_7 {dimension_numbers = #tpu.dot_dimension_numbers<[1], [0], [0], [1], [0, 0, 1, 1], [], []>} : vector<32x3xf32>, vector<3x256xf32>, vector<32x256xf32> -> vector<32x256xf32>
    %cst_8 = arith.constant 5.000000e-02 : f32
    %21 = vector.broadcast %cst_8 : f32 to vector<1x256xf32>
    %cst_9 = arith.constant 0.000000e+00 : f32
    %22 = vector.broadcast %cst_9 : f32 to vector<32x256xf32>
    %cst_10 = arith.constant 0.000000e+00 : f32
    %23 = vector.broadcast %cst_10 : f32 to vector<32x256xf32>
    %c0_i32 = arith.constant 0 : i32
    %24 = vector.broadcast %21 : vector<1x256xf32> to vector<32x256xf32>
    %25 = arith.mulf %24, %20 : vector<32x256xf32>
    %26 = arith.addf %19, %25 : vector<32x256xf32>
    %cst_11 = arith.constant 0.000000e+00 : f32
    %27 = vector.broadcast %cst_11 : f32 to vector<32x256xf32>
    %28 = arith.maximumf %26, %27 : vector<32x256xf32>
    %cst_12 = arith.constant dense<0.000000e+00> : vector<32x256xf32>
    %29 = tpu.matmul %7, %28, %cst_12 {dimension_numbers = #tpu.dot_dimension_numbers<[1], [0], [0], [1], [0, 0, 1, 1], [], []>} : vector<32x32xf32>, vector<32x256xf32>, vector<32x256xf32> -> vector<32x256xf32>
    %30 = vector.broadcast %10 : vector<32x1xf32> to vector<32x256xf32>
    %31 = arith.addf %29, %30 : vector<32x256xf32>
    %cst_13 = arith.constant 0.000000e+00 : f32
    %32 = vector.broadcast %cst_13 : f32 to vector<32x256xf32>
    %33 = arith.maximumf %31, %32 : vector<32x256xf32>
    %cst_14 = arith.constant dense<0.000000e+00> : vector<32x256xf32>
    %34 = tpu.matmul %8, %33, %cst_14 {dimension_numbers = #tpu.dot_dimension_numbers<[1], [0], [0], [1], [0, 0, 1, 1], [], []>} : vector<32x32xf32>, vector<32x256xf32>, vector<32x256xf32> -> vector<32x256xf32>
    %35 = vector.broadcast %11 : vector<32x1xf32> to vector<32x256xf32>
    %36 = arith.addf %34, %35 : vector<32x256xf32>
    %cst_15 = arith.constant 0.000000e+00 : f32
    %37 = vector.broadcast %cst_15 : f32 to vector<32x256xf32>
    %38 = arith.maximumf %36, %37 : vector<32x256xf32>
    %39 = tpu.concatenate %38, %22 in 0 : vector<32x256xf32>, vector<32x256xf32> -> vector<64x256xf32>
    %cst_16 = arith.constant dense<0.000000e+00> : vector<128x256xf32>
    %40 = tpu.matmul %13, %39, %cst_16 {dimension_numbers = #tpu.dot_dimension_numbers<[1], [0], [0], [1], [0, 0, 1, 1], [], []>} : vector<128x64xf32>, vector<64x256xf32>, vector<128x256xf32> -> vector<128x256xf32>
    %41 = vector.broadcast %14 : vector<128x1xf32> to vector<128x256xf32>
    %42 = arith.addf %40, %41 : vector<128x256xf32>
    %43 = vector.extract_strided_slice %42 {offsets = [0, 0], sizes = [32, 256], strides = [1, 1]} : vector<128x256xf32> to vector<32x256xf32>
    %cst_17 = arith.constant 5.000000e-01 : f32
    %44 = vector.broadcast %cst_17 : f32 to vector<32x256xf32>
    %45 = arith.mulf %44, %43 : vector<32x256xf32>
    %46 = math.tanh %45 : vector<32x256xf32>
    %cst_18 = arith.constant 5.000000e-01 : f32
    %47 = vector.broadcast %cst_18 : f32 to vector<32x256xf32>
    %48 = arith.mulf %47, %46 : vector<32x256xf32>
    %cst_19 = arith.constant 5.000000e-01 : f32
    %49 = vector.broadcast %cst_19 : f32 to vector<32x256xf32>
    %50 = arith.addf %48, %49 : vector<32x256xf32>
    %51 = vector.extract_strided_slice %42 {offsets = [32, 0], sizes = [32, 256], strides = [1, 1]} : vector<128x256xf32> to vector<32x256xf32>
    %cst_20 = arith.constant 5.000000e-01 : f32
    %52 = vector.broadcast %cst_20 : f32 to vector<32x256xf32>
    %53 = arith.mulf %52, %51 : vector<32x256xf32>
    %54 = math.tanh %53 : vector<32x256xf32>
    %cst_21 = arith.constant 5.000000e-01 : f32
    %55 = vector.broadcast %cst_21 : f32 to vector<32x256xf32>
    %56 = arith.mulf %55, %54 : vector<32x256xf32>
    %cst_22 = arith.constant 5.000000e-01 : f32
    %57 = vector.broadcast %cst_22 : f32 to vector<32x256xf32>
    %58 = arith.addf %56, %57 : vector<32x256xf32>
    %59 = vector.extract_strided_slice %42 {offsets = [64, 0], sizes = [32, 256], strides = [1, 1]} : vector<128x256xf32> to vector<32x256xf32>
    %60 = math.tanh %59 : vector<32x256xf32>
    %61 = vector.extract_strided_slice %42 {offsets = [96, 0], sizes = [32, 256], strides = [1, 1]} : vector<128x256xf32> to vector<32x256xf32>
    %cst_23 = arith.constant 5.000000e-01 : f32
    %62 = vector.broadcast %cst_23 : f32 to vector<32x256xf32>
    %63 = arith.mulf %62, %61 : vector<32x256xf32>
    %64 = math.tanh %63 : vector<32x256xf32>
    %cst_24 = arith.constant 5.000000e-01 : f32
    %65 = vector.broadcast %cst_24 : f32 to vector<32x256xf32>
    %66 = arith.mulf %65, %64 : vector<32x256xf32>
    %cst_25 = arith.constant 5.000000e-01 : f32
    %67 = vector.broadcast %cst_25 : f32 to vector<32x256xf32>
    %68 = arith.addf %66, %67 : vector<32x256xf32>
    %69 = arith.mulf %58, %23 : vector<32x256xf32>
    %70 = arith.mulf %50, %60 : vector<32x256xf32>
    %71 = arith.addf %69, %70 : vector<32x256xf32>
    %72 = math.tanh %71 : vector<32x256xf32>
    %73 = arith.mulf %68, %72 : vector<32x256xf32>
    %74 = vector.broadcast %15 : vector<32x1xf32> to vector<32x256xf32>
    %75 = arith.mulf %73, %74 : vector<32x256xf32>
    %cst_26 = arith.constant dense<0.000000e+00> : vector<256xf32>
    %76 = vector.multi_reduction <add>, %75, %cst_26 [0] : vector<32x256xf32> to vector<256xf32>
    %77 = vector.shape_cast %76 : vector<256xf32> to vector<1x256xf32>
    %78 = vector.broadcast %16 : vector<1x1xf32> to vector<1x256xf32>
    %79 = arith.addf %77, %78 : vector<1x256xf32>
    %80 = arith.addf %21, %79 : vector<1x256xf32>
    %c1_i32 = arith.constant 1 : i32
    %81 = vector.broadcast %80 : vector<1x256xf32> to vector<32x256xf32>
    %82 = arith.mulf %81, %20 : vector<32x256xf32>
    %83 = arith.addf %19, %82 : vector<32x256xf32>
    %cst_27 = arith.constant 0.000000e+00 : f32
    %84 = vector.broadcast %cst_27 : f32 to vector<32x256xf32>
    %85 = arith.maximumf %83, %84 : vector<32x256xf32>
    %cst_28 = arith.constant dense<0.000000e+00> : vector<32x256xf32>
    %86 = tpu.matmul %7, %85, %cst_28 {dimension_numbers = #tpu.dot_dimension_numbers<[1], [0], [0], [1], [0, 0, 1, 1], [], []>} : vector<32x32xf32>, vector<32x256xf32>, vector<32x256xf32> -> vector<32x256xf32>
    %87 = vector.broadcast %10 : vector<32x1xf32> to vector<32x256xf32>
    %88 = arith.addf %86, %87 : vector<32x256xf32>
    %cst_29 = arith.constant 0.000000e+00 : f32
    %89 = vector.broadcast %cst_29 : f32 to vector<32x256xf32>
    %90 = arith.maximumf %88, %89 : vector<32x256xf32>
    %cst_30 = arith.constant dense<0.000000e+00> : vector<32x256xf32>
    %91 = tpu.matmul %8, %90, %cst_30 {dimension_numbers = #tpu.dot_dimension_numbers<[1], [0], [0], [1], [0, 0, 1, 1], [], []>} : vector<32x32xf32>, vector<32x256xf32>, vector<32x256xf32> -> vector<32x256xf32>
    %92 = vector.broadcast %11 : vector<32x1xf32> to vector<32x256xf32>
    %93 = arith.addf %91, %92 : vector<32x256xf32>
    %cst_31 = arith.constant 0.000000e+00 : f32
    %94 = vector.broadcast %cst_31 : f32 to vector<32x256xf32>
    %95 = arith.maximumf %93, %94 : vector<32x256xf32>
    %96 = tpu.concatenate %95, %73 in 0 : vector<32x256xf32>, vector<32x256xf32> -> vector<64x256xf32>
    %cst_32 = arith.constant dense<0.000000e+00> : vector<128x256xf32>
    %97 = tpu.matmul %13, %96, %cst_32 {dimension_numbers = #tpu.dot_dimension_numbers<[1], [0], [0], [1], [0, 0, 1, 1], [], []>} : vector<128x64xf32>, vector<64x256xf32>, vector<128x256xf32> -> vector<128x256xf32>
    %98 = vector.broadcast %14 : vector<128x1xf32> to vector<128x256xf32>
    %99 = arith.addf %97, %98 : vector<128x256xf32>
    %100 = vector.extract_strided_slice %99 {offsets = [0, 0], sizes = [32, 256], strides = [1, 1]} : vector<128x256xf32> to vector<32x256xf32>
    %cst_33 = arith.constant 5.000000e-01 : f32
    %101 = vector.broadcast %cst_33 : f32 to vector<32x256xf32>
    %102 = arith.mulf %101, %100 : vector<32x256xf32>
    %103 = math.tanh %102 : vector<32x256xf32>
    %cst_34 = arith.constant 5.000000e-01 : f32
    %104 = vector.broadcast %cst_34 : f32 to vector<32x256xf32>
    %105 = arith.mulf %104, %103 : vector<32x256xf32>
    %cst_35 = arith.constant 5.000000e-01 : f32
    %106 = vector.broadcast %cst_35 : f32 to vector<32x256xf32>
    %107 = arith.addf %105, %106 : vector<32x256xf32>
    %108 = vector.extract_strided_slice %99 {offsets = [32, 0], sizes = [32, 256], strides = [1, 1]} : vector<128x256xf32> to vector<32x256xf32>
    %cst_36 = arith.constant 5.000000e-01 : f32
    %109 = vector.broadcast %cst_36 : f32 to vector<32x256xf32>
    %110 = arith.mulf %109, %108 : vector<32x256xf32>
    %111 = math.tanh %110 : vector<32x256xf32>
    %cst_37 = arith.constant 5.000000e-01 : f32
    %112 = vector.broadcast %cst_37 : f32 to vector<32x256xf32>
    %113 = arith.mulf %112, %111 : vector<32x256xf32>
    %cst_38 = arith.constant 5.000000e-01 : f32
    %114 = vector.broadcast %cst_38 : f32 to vector<32x256xf32>
    %115 = arith.addf %113, %114 : vector<32x256xf32>
    %116 = vector.extract_strided_slice %99 {offsets = [64, 0], sizes = [32, 256], strides = [1, 1]} : vector<128x256xf32> to vector<32x256xf32>
    %117 = math.tanh %116 : vector<32x256xf32>
    %118 = vector.extract_strided_slice %99 {offsets = [96, 0], sizes = [32, 256], strides = [1, 1]} : vector<128x256xf32> to vector<32x256xf32>
    %cst_39 = arith.constant 5.000000e-01 : f32
    %119 = vector.broadcast %cst_39 : f32 to vector<32x256xf32>
    %120 = arith.mulf %119, %118 : vector<32x256xf32>
    %121 = math.tanh %120 : vector<32x256xf32>
    %cst_40 = arith.constant 5.000000e-01 : f32
    %122 = vector.broadcast %cst_40 : f32 to vector<32x256xf32>
    %123 = arith.mulf %122, %121 : vector<32x256xf32>
    %cst_41 = arith.constant 5.000000e-01 : f32
    %124 = vector.broadcast %cst_41 : f32 to vector<32x256xf32>
    %125 = arith.addf %123, %124 : vector<32x256xf32>
    %126 = arith.mulf %115, %71 : vector<32x256xf32>
    %127 = arith.mulf %107, %117 : vector<32x256xf32>
    %128 = arith.addf %126, %127 : vector<32x256xf32>
    %129 = math.tanh %128 : vector<32x256xf32>
    %130 = arith.mulf %125, %129 : vector<32x256xf32>
    %131 = vector.broadcast %15 : vector<32x1xf32> to vector<32x256xf32>
    %132 = arith.mulf %130, %131 : vector<32x256xf32>
    %cst_42 = arith.constant dense<0.000000e+00> : vector<256xf32>
    %133 = vector.multi_reduction <add>, %132, %cst_42 [0] : vector<32x256xf32> to vector<256xf32>
    %134 = vector.shape_cast %133 : vector<256xf32> to vector<1x256xf32>
    %135 = vector.broadcast %16 : vector<1x1xf32> to vector<1x256xf32>
    %136 = arith.addf %134, %135 : vector<1x256xf32>
    %137 = arith.addf %80, %136 : vector<1x256xf32>
    %c2_i32 = arith.constant 2 : i32
    %138 = vector.broadcast %137 : vector<1x256xf32> to vector<32x256xf32>
    %139 = arith.mulf %138, %20 : vector<32x256xf32>
    %140 = arith.addf %19, %139 : vector<32x256xf32>
    %cst_43 = arith.constant 0.000000e+00 : f32
    %141 = vector.broadcast %cst_43 : f32 to vector<32x256xf32>
    %142 = arith.maximumf %140, %141 : vector<32x256xf32>
    %cst_44 = arith.constant dense<0.000000e+00> : vector<32x256xf32>
    %143 = tpu.matmul %7, %142, %cst_44 {dimension_numbers = #tpu.dot_dimension_numbers<[1], [0], [0], [1], [0, 0, 1, 1], [], []>} : vector<32x32xf32>, vector<32x256xf32>, vector<32x256xf32> -> vector<32x256xf32>
    %144 = vector.broadcast %10 : vector<32x1xf32> to vector<32x256xf32>
    %145 = arith.addf %143, %144 : vector<32x256xf32>
    %cst_45 = arith.constant 0.000000e+00 : f32
    %146 = vector.broadcast %cst_45 : f32 to vector<32x256xf32>
    %147 = arith.maximumf %145, %146 : vector<32x256xf32>
    %cst_46 = arith.constant dense<0.000000e+00> : vector<32x256xf32>
    %148 = tpu.matmul %8, %147, %cst_46 {dimension_numbers = #tpu.dot_dimension_numbers<[1], [0], [0], [1], [0, 0, 1, 1], [], []>} : vector<32x32xf32>, vector<32x256xf32>, vector<32x256xf32> -> vector<32x256xf32>
    %149 = vector.broadcast %11 : vector<32x1xf32> to vector<32x256xf32>
    %150 = arith.addf %148, %149 : vector<32x256xf32>
    %cst_47 = arith.constant 0.000000e+00 : f32
    %151 = vector.broadcast %cst_47 : f32 to vector<32x256xf32>
    %152 = arith.maximumf %150, %151 : vector<32x256xf32>
    %153 = tpu.concatenate %152, %130 in 0 : vector<32x256xf32>, vector<32x256xf32> -> vector<64x256xf32>
    %cst_48 = arith.constant dense<0.000000e+00> : vector<128x256xf32>
    %154 = tpu.matmul %13, %153, %cst_48 {dimension_numbers = #tpu.dot_dimension_numbers<[1], [0], [0], [1], [0, 0, 1, 1], [], []>} : vector<128x64xf32>, vector<64x256xf32>, vector<128x256xf32> -> vector<128x256xf32>
    %155 = vector.broadcast %14 : vector<128x1xf32> to vector<128x256xf32>
    %156 = arith.addf %154, %155 : vector<128x256xf32>
    %157 = vector.extract_strided_slice %156 {offsets = [0, 0], sizes = [32, 256], strides = [1, 1]} : vector<128x256xf32> to vector<32x256xf32>
    %cst_49 = arith.constant 5.000000e-01 : f32
    %158 = vector.broadcast %cst_49 : f32 to vector<32x256xf32>
    %159 = arith.mulf %158, %157 : vector<32x256xf32>
    %160 = math.tanh %159 : vector<32x256xf32>
    %cst_50 = arith.constant 5.000000e-01 : f32
    %161 = vector.broadcast %cst_50 : f32 to vector<32x256xf32>
    %162 = arith.mulf %161, %160 : vector<32x256xf32>
    %cst_51 = arith.constant 5.000000e-01 : f32
    %163 = vector.broadcast %cst_51 : f32 to vector<32x256xf32>
    %164 = arith.addf %162, %163 : vector<32x256xf32>
    %165 = vector.extract_strided_slice %156 {offsets = [32, 0], sizes = [32, 256], strides = [1, 1]} : vector<128x256xf32> to vector<32x256xf32>
    %cst_52 = arith.constant 5.000000e-01 : f32
    %166 = vector.broadcast %cst_52 : f32 to vector<32x256xf32>
    %167 = arith.mulf %166, %165 : vector<32x256xf32>
    %168 = math.tanh %167 : vector<32x256xf32>
    %cst_53 = arith.constant 5.000000e-01 : f32
    %169 = vector.broadcast %cst_53 : f32 to vector<32x256xf32>
    %170 = arith.mulf %169, %168 : vector<32x256xf32>
    %cst_54 = arith.constant 5.000000e-01 : f32
    %171 = vector.broadcast %cst_54 : f32 to vector<32x256xf32>
    %172 = arith.addf %170, %171 : vector<32x256xf32>
    %173 = vector.extract_strided_slice %156 {offsets = [64, 0], sizes = [32, 256], strides = [1, 1]} : vector<128x256xf32> to vector<32x256xf32>
    %174 = math.tanh %173 : vector<32x256xf32>
    %175 = vector.extract_strided_slice %156 {offsets = [96, 0], sizes = [32, 256], strides = [1, 1]} : vector<128x256xf32> to vector<32x256xf32>
    %cst_55 = arith.constant 5.000000e-01 : f32
    %176 = vector.broadcast %cst_55 : f32 to vector<32x256xf32>
    %177 = arith.mulf %176, %175 : vector<32x256xf32>
    %178 = math.tanh %177 : vector<32x256xf32>
    %cst_56 = arith.constant 5.000000e-01 : f32
    %179 = vector.broadcast %cst_56 : f32 to vector<32x256xf32>
    %180 = arith.mulf %179, %178 : vector<32x256xf32>
    %cst_57 = arith.constant 5.000000e-01 : f32
    %181 = vector.broadcast %cst_57 : f32 to vector<32x256xf32>
    %182 = arith.addf %180, %181 : vector<32x256xf32>
    %183 = arith.mulf %172, %128 : vector<32x256xf32>
    %184 = arith.mulf %164, %174 : vector<32x256xf32>
    %185 = arith.addf %183, %184 : vector<32x256xf32>
    %186 = math.tanh %185 : vector<32x256xf32>
    %187 = arith.mulf %182, %186 : vector<32x256xf32>
    %188 = vector.broadcast %15 : vector<32x1xf32> to vector<32x256xf32>
    %189 = arith.mulf %187, %188 : vector<32x256xf32>
    %cst_58 = arith.constant dense<0.000000e+00> : vector<256xf32>
    %190 = vector.multi_reduction <add>, %189, %cst_58 [0] : vector<32x256xf32> to vector<256xf32>
    %191 = vector.shape_cast %190 : vector<256xf32> to vector<1x256xf32>
    %192 = vector.broadcast %16 : vector<1x1xf32> to vector<1x256xf32>
    %193 = arith.addf %191, %192 : vector<1x256xf32>
    %194 = arith.addf %137, %193 : vector<1x256xf32>
    %c3_i32 = arith.constant 3 : i32
    %195 = vector.broadcast %194 : vector<1x256xf32> to vector<32x256xf32>
    %196 = arith.mulf %195, %20 : vector<32x256xf32>
    %197 = arith.addf %19, %196 : vector<32x256xf32>
    %cst_59 = arith.constant 0.000000e+00 : f32
    %198 = vector.broadcast %cst_59 : f32 to vector<32x256xf32>
    %199 = arith.maximumf %197, %198 : vector<32x256xf32>
    %cst_60 = arith.constant dense<0.000000e+00> : vector<32x256xf32>
    %200 = tpu.matmul %7, %199, %cst_60 {dimension_numbers = #tpu.dot_dimension_numbers<[1], [0], [0], [1], [0, 0, 1, 1], [], []>} : vector<32x32xf32>, vector<32x256xf32>, vector<32x256xf32> -> vector<32x256xf32>
    %201 = vector.broadcast %10 : vector<32x1xf32> to vector<32x256xf32>
    %202 = arith.addf %200, %201 : vector<32x256xf32>
    %cst_61 = arith.constant 0.000000e+00 : f32
    %203 = vector.broadcast %cst_61 : f32 to vector<32x256xf32>
    %204 = arith.maximumf %202, %203 : vector<32x256xf32>
    %cst_62 = arith.constant dense<0.000000e+00> : vector<32x256xf32>
    %205 = tpu.matmul %8, %204, %cst_62 {dimension_numbers = #tpu.dot_dimension_numbers<[1], [0], [0], [1], [0, 0, 1, 1], [], []>} : vector<32x32xf32>, vector<32x256xf32>, vector<32x256xf32> -> vector<32x256xf32>
    %206 = vector.broadcast %11 : vector<32x1xf32> to vector<32x256xf32>
    %207 = arith.addf %205, %206 : vector<32x256xf32>
    %cst_63 = arith.constant 0.000000e+00 : f32
    %208 = vector.broadcast %cst_63 : f32 to vector<32x256xf32>
    %209 = arith.maximumf %207, %208 : vector<32x256xf32>
    %210 = tpu.concatenate %209, %187 in 0 : vector<32x256xf32>, vector<32x256xf32> -> vector<64x256xf32>
    %cst_64 = arith.constant dense<0.000000e+00> : vector<128x256xf32>
    %211 = tpu.matmul %13, %210, %cst_64 {dimension_numbers = #tpu.dot_dimension_numbers<[1], [0], [0], [1], [0, 0, 1, 1], [], []>} : vector<128x64xf32>, vector<64x256xf32>, vector<128x256xf32> -> vector<128x256xf32>
    %212 = vector.broadcast %14 : vector<128x1xf32> to vector<128x256xf32>
    %213 = arith.addf %211, %212 : vector<128x256xf32>
    %214 = vector.extract_strided_slice %213 {offsets = [0, 0], sizes = [32, 256], strides = [1, 1]} : vector<128x256xf32> to vector<32x256xf32>
    %cst_65 = arith.constant 5.000000e-01 : f32
    %215 = vector.broadcast %cst_65 : f32 to vector<32x256xf32>
    %216 = arith.mulf %215, %214 : vector<32x256xf32>
    %217 = math.tanh %216 : vector<32x256xf32>
    %cst_66 = arith.constant 5.000000e-01 : f32
    %218 = vector.broadcast %cst_66 : f32 to vector<32x256xf32>
    %219 = arith.mulf %218, %217 : vector<32x256xf32>
    %cst_67 = arith.constant 5.000000e-01 : f32
    %220 = vector.broadcast %cst_67 : f32 to vector<32x256xf32>
    %221 = arith.addf %219, %220 : vector<32x256xf32>
    %222 = vector.extract_strided_slice %213 {offsets = [32, 0], sizes = [32, 256], strides = [1, 1]} : vector<128x256xf32> to vector<32x256xf32>
    %cst_68 = arith.constant 5.000000e-01 : f32
    %223 = vector.broadcast %cst_68 : f32 to vector<32x256xf32>
    %224 = arith.mulf %223, %222 : vector<32x256xf32>
    %225 = math.tanh %224 : vector<32x256xf32>
    %cst_69 = arith.constant 5.000000e-01 : f32
    %226 = vector.broadcast %cst_69 : f32 to vector<32x256xf32>
    %227 = arith.mulf %226, %225 : vector<32x256xf32>
    %cst_70 = arith.constant 5.000000e-01 : f32
    %228 = vector.broadcast %cst_70 : f32 to vector<32x256xf32>
    %229 = arith.addf %227, %228 : vector<32x256xf32>
    %230 = vector.extract_strided_slice %213 {offsets = [64, 0], sizes = [32, 256], strides = [1, 1]} : vector<128x256xf32> to vector<32x256xf32>
    %231 = math.tanh %230 : vector<32x256xf32>
    %232 = vector.extract_strided_slice %213 {offsets = [96, 0], sizes = [32, 256], strides = [1, 1]} : vector<128x256xf32> to vector<32x256xf32>
    %cst_71 = arith.constant 5.000000e-01 : f32
    %233 = vector.broadcast %cst_71 : f32 to vector<32x256xf32>
    %234 = arith.mulf %233, %232 : vector<32x256xf32>
    %235 = math.tanh %234 : vector<32x256xf32>
    %cst_72 = arith.constant 5.000000e-01 : f32
    %236 = vector.broadcast %cst_72 : f32 to vector<32x256xf32>
    %237 = arith.mulf %236, %235 : vector<32x256xf32>
    %cst_73 = arith.constant 5.000000e-01 : f32
    %238 = vector.broadcast %cst_73 : f32 to vector<32x256xf32>
    %239 = arith.addf %237, %238 : vector<32x256xf32>
    %240 = arith.mulf %229, %185 : vector<32x256xf32>
    %241 = arith.mulf %221, %231 : vector<32x256xf32>
    %242 = arith.addf %240, %241 : vector<32x256xf32>
    %243 = math.tanh %242 : vector<32x256xf32>
    %244 = arith.mulf %239, %243 : vector<32x256xf32>
    %245 = vector.broadcast %15 : vector<32x1xf32> to vector<32x256xf32>
    %246 = arith.mulf %244, %245 : vector<32x256xf32>
    %cst_74 = arith.constant dense<0.000000e+00> : vector<256xf32>
    %247 = vector.multi_reduction <add>, %246, %cst_74 [0] : vector<32x256xf32> to vector<256xf32>
    %248 = vector.shape_cast %247 : vector<256xf32> to vector<1x256xf32>
    %249 = vector.broadcast %16 : vector<1x1xf32> to vector<1x256xf32>
    %250 = arith.addf %248, %249 : vector<1x256xf32>
    %251 = arith.addf %194, %250 : vector<1x256xf32>
    %252 = vector.broadcast %251 : vector<1x256xf32> to vector<32x256xf32>
    %253 = arith.mulf %252, %20 : vector<32x256xf32>
    %254 = arith.addf %19, %253 : vector<32x256xf32>
    %cst_75 = arith.constant 0.000000e+00 : f32
    %255 = vector.broadcast %cst_75 : f32 to vector<32x256xf32>
    %256 = arith.maximumf %254, %255 : vector<32x256xf32>
    %cst_76 = arith.constant dense<0.000000e+00> : vector<32x256xf32>
    %257 = tpu.matmul %7, %256, %cst_76 {dimension_numbers = #tpu.dot_dimension_numbers<[1], [0], [0], [1], [0, 0, 1, 1], [], []>} : vector<32x32xf32>, vector<32x256xf32>, vector<32x256xf32> -> vector<32x256xf32>
    %258 = vector.broadcast %10 : vector<32x1xf32> to vector<32x256xf32>
    %259 = arith.addf %257, %258 : vector<32x256xf32>
    %cst_77 = arith.constant 0.000000e+00 : f32
    %260 = vector.broadcast %cst_77 : f32 to vector<32x256xf32>
    %261 = arith.maximumf %259, %260 : vector<32x256xf32>
    %cst_78 = arith.constant dense<0.000000e+00> : vector<32x256xf32>
    %262 = tpu.matmul %8, %261, %cst_78 {dimension_numbers = #tpu.dot_dimension_numbers<[1], [0], [0], [1], [0, 0, 1, 1], [], []>} : vector<32x32xf32>, vector<32x256xf32>, vector<32x256xf32> -> vector<32x256xf32>
    %263 = vector.broadcast %11 : vector<32x1xf32> to vector<32x256xf32>
    %264 = arith.addf %262, %263 : vector<32x256xf32>
    %cst_79 = arith.constant 0.000000e+00 : f32
    %265 = vector.broadcast %cst_79 : f32 to vector<32x256xf32>
    %266 = arith.maximumf %264, %265 : vector<32x256xf32>
    %c0_80 = arith.constant 0 : index
    %c0_81 = arith.constant 0 : index
    %267 = vector.load %arg6[%c0_80, %c0_81] : memref<32x4xf32, #tpu.memory_space<vmem>>, vector<32x4xf32>
    %c0_82 = arith.constant 0 : index
    %c0_83 = arith.constant 0 : index
    %c0_84 = arith.constant 0 : index
    %268 = vector.load %arg5[%c0_82, %c0_83, %c0_84] : memref<4x32x32xf32, #tpu.memory_space<vmem>>, vector<1x32x32xf32>
    %269 = vector.shape_cast %268 : vector<1x32x32xf32> to vector<32x32xf32>
    %cst_85 = arith.constant dense<0.000000e+00> : vector<32x256xf32>
    %270 = tpu.matmul %269, %266, %cst_85 {dimension_numbers = #tpu.dot_dimension_numbers<[1], [0], [0], [1], [0, 0, 1, 1], [], []>} : vector<32x32xf32>, vector<32x256xf32>, vector<32x256xf32> -> vector<32x256xf32>
    %271 = vector.extract_strided_slice %267 {offsets = [0, 0], sizes = [32, 1], strides = [1, 1]} : vector<32x4xf32> to vector<32x1xf32>
    %272 = vector.broadcast %271 : vector<32x1xf32> to vector<32x256xf32>
    %273 = arith.addf %270, %272 : vector<32x256xf32>
    %cst_86 = arith.constant 0.000000e+00 : f32
    %274 = vector.broadcast %cst_86 : f32 to vector<32x256xf32>
    %275 = arith.maximumf %273, %274 : vector<32x256xf32>
    %c1 = arith.constant 1 : index
    %c0_87 = arith.constant 0 : index
    %c0_88 = arith.constant 0 : index
    %276 = vector.load %arg5[%c1, %c0_87, %c0_88] : memref<4x32x32xf32, #tpu.memory_space<vmem>>, vector<1x32x32xf32>
    %277 = vector.shape_cast %276 : vector<1x32x32xf32> to vector<32x32xf32>
    %cst_89 = arith.constant dense<0.000000e+00> : vector<32x256xf32>
    %278 = tpu.matmul %277, %275, %cst_89 {dimension_numbers = #tpu.dot_dimension_numbers<[1], [0], [0], [1], [0, 0, 1, 1], [], []>} : vector<32x32xf32>, vector<32x256xf32>, vector<32x256xf32> -> vector<32x256xf32>
    %279 = vector.extract_strided_slice %267 {offsets = [0, 1], sizes = [32, 1], strides = [1, 1]} : vector<32x4xf32> to vector<32x1xf32>
    %280 = vector.broadcast %279 : vector<32x1xf32> to vector<32x256xf32>
    %281 = arith.addf %278, %280 : vector<32x256xf32>
    %cst_90 = arith.constant 0.000000e+00 : f32
    %282 = vector.broadcast %cst_90 : f32 to vector<32x256xf32>
    %283 = arith.maximumf %281, %282 : vector<32x256xf32>
    %c2 = arith.constant 2 : index
    %c0_91 = arith.constant 0 : index
    %c0_92 = arith.constant 0 : index
    %284 = vector.load %arg5[%c2, %c0_91, %c0_92] : memref<4x32x32xf32, #tpu.memory_space<vmem>>, vector<1x32x32xf32>
    %285 = vector.shape_cast %284 : vector<1x32x32xf32> to vector<32x32xf32>
    %cst_93 = arith.constant dense<0.000000e+00> : vector<32x256xf32>
    %286 = tpu.matmul %285, %283, %cst_93 {dimension_numbers = #tpu.dot_dimension_numbers<[1], [0], [0], [1], [0, 0, 1, 1], [], []>} : vector<32x32xf32>, vector<32x256xf32>, vector<32x256xf32> -> vector<32x256xf32>
    %287 = vector.extract_strided_slice %267 {offsets = [0, 2], sizes = [32, 1], strides = [1, 1]} : vector<32x4xf32> to vector<32x1xf32>
    %288 = vector.broadcast %287 : vector<32x1xf32> to vector<32x256xf32>
    %289 = arith.addf %286, %288 : vector<32x256xf32>
    %cst_94 = arith.constant 0.000000e+00 : f32
    %290 = vector.broadcast %cst_94 : f32 to vector<32x256xf32>
    %291 = arith.maximumf %289, %290 : vector<32x256xf32>
    %c3 = arith.constant 3 : index
    %c0_95 = arith.constant 0 : index
    %c0_96 = arith.constant 0 : index
    %292 = vector.load %arg5[%c3, %c0_95, %c0_96] : memref<4x32x32xf32, #tpu.memory_space<vmem>>, vector<1x32x32xf32>
    %293 = vector.shape_cast %292 : vector<1x32x32xf32> to vector<32x32xf32>
    %cst_97 = arith.constant dense<0.000000e+00> : vector<32x256xf32>
    %294 = tpu.matmul %293, %291, %cst_97 {dimension_numbers = #tpu.dot_dimension_numbers<[1], [0], [0], [1], [0, 0, 1, 1], [], []>} : vector<32x32xf32>, vector<32x256xf32>, vector<32x256xf32> -> vector<32x256xf32>
    %295 = vector.extract_strided_slice %267 {offsets = [0, 3], sizes = [32, 1], strides = [1, 1]} : vector<32x4xf32> to vector<32x1xf32>
    %296 = vector.broadcast %295 : vector<32x1xf32> to vector<32x256xf32>
    %297 = arith.addf %294, %296 : vector<32x256xf32>
    %298 = vector.extract_strided_slice %297 {offsets = [0, 0], sizes = [3, 256], strides = [1, 1]} : vector<32x256xf32> to vector<3x256xf32>
    %299 = tpu.concatenate %298, %251 in 0 : vector<3x256xf32>, vector<1x256xf32> -> vector<4x256xf32>
    %c0_98 = arith.constant 0 : index
    %c0_99 = arith.constant 0 : index
    %c0_100 = arith.constant 0 : index
    %300 = vector.load %arg7[%c0_98, %c0_99, %c0_100] : memref<1x4x256xf32, #tpu.memory_space<vmem>>, vector<1x4x256xf32>
    %301 = vector.shape_cast %300 : vector<1x4x256xf32> to vector<4x256xf32>
    %302 = vector.shape_cast %299 : vector<4x256xf32> to vector<1x4x256xf32>
    tpu.vector_store %arg7[%c0_98, %c0_99, %c0_100], %302 {strides = array<i32>} : memref<1x4x256xf32, #tpu.memory_space<vmem>>, vector<1x4x256xf32>,
    return
  }
  func.func @transform_0(%arg0: i32, %arg1: i32) -> (i32, i32, i32) {
    %c0_i32 = arith.constant 0 : i32
    %c0_i32_0 = arith.constant 0 : i32
    return %arg1, %c0_i32, %arg0 : i32, i32, i32
  }
  func.func @transform_1(%arg0: i32, %arg1: i32) -> (i32, i32, i32) {
    %c0_i32 = arith.constant 0 : i32
    %c0_i32_0 = arith.constant 0 : i32
    %c0_i32_1 = arith.constant 0 : i32
    return %arg1, %c0_i32, %c0_i32_0 : i32, i32, i32
  }
  func.func @transform_2(%arg0: i32, %arg1: i32) -> (i32, i32) {
    %c0_i32 = arith.constant 0 : i32
    %c0_i32_0 = arith.constant 0 : i32
    %c0_i32_1 = arith.constant 0 : i32
    return %c0_i32, %c0_i32_0 : i32, i32
  }
  func.func @transform_3(%arg0: i32, %arg1: i32) -> (i32, i32, i32) {
    %c0_i32 = arith.constant 0 : i32
    %c0_i32_0 = arith.constant 0 : i32
    %c0_i32_1 = arith.constant 0 : i32
    %c0_i32_2 = arith.constant 0 : i32
    return %c0_i32, %c0_i32_0, %c0_i32_1 : i32, i32, i32
  }
  func.func @transform_4(%arg0: i32, %arg1: i32) -> (i32, i32) {
    %c0_i32 = arith.constant 0 : i32
    %c0_i32_0 = arith.constant 0 : i32
    %c0_i32_1 = arith.constant 0 : i32
    return %c0_i32, %c0_i32_0 : i32, i32
  }
  func.func @transform_5(%arg0: i32, %arg1: i32) -> (i32, i32, i32) {
    %c0_i32 = arith.constant 0 : i32
    %c0_i32_0 = arith.constant 0 : i32
    return %arg1, %c0_i32, %arg0 : i32, i32, i32
  }
}

</mosaic_0001>

<bundles_post_ra>
// kernel: tpu_custom_call.1
= control target key start
LH: loop header
LB: loop body
LE: loop exit
PB: predicated region body
PF: predicated region fallthrough
CT: control target
= control target key end

     0   :  { %10 = vsyncpa [#allocation3], 0  ;;  %s6268_s0 = inlined_call_operand.vmem [shape: f32[2,6,1024], index: 0, kind: input, shape index: {}]   ;;  %s6269_s1 = inlined_call_operand.vmem [shape: f32[2,32,70], index: 1, kind: input, shape index: {}]   ;;  %s6270_s2 = inlined_call_operand.vmem [shape: f32[128,66], index: 2, kind: input, shape index: {}]   ;;  %s6271_s3 = inlined_call_operand.vmem [shape: f32[4,32,32], index: 3, kind: input, shape index: {}]   ;;  %s6272_s4 = inlined_call_operand.vmem [shape: f32[32,4], index: 4, kind: input, shape index: {}]   ;;  %s6273_s5 = inlined_call_operand.hbm [shape: f32[2,4,1024], index: 5, kind: output, shape index: {}]  }
   0x1   :  { %12 = vsyncpa [#allocation3 + $0x1], 0  ;;  %s4728_s18 = smov 0   ;;  %s4730_s19 = smov 0  }
   0x2   :  { %s4732_s20 = smov 0   ;;  %s4734_s21 = smov 0  }
   0x3   :  { %s4736_s22 = smov 0   ;;  %s4738_s23 = smov 0  }
   0x4   :  { %s4740_s24 = smov 0   ;;  %s4742_s25 = smov 0  }
   0x5 LB: > { %s3807_s26 = sadd.s32 4294967295, %s4683_s25   ;;  %s3808_s27 = sadd.s32 4294967294, %s4683_s25   ;;  %s4683_s25 = sphi %s4742_s25, %s18_s25   ;;  %s4679_s24 = sphi %s4740_s24, %s6615_s24   ;;  %s4675_s23 = sphi %s4738_s23, %s6614_s23   ;;  %s4671_s22 = sphi %s4736_s22, %s6613_s22   ;;  %s4667_s21 = sphi %s4734_s21, %s6612_s21   ;;  %s4663_s20 = sphi %s4732_s20, %s6611_s20   ;;  %s4659_s19 = sphi %s4730_s19, %s6610_s19   ;;  %s4655_s18 = sphi %s4728_s18, %s6609_s18  }
   0x6   : > { %s27_s28 = sadd.s32 1, %s4675_s23  ;;  %s30_s29 = sadd.s32 1, %s4679_s24 }
   0x7   : > { %p28_p0 = scmp.ge.s32.totalorder %s27_s28, 2  ;;  %p166_p1 = scmp.ne.s32.totalorder %s4663_s20, %s4659_s19 }
   0x8   : > { %p167_p2 = scmp.eq.s32.totalorder %s3807_s26, 7  ;;  %p172_p5 = scmp.ne.s32.totalorder %s4659_s19, %s4655_s18 }
   0x9   : > { %s6617_s28 = smov (%p28_p0, %s27_s28), 0  ;;  %s6619_s29 = smov (!%p28_p0, %s30_s29), %s4679_s24 }
   0xa   : > { %s151_s30 = ssub.s32 %s4675_s23, %s6617_s28  ;;  %p4777_p3 = por %p167_p2, %p166_p1 }
   0xb   : > { %p32_p4 = scmp.ge.s32.totalorder %s6619_s29, 4  ;;  %p173_p6 = scmp.eq.s32.totalorder %s3808_s27, 7 }
   0xc   : > { %p3811_p7 = scmp.ge.s32.totalorder %s4683_s25, 1  ;;  %p221_p9 = scmp.lt.s32.totalorder %s4683_s25, 9 }
   0xd   : > { %s6621_s29 = smov (%p32_p4, %s6619_s29), 0  ;;  %p4786_p8 = por %p173_p6, %p172_p5 }
   0xe   : > { %s152_s8 = ssub.s32 %s4679_s24, %s6621_s29  ;;  %s156_s9 = sadd.s32 1, %s4663_s20 }
   0xf   : > { %s153_s10 = sor.u32 %s152_s8, %s151_s30  ;;  %p222_p10 = pnand %p3811_p7, %p221_p9 }
  0x10   : > { %p154_p11 = scmp.eq.s32.totalorder %s153_s10, 0 }
  0x11   : > { %225 = sbr.rel (%p222_p10) target bundleno = 4916 (0x1334), region = 40 }
  0x12   : > { %s4795_s11 = scalar_select %p154_p11, %s4663_s20, %s156_s9  }
  0x18   : > { %s4797_s12 = sshll.u32 %s4671_s22, 1  ;;  %p259_p12 = scmp.lt.s32.totalorder %s4667_s21, 1  ;;  %v6274_v0 = vmov 0.0   ;;  %v4686_v1 = vmov 67   ;;  %vm325_vm0 = vcmask 1042432   ;;  %vm316_vm1 = vcmask 23552  }
  0x19   : > { %p261_p13 = scmp.lt.s32.totalorder %s4797_s12, 7  ;;  %396 = vmatprep.mubr.f32.mxu0 %v6274_v0  ;;  %491 = vmatprep.mubr.f32.mxu1 %v6274_v0  ;;  %v4688_v10 = vmov 68   ;;  %vm564_vm2 = vcmask 261120   ;;  %vm879_vm3 = vcmask 523264   ;;  %s255_s26 = sand.u32 1, %s4659_s19  }
  0x1a   : > { %s260_s13 = scalar_select %p259_p12, %s4667_s21, 1  ;;  %4220 = vset.pattern.permute.xlu0 %v4686_v1  ;;  %4221 = vset.pattern.permute.xlu1 %v4686_v1 }
  0x1b   : > { %s262_s14 = scalar_select %p261_p13, %s4797_s12, 7 }
  0x1c   : > { %s3814_s15 = sshll.u32 %s260_s13, 3  ;;  %s3968_s16 = sshll.u32 %s260_s13, 5 }
  0x1d   : > { %s264_s17 = sadd.s32 %s3814_s15, %s262_s14  ;;  %s272_s27 = scalar_lea.vmem %s6269_s1, %s3968_s16 }
  0x1e   : > { %s3815_s30 = sshll.u32 %s264_s17, 3  ;;  %v4808_v2 = vld [vmem:[%s272_s27] sm:$0xff]  ;;  %v4810_v3 = vld [vmem:[%s272_s27 + $0x10] sm:$0xff]  ;;  %v4822_v8 = vld [vmem:[%s272_s27 + $0x8] sm:$0xff]  ;;  %s4687_s13 = smov 125  }
  0x1f   : > { %s266_s10 = scalar_lea.vmem %s6268_s0, %s3815_s30  ;;  %298 = vperm.xlu0 %4220, %v4808_v2   ;;  %308 = vperm.xlu1 %4221, %v4810_v3   ;;  %v4826_v9 = vld [vmem:[%s272_s27 + $0x18] sm:$0xff]  ;;  %s4689_s14 = smov 93  }
  0x20   : > { %v275_v4 = vld [vmem:[%s266_s10 + $0x8] sm:$0x3f]  ;;  %v274_v5 = vld [vmem:[%s266_s10] sm:$0x3f]  ;;  %s3964_s27 = sshll.u32 %s4667_s21, 3  ;;  %s3812_s30 = sshll.u32 %s255_s26, 3 }
  0x21   : > { %3818 = vmatprep.subr.msk.mxu0 %vm325_vm0, %v275_v4  ;;  %v421_v6 = vrot.slane %v274_v5, 3  ;;  %v422_v7 = vrot.slane %v275_v4, 3  ;;  %s3712_s8 = sadd.s32 %s3964_s27, %s4797_s12  ;;  %s257_s10 = scalar_lea.vmem [#allocation2], %s3812_s30 }
  0x22   : > { %3819 = vmatpush1.msk.msra.mxu0 %vm325_vm0, %v274_v5  ;;  %s3965_s9 = sshll.u32 %s3712_s8, 6  ;;  %s3700_s15 = scalar_lea.sflag [#allocation3], %s255_s26 }
  0x23   : > { %3820 = vmatmul.mubr.msk.f32.vlgmr.msra.gmra.mrb[0].mxu0 %vm316_vm1, %v4808_v2  ;;  %3824 = vmatprep.subr.msk.mxu1 %vm325_vm0, %v422_v7  ;;  %s4697_s17 = smov [#allocation2]  }
  0x24   : > { %3825 = vmatpush1.msk.msra.mxu1 %vm325_vm0, %v421_v6  ;;  %402 = vmatprep.mubr.f32.mxu0 %v6274_v0  ;;  %s4593_s22 = sshll.u32 %s4697_s17, 4  ;;  %s4594_s22 = int_to_ptr.vmem [resolvable:$false] %s4593_s22 }
  0x25   : > { %3826 = vmatmul.mubr.msk.f32.vlgmr.msra.gmra.mrb[0].mxu1 %vm316_vm1, %v4808_v2  ;;  %303 = vperm.xlu0 %4220, %v4822_v8   ;;  %s4595_s27 = scalar_lea.vmem %s4594_s22, 256 }
  0x26   : > { %497 = vmatprep.mubr.f32.mxu1 %v6274_v0  ;;  %313 = vperm.xlu1 %4221, %v4826_v9  }
  0x27   : > { %3821 = vmatmul.mubr.msk.f32.gmra.mrb[2].mxu0 %vm316_vm1, %v4822_v8 }
  0x28   : > { %408 = vmatprep.mubr.f32.mxu0 %v6274_v0 }
  0x29   : > { %3827 = vmatmul.mubr.msk.f32.gmra.mrb[2].mxu1 %vm316_vm1, %v4822_v8  ;;  %556 = vrot.lane.b32.xlu0 %v4808_v2, %s4687_s13 }
  0x2a   : > { %503 = vmatprep.mubr.f32.mxu1 %v6274_v0  ;;  %558 = vrot.lane.b32.xlu1 %v4822_v8, %s4687_s13 }
  0x2b   : > { %3822 = vmatmul.mubr.msk.f32.gmra.mrb[4].mxu0 %vm316_vm1, %v4810_v3  ;;  %4222 = vset.pattern.permute.xlu0 %v4688_v10 }
  0x2c   : > { %414 = vmatprep.mubr.f32.mxu0 %v6274_v0  ;;  %4223 = vset.pattern.permute.xlu1 %v4688_v10 }
  0x2d   : > { %3828 = vmatmul.mubr.msk.f32.gmra.mrb[4].mxu1 %vm316_vm1, %v4810_v3  ;;  %560 = vrot.lane.b32.xlu0 %v4810_v3, %s4687_s13 }
  0x2e   : > { %509 = vmatprep.mubr.f32.mxu1 %v6274_v0  ;;  %562 = vrot.lane.b32.xlu1 %v4826_v9, %s4687_s13  ;;  %s3716_s13 = sshll.u32 %s257_s10, 4  ;;  %s6217_s13 = int_to_ptr.vmem [resolvable:$true] %s3716_s13 }
  0x2f   : > { %3823 = vmatmul.mubr.msk.f32.gmra.mrb[6].mxu0 %vm316_vm1, %v4826_v9  ;;  %s4589_s16 = scalar_lea.vmem %s6217_s13, 128  ;;  %p4596_p4 = scmp.lt.s32.totalorder %s6217_s13, %s4594_s22 }
  0x30   : > { %637 = vmatprep.mubr.f32.mxu0 %v6274_v0  ;;  %p4590_p0 = scmp.ne.s32.totalorder %s6217_s13, %s4589_s16  ;;  %p4597_p5 = scmp.lt.s32.totalorder %s4595_s27, %s4589_s16 }
  0x31   : > { %3829 = vmatmul.mubr.msk.f32.gmra.mrb[6].mxu1 %vm316_vm1, %v4826_v9  ;;  %541 = vperm.xlu0 %4222, %v4808_v2  }
  0x32   : > { %766 = vmatprep.mubr.f32.mxu1 %v6274_v0  ;;  %545 = vperm.xlu1 %4223, %v4822_v8   ;;  %p4591_p1 = pnand %p4590_p0, %p4777_p3  ;;  %p4598_p6 = por %p4597_p5, %p4596_p4 }
  0x34   : > { %p4592_p2 = pneg %p4591_p1 }
  0x35   : > { %553 = vperm.xlu0 %4222, %v4826_v9  }
  0x36   : > { %549 = vperm.xlu1 %4223, %v4810_v3   ;;  %p4599_p7 = pnand %p4598_p6, %p4592_p2 }
  0x39   : > { %688 = vrot.lane.b32.xlu0 %v4822_v8, %s4689_s14 }
  0x3a   : > { %686 = vrot.lane.b32.xlu1 %v4808_v2, %s4689_s14 }
  0x3d   : > { %692 = vrot.lane.b32.xlu0 %v4826_v9, %s4689_s14 }
  0x3e   : > { %690 = vrot.lane.b32.xlu1 %v4810_v3, %s4689_s14  ;;  %s6215_s14 = scalar_lea.hbm %s6273_s5, %s3965_s9 }
  0x9e   : > { %v299_v11 = vpop.permute.xlu0 %298  ;;  %v309_v26 = vpop.permute.xlu1 %308 }
  0xa4   : > { %v304_v15 = vpop.permute.xlu0 %303 }
  0xa5   : > { %v314_v43 = vpop.permute.xlu1 %313 }
  0xa8   : > { %v4911_v6 = vpop.permute.xlu0 %556 }
  0xa9   : > { %v4915_v7 = vpop.permute.xlu1 %558 }
  0xac   : > { %v4920_v10 = vpop.permute.xlu0 %560 }
  0xf6   : > { %v398_v12 = vpop.f32.mrb[0].mxu0 }
  0xf7   : > { %v400_v13 = vpop.f32.mrb[1].mxu0  ;;  %v4865_v16 = vadd.f32 %v398_v12, %v299_v11  ;;  %v4690_v12 = vmov 69  }
  0xf8   : > { %v4863_v14 = vpop.f32.mrb[0].mxu1  ;;  %v4870_v19 = vadd.f32 %v400_v13, %v299_v11  ;;  %v4925_v11 = vpop.permute.xlu1 %562  ;;  %4224 = vset.pattern.permute.xlu1 %v4690_v12  ;;  %4225 = vset.pattern.permute.xlu0 %v4690_v12  ;;  %v5003_v12 = vld [vmem:[%s6270_s2 + $0x30] sm:$0xff] }
  0xf9   : > { %6415 = vst [vmem:[#allocation5_spill] sm:$0xff] %v4863_v14  ;;  %6416 = vst [vmem:[#allocation6_spill] sm:$0xff] %v4865_v16  ;;  %v516_v17 = vmul.f32 0.05, %v4863_v14  ;;  %v4868_v18 = vpop.f32.mrb[1].mxu1  ;;  %671 = vperm.xlu1 %4224, %v4808_v2   ;;  %675 = vperm.xlu0 %4225, %v4822_v8   ;;  %v4935_v13 = vpop.permute.xlu0 %541 }
  0xfa   : > { %6417 = vst [vmem:[#allocation7_spill] sm:$0xff] %v4868_v18  ;;  %v404_v20 = vpop.f32.mrb[2].mxu0  ;;  %v517_v21 = vmul.f32 0.05, %v4868_v18 }
  0xfb   : > { %v4873_v22 = vadd.f32 %v404_v20, %v304_v15  ;;  %v406_v23 = vpop.f32.mrb[3].mxu0  ;;  %v524_v29 = vadd.f32 %v516_v17, %v4865_v16 }
  0xfc   : > { %v4875_v24 = vadd.f32 %v406_v23, %v304_v15  ;;  %v4877_v25 = vpop.f32.mrb[2].mxu1  ;;  %v525_v32 = vadd.f32 %v517_v21, %v4870_v19  ;;  %v4937_v20 = vpop.permute.xlu1 %545 }
  0xfd   : > { %6418 = vst [vmem:[#allocation8_spill] sm:$0xff] %v4873_v22  ;;  %6419 = vst [vmem:[#allocation9_spill] sm:$0xff] %v4877_v25  ;;  %v518_v27 = vmul.f32 0.05, %v4877_v25  ;;  %v4880_v28 = vpop.f32.mrb[3].mxu1  ;;  %v532_v40 = vmax.f32 %v524_v29, 0.0  ;;  %679 = vperm.xlu1 %4224, %v4810_v3  }
  0xfe   : > { %6420 = vst [vmem:[#allocation10_spill] sm:$0xff] %v4880_v28  ;;  %v410_v30 = vpop.f32.mrb[4].mxu0  ;;  %v519_v31 = vmul.f32 0.05, %v4880_v28  ;;  %v533_v45 = vmax.f32 %v525_v32, 0.0 }
  0xff   : > { %v412_v33 = vpop.f32.mrb[5].mxu0  ;;  %v526_v34 = vadd.f32 %v518_v27, %v4873_v22  ;;  %v4889_v37 = vadd.f32 %v410_v30, %v309_v26 }
 0x100   : > { %v4886_v35 = vpop.f32.mrb[4].mxu1  ;;  %v527_v36 = vadd.f32 %v519_v31, %v4875_v24  ;;  %v4894_v42 = vadd.f32 %v412_v33, %v309_v26  ;;  %v4943_v31 = vpop.permute.xlu1 %549 }
 0x101   : > { %6421 = vst [vmem:[#allocation11_spill] sm:$0xff] %v4886_v35  ;;  %6422 = vst [vmem:[#allocation12_spill] sm:$0xff] %v4889_v37  ;;  %v520_v38 = vmul.f32 0.05, %v4886_v35  ;;  %v4892_v39 = vpop.f32.mrb[5].mxu1  ;;  %v534_v41 = vmax.f32 %v526_v34, 0.0  ;;  %683 = vperm.xlu1 %4224, %v4826_v9  }
 0x102   : > { %6423 = vst [vmem:[#allocation13_spill] sm:$0xff] %v4892_v39  ;;  %v416_v44 = vpop.f32.mrb[6].mxu0  ;;  %v535_v46 = vmax.f32 %v527_v36, 0.0  ;;  %v521_v47 = vmul.f32 0.05, %v4892_v39 }
 0x103   : > { %v418_v48 = vpop.f32.mrb[7].mxu0  ;;  %v3971_v49 = vpack.c.bf16 %v534_v41, %v532_v40  ;;  %v4899_v52 = vadd.f32 %v416_v44, %v314_v43  ;;  %v528_v55 = vadd.f32 %v520_v38, %v4889_v37  ;;  %v4946_v40 = vpop.permute.xlu0 %553 }
 0x104   : > { %v4897_v50 = vpop.f32.mrb[6].mxu1  ;;  %v3969_v51 = vpack.c.bf16 %v535_v46, %v533_v45  ;;  %v4905_v56 = vadd.f32 %v418_v48, %v314_v43  ;;  %v529_v58 = vadd.f32 %v521_v47, %v4894_v42 }
 0x105   : > { %6424 = vst [vmem:[#allocation14_spill] sm:$0xff] %v4897_v50  ;;  %v522_v53 = vmul.f32 0.05, %v4897_v50  ;;  %v4902_v54 = vpop.f32.mrb[7].mxu1  ;;  %v536_v61 = vmax.f32 %v528_v55, 0.0 }
 0x106   : > { %6425 = vst [vmem:[#allocation15_spill] sm:$0xff] %v4902_v54  ;;  %3970 = vmatprep.subr.bf16.mxu0 %v3969_v51  ;;  %v523_v57 = vmul.f32 0.05, %v4902_v54  ;;  %v537_v63 = vmax.f32 %v529_v58, 0.0 }
 0x107   : > { %3972 = vmatpush1.bf16.msra.mxu0 %v3971_v49  ;;  %v530_v59 = vadd.f32 %v522_v53, %v4899_v52  ;;  %v4955_v58 = vpop.permute.xlu0 %688 }
 0x108   : > { %v531_v60 = vadd.f32 %v523_v57, %v4905_v56  ;;  %v4951_v57 = vpop.permute.xlu1 %686  ;;  %6426 = vst [vmem:[#allocation16_spill] sm:$0xff] %v4955_v58 }
 0x109   : > { %v538_v62 = vmax.f32 %v530_v59, 0.0 }
 0x10a   : > { %v539_v1 = vmax.f32 %v531_v60, 0.0 }
 0x10b   : > { %v3975_v4 = vpack.c.bf16 %v538_v62, %v536_v61  ;;  %v4965_v60 = vpop.permute.xlu0 %692  ;;  %v4974_v61 = vld [vmem:[%s6270_s2] sm:$0xff]  ;;  %v4979_v62 = vld [vmem:[%s6270_s2 + $0x8] sm:$0xff] }
 0x10c   : > { %v3973_v5 = vpack.c.bf16 %v539_v1, %v537_v63  ;;  %v4960_v59 = vpop.permute.xlu1 %690  ;;  %6428 = vst [vmem:[#allocation18_spill] sm:$0xff] %v4965_v60  ;;  %v4691_v63 = vmov 64   ;;  %v4986_v1 = vld [vmem:[%s6270_s2 + $0x20] sm:$0xff] }
 0x10d   : > { %6427 = vst [vmem:[#allocation17_spill] sm:$0xff] %v4960_v59  ;;  %4227 = vset.pattern.permute.xlu1 %v4691_v63  ;;  %4226 = vset.pattern.permute.xlu0 %v4691_v63 }
 0x10e   : > { %3974 = vmatprep.subr.bf16.mxu0 %v3973_v5  ;;  %806 = vperm.xlu1 %4227, %v4979_v62   ;;  %v4998_v5 = vld [vmem:[%s6270_s2 + $0x10] sm:$0xff] }
 0x10f   : > { %3976 = vmatpush1.bf16.msra.mxu0 %v3975_v4  ;;  %801 = vperm.xlu0 %4226, %v4974_v61   ;;  %v4991_v4 = vld [vmem:[%s6270_s2 + $0x28] sm:$0xff] }
 0x112   : > { %3830 = vmatmul.mubr.msk.f32.vlgmr.msra.gmra.mrb[8].mxu0 %vm564_vm2, %v4911_v6  ;;  %821 = vperm.xlu1 %4227, %v4986_v1  }
 0x113   : > { %643 = vmatprep.mubr.f32.mxu0 %v6274_v0  ;;  %826 = vperm.xlu0 %4226, %v4991_v4  }
 0x116   : > { %3831 = vmatmul.mubr.msk.f32.gmra.mrb[10].mxu0 %vm564_vm2, %v4915_v7  ;;  %811 = vperm.xlu1 %4227, %v4998_v5  }
 0x117   : > { %649 = vmatprep.mubr.f32.mxu0 %v6274_v0  ;;  %831 = vperm.xlu0 %4226, %v5003_v12  }
 0x11a   : > { %3832 = vmatmul.mubr.msk.f32.gmra.mrb[12].mxu0 %vm564_vm2, %v4920_v10 }
 0x11b   : > { %655 = vmatprep.mubr.f32.mxu0 %v6274_v0 }
 0x11e   : > { %3833 = vmatmul.mubr.msk.f32.gmra.mrb[14].mxu0 %vm564_vm2, %v4925_v11 }
 0x11f   : > { %976 = vmatprep.mubr.f32.mxu0 %v6274_v0 }
 0x1e5   : > { %v639_v15 = vpop.f32.mrb[8].mxu0 }
 0x1e6   : > { %v641_v17 = vpop.f32.mrb[9].mxu0  ;;  %v640_v21 = vadd.f32 %v639_v15, %v4935_v13  ;;  %v5010_v15 = vld [vmem:[%s6270_s2 + $0x18] sm:$0xff] }
 0x1e7   : > { %v642_v23 = vadd.f32 %v641_v17, %v4935_v13  ;;  %v5015_v17 = vld [vmem:[%s6270_s2 + $0x38] sm:$0xff]  ;;  %816 = vperm.xlu1 %4227, %v5010_v15  }
 0x1e8   : > { %v662_v29 = vmax.f32 %v640_v21, 0.0  ;;  %836 = vperm.xlu0 %4226, %v5015_v17   ;;  %v5022_v21 = vld [vmem:[%s6270_s2 + $0x40] sm:$0xff] }
 0x1e9   : > { %v645_v26 = vpop.f32.mrb[10].mxu0  ;;  %v663_v30 = vmax.f32 %v642_v23, 0.0  ;;  %v5027_v23 = vld [vmem:[%s6270_s2 + $0x48] sm:$0xff] }
 0x1ea   : > { %v646_v27 = vadd.f32 %v645_v26, %v4937_v20  ;;  %v647_v2 = vpop.f32.mrb[11].mxu0  ;;  %v5034_v26 = vld [vmem:[%s6270_s2 + $0x50] sm:$0xff] }
 0x1eb   : > { %v648_v8 = vadd.f32 %v647_v2, %v4937_v20  ;;  %841 = vperm.xlu1 %4227, %v5022_v21   ;;  %v5046_v2 = vld [vmem:[%s6270_s2 + $0x60] sm:$0xff] }
 0x1ec   : > { %v664_v3 = vmax.f32 %v646_v27, 0.0  ;;  %846 = vperm.xlu0 %4226, %v5027_v23   ;;  %v5039_v27 = vld [vmem:[%s6270_s2 + $0x58] sm:$0xff] }
 0x1ed   : > { %v665_v9 = vmax.f32 %v648_v8, 0.0  ;;  %v651_v32 = vpop.f32.mrb[12].mxu0  ;;  %v5051_v8 = vld [vmem:[%s6270_s2 + $0x68] sm:$0xff] }
 0x1ee   : > { %v3979_v33 = vpack.c.bf16 %v664_v3, %v662_v29  ;;  %v653_v34 = vpop.f32.mrb[13].mxu0  ;;  %v652_v38 = vadd.f32 %v651_v32, %v4943_v31  ;;  %v5058_v29 = vld [vmem:[%s6270_s2 + $0x70] sm:$0xff]  ;;  %v5063_v3 = vld [vmem:[%s6270_s2 + $0x78] sm:$0xff] }
 0x1ef   : > { %v3977_v36 = vpack.c.bf16 %v665_v9, %v663_v30  ;;  %v654_v41 = vadd.f32 %v653_v34, %v4943_v31  ;;  %851 = vperm.xlu1 %4227, %v5034_v26   ;;  %v4692_v30 = vmov 65   ;;  %v5072_v9 = vpop.permute.xlu1 %671  ;;  %v5074_v34 = vpop.permute.xlu0 %675 }
 0x1f0   : > { %v666_v47 = vmax.f32 %v652_v38, 0.0  ;;  %856 = vperm.xlu0 %4226, %v5039_v27   ;;  %6429 = vst [vmem:[#allocation19_spill] sm:$0xff] %v5072_v9  ;;  %6430 = vst [vmem:[#allocation20_spill] sm:$0xff] %v5074_v34 }
 0x1f1   : > { %v657_v43 = vpop.f32.mrb[14].mxu0  ;;  %3978 = vmatprep.subr.bf16.mxu1 %v3977_v36  ;;  %v667_v49 = vmax.f32 %v654_v41, 0.0 }
 0x1f2   : > { %v658_v44 = vadd.f32 %v657_v43, %v4946_v40  ;;  %v659_v45 = vpop.f32.mrb[15].mxu0  ;;  %3980 = vmatpush1.bf16.msra.mxu1 %v3979_v33 }
 0x1f3   : > { %v660_v46 = vadd.f32 %v659_v45, %v4946_v40  ;;  %861 = vperm.xlu1 %4227, %v5046_v2   ;;  %v5079_v45 = vpop.permute.xlu1 %679 }
 0x1f4   : > { %v668_v48 = vmax.f32 %v658_v44, 0.0  ;;  %866 = vperm.xlu0 %4226, %v5051_v8   ;;  %6431 = vst [vmem:[#allocation21_spill] sm:$0xff] %v5079_v45 }
 0x1f5   : > { %v669_v51 = vmax.f32 %v660_v46, 0.0 }
 0x1f6   : > { %v3983_v53 = vpack.c.bf16 %v668_v48, %v666_v47 }
 0x1f7   : > { %v3981_v55 = vpack.c.bf16 %v669_v51, %v667_v49  ;;  %871 = vperm.xlu1 %4227, %v5058_v29  }
 0x1f8   : > { %876 = vperm.xlu0 %4226, %v5063_v3  }
 0x1f9   : > { %3982 = vmatprep.subr.bf16.mxu1 %v3981_v55 }
 0x1fa   : > { %3984 = vmatpush1.bf16.msra.mxu1 %v3983_v53 }
 0x1fb   : > { %4228 = vset.pattern.permute.xlu1 %v4692_v30 }
 0x1fc   : > { %4229 = vset.pattern.permute.xlu0 %v4692_v30  ;;  %1218 = vperm.xlu1 %4228, %v4974_v61  }
 0x1fd   : > { %3834 = vmatmul.mubr.msk.f32.vlgmr.msra.gmra.mrb[8].mxu1 %vm564_vm2, %v4951_v57  ;;  %1222 = vperm.xlu0 %4229, %v4979_v62  }
 0x1fe   : > { %772 = vmatprep.mubr.f32.mxu1 %v6274_v0 }
 0x200   : > { %1226 = vperm.xlu1 %4228, %v4998_v5  }
 0x201   : > { %3835 = vmatmul.mubr.msk.f32.gmra.mrb[10].mxu1 %vm564_vm2, %v4955_v58  ;;  %1260 = vperm.xlu0 %4229, %v4986_v1  }
 0x202   : > { %778 = vmatprep.mubr.f32.mxu1 %v6274_v0 }
 0x204   : > { %1230 = vperm.xlu1 %4228, %v5010_v15  }
 0x205   : > { %3836 = vmatmul.mubr.msk.f32.gmra.mrb[12].mxu1 %vm564_vm2, %v4960_v59 }
 0x206   : > { %784 = vmatprep.mubr.f32.mxu1 %v6274_v0 }
 0x209   : > { %3837 = vmatmul.mubr.msk.f32.gmra.mrb[14].mxu1 %vm564_vm2, %v4965_v60 }
 0x20a   : > { %1363 = vmatprep.mubr.f32.mxu1 %v6274_v0  ;;  %v5083_v0 = vpop.permute.xlu1 %683 }
 0x20b   : > { %6432 = vst [vmem:[#allocation22_spill] sm:$0xff] %v5083_v0 }
 0x2d0   : > { %v768_v32 = vpop.f32.mrb[8].mxu1 }
 0x2d1   : > { %v770_v33 = vpop.f32.mrb[9].mxu1  ;;  %v769_v36 = vadd.f32 %v768_v32, %v5072_v9 }
 0x2d2   : > { %v771_v38 = vadd.f32 %v770_v33, %v5072_v9 }
 0x2d3   : > { %v791_v47 = vmax.f32 %v769_v36, 0.0 }
 0x2d4   : > { %v774_v41 = vpop.f32.mrb[10].mxu1  ;;  %v792_v49 = vmax.f32 %v771_v38, 0.0 }
 0x2d5   : > { %v775_v43 = vadd.f32 %v774_v41, %v5074_v34  ;;  %v776_v44 = vpop.f32.mrb[11].mxu1 }
 0x2d6   : > { %v777_v46 = vadd.f32 %v776_v44, %v5074_v34 }
 0x2d7   : > { %v793_v48 = vmax.f32 %v775_v43, 0.0 }
 0x2d8   : > { %v794_v51 = vmax.f32 %v777_v46, 0.0  ;;  %v780_v53 = vpop.f32.mrb[12].mxu1 }
 0x2d9   : > { %v3987_v55 = vpack.c.bf16 %v793_v48, %v791_v47  ;;  %v782_v63 = vpop.f32.mrb[13].mxu1  ;;  %v781_v32 = vadd.f32 %v780_v53, %v5079_v45 }
 0x2da   : > { %v3985_v30 = vpack.c.bf16 %v794_v51, %v792_v49  ;;  %v783_v33 = vadd.f32 %v782_v63, %v5079_v45  ;;  %v6433_v49 = vmov 0.0  }
 0x2db   : > { %v795_v38 = vmax.f32 %v781_v32, 0.0 }
 0x2dc   : > { %v786_v41 = vpop.f32.mrb[14].mxu1  ;;  %3986 = vmatprep.subr.bf16.mxu0 %v3985_v30  ;;  %v796_v44 = vmax.f32 %v783_v33, 0.0 }
 0x2dd   : > { %v787_v9 = vadd.f32 %v786_v41, %v5083_v0  ;;  %v788_v60 = vpop.f32.mrb[15].mxu1  ;;  %3988 = vmatpush1.bf16.msra.mxu0 %v3987_v55 }
 0x2de   : > { %v789_v36 = vadd.f32 %v788_v60, %v5083_v0 }
 0x2df   : > { %v797_v43 = vmax.f32 %v787_v9, 0.0 }
 0x2e0   : > { %v798_v46 = vmax.f32 %v789_v36, 0.0 }
 0x2e1   : > { %v3991_v47 = vpack.c.bf16 %v797_v43, %v795_v38 }
 0x2e2   : > { %v3989_v48 = vpack.c.bf16 %v798_v46, %v796_v44 }
 0x2e4   : > { %3990 = vmatprep.subr.bf16.mxu0 %v3989_v48 }
 0x2e5   : > { %3992 = vmatpush1.bf16.msra.mxu0 %v3991_v47 }
 0x2e8   : > { %3838 = vmatmul.mubr.msk.f32.vlgmr.msra.gmra.mrb[16].mxu0 %vm879_vm3, %v4974_v61 }
 0x2e9   : > { %982 = vmatprep.mubr.f32.mxu0 %v6433_v49 }
 0x2ec   : > { %3839 = vmatmul.mubr.msk.f32.gmra.mrb[18].mxu0 %vm879_vm3, %v4979_v62  ;;  %v5136_v62 = vpop.permute.xlu1 %806 }
 0x2ed   : > { %988 = vmatprep.mubr.f32.mxu0 %v6433_v49  ;;  %6434 = vst [vmem:[#allocation23_spill] sm:$0xff] %v5136_v62 }
 0x2f0   : > { %3840 = vmatmul.mubr.msk.f32.gmra.mrb[20].mxu0 %vm879_vm3, %v4998_v5  ;;  %v5138_v5 = vpop.permute.xlu1 %821 }
 0x2f1   : > { %994 = vmatprep.mubr.f32.mxu0 %v6433_v49  ;;  %6435 = vst [vmem:[#allocation24_spill] sm:$0xff] %v5138_v5 }
 0x2f4   : > { %3841 = vmatmul.mubr.msk.f32.gmra.mrb[22].mxu0 %vm879_vm3, %v5010_v15 }
 0x2f5   : > { %1000 = vmatprep.mubr.f32.mxu0 %v6433_v49 }
 0x2f8   : > { %3842 = vmatmul.mubr.msk.f32.gmra.mrb[24].mxu0 %vm879_vm3, %v4986_v1 }
 0x2f9   : > { %1006 = vmatprep.mubr.f32.mxu0 %v6433_v49 }
 0x2fc   : > { %3843 = vmatmul.mubr.msk.f32.gmra.mrb[26].mxu0 %vm879_vm3, %v4991_v4 }
 0x2fd   : > { %1012 = vmatprep.mubr.f32.mxu0 %v6433_v49 }
 0x300   : > { %3844 = vmatmul.mubr.msk.f32.gmra.mrb[28].mxu0 %vm879_vm3, %v5003_v12 }
 0x301   : > { %1018 = vmatprep.mubr.f32.mxu0 %v6433_v49 }
 0x304   : > { %3845 = vmatmul.mubr.msk.f32.gmra.mrb[30].mxu0 %vm879_vm3, %v5015_v17  ;;  %v5140_v17 = vpop.permute.xlu0 %801 }
 0x305   : > { %1024 = vmatprep.mubr.f32.mxu0 %v6433_v49  ;;  %6436 = vst [vmem:[#allocation25_spill] sm:$0xff] %v5140_v17 }
 0x308   : > { %3846 = vmatmul.mubr.msk.f32.gmra.mrb[32].mxu0 %vm879_vm3, %v5022_v21 }
 0x309   : > { %1030 = vmatprep.mubr.f32.mxu0 %v6433_v49 }
 0x30c   : > { %3847 = vmatmul.mubr.msk.f32.gmra.mrb[34].mxu0 %vm879_vm3, %v5027_v23 }
 0x30d   : > { %1036 = vmatprep.mubr.f32.mxu0 %v6433_v49 }
 0x310   : > { %3848 = vmatmul.mubr.msk.f32.gmra.mrb[36].mxu0 %vm879_vm3, %v5034_v26 }
 0x311   : > { %1042 = vmatprep.mubr.f32.mxu0 %v6433_v49 }
 0x314   : > { %3849 = vmatmul.mubr.msk.f32.gmra.mrb[38].mxu0 %vm879_vm3, %v5039_v27 }
 0x315   : > { %1048 = vmatprep.mubr.f32.mxu0 %v6433_v49 }
 0x318   : > { %3850 = vmatmul.mubr.msk.f32.gmra.mrb[40].mxu0 %vm879_vm3, %v5046_v2  ;;  %v5144_v2 = vpop.permute.xlu1 %811 }
 0x319   : > { %1054 = vmatprep.mubr.f32.mxu0 %v6433_v49  ;;  %6437 = vst [vmem:[#allocation26_spill] sm:$0xff] %v5144_v2 }
 0x31c   : > { %3851 = vmatmul.mubr.msk.f32.gmra.mrb[42].mxu0 %vm879_vm3, %v5051_v8  ;;  %v5153_v36 = vpop.permute.xlu1 %816 }
 0x31d   : > { %1060 = vmatprep.mubr.f32.mxu0 %v6433_v49  ;;  %6439 = vst [vmem:[#allocation28_spill] sm:$0xff] %v5153_v36 }
 0x320   : > { %3852 = vmatmul.mubr.msk.f32.gmra.mrb[44].mxu0 %vm879_vm3, %v5058_v29 }
 0x321   : > { %1066 = vmatprep.mubr.f32.mxu0 %v6433_v49 }
 0x324   : > { %3853 = vmatmul.mubr.msk.f32.gmra.mrb[46].mxu0 %vm879_vm3, %v5063_v3  ;;  %v5148_v3 = vpop.permute.xlu0 %826 }
 0x325   : > { %1924 = vmatprep.mubr.f32.mxu0 %v6433_v49  ;;  %6438 = vst [vmem:[#allocation27_spill] sm:$0xff] %v5148_v3 }
 0x328   : > { %v5157_v48 = vpop.permute.xlu0 %831 }
 0x329   : > { %6440 = vst [vmem:[#allocation29_spill] sm:$0xff] %v5157_v48 }
 0x3bb   : > { %v978_v60 = vpop.f32.mrb[16].mxu0 }
 0x3bc   : > { %v980_v61 = vpop.f32.mrb[17].mxu0  ;;  %v979_v23 = vadd.f32 %v978_v60, %v5140_v17 }
 0x3bd   : > { %v981_v27 = vadd.f32 %v980_v61, %v5140_v17 }
 0x3be   : > { %v1073_v51 = vmul.f32 0.5, %v979_v23 }
 0x3bf   : > { %v984_v1 = vpop.f32.mrb[18].mxu0  ;;  %v1074_v63 = vmul.f32 0.5, %v981_v27 }
 0x3c0   : > { %v986_v4 = vpop.f32.mrb[19].mxu0  ;;  %v985_v8 = vadd.f32 %v984_v1, %v5136_v62  ;;  %4237 = vtanh.f32 %v1073_v51 }
 0x3c1   : > { %v987_v29 = vadd.f32 %v986_v4, %v5136_v62  ;;  %4239 = vtanh.f32 %v1074_v63 }
 0x3c2   : > { %v1075_v32 = vmul.f32 0.5, %v985_v8 }
 0x3c3   : > { %v990_v12 = vpop.f32.mrb[20].mxu0  ;;  %v1076_v41 = vmul.f32 0.5, %v987_v29 }
 0x3c4   : > { %v992_v15 = vpop.f32.mrb[21].mxu0  ;;  %v991_v33 = vadd.f32 %v990_v12, %v5144_v2  ;;  %4241 = vtanh.f32 %v1075_v32 }
 0x3c5   : > { %v993_v43 = vadd.f32 %v992_v15, %v5144_v2  ;;  %4243 = vtanh.f32 %v1076_v41 }
 0x3c6   : > { %v1077_v1 = vmul.f32 0.5, %v991_v33 }
 0x3c7   : > { %v996_v21 = vpop.f32.mrb[22].mxu0  ;;  %v1078_v27 = vmul.f32 0.5, %v993_v43 }
 0x3c8   : > { %v998_v26 = vpop.f32.mrb[23].mxu0  ;;  %v997_v4 = vadd.f32 %v996_v21, %v5153_v36 }
 0x3c9   : > { %v999_v29 = vadd.f32 %v998_v26, %v5153_v36 }
 0x3cb   : > { %v1002_v9 = vpop.f32.mrb[24].mxu0  ;;  %v1080_v41 = vmul.f32 0.5, %v999_v29 }
 0x3cc   : > { %v1003_v53 = vadd.f32 %v1002_v9, %v5138_v5  ;;  %v1004_v55 = vpop.f32.mrb[25].mxu0 }
 0x3cd   : > { %v1005_v30 = vadd.f32 %v1004_v55, %v5138_v5  ;;  %v5164_v55 = vpop.permute.xlu0 %836 }
 0x3ce   : > { %v1105_v44 = vmul.f32 0.5, %v1003_v53  ;;  %v1079_v53 = vmul.f32 0.5, %v997_v4  ;;  %6441 = vst [vmem:[#allocation30_spill] sm:$0xff] %v5164_v55 }
 0x3cf   : > { %v1008_v38 = vpop.f32.mrb[26].mxu0  ;;  %v1106_v60 = vmul.f32 0.5, %v1005_v30 }
 0x3d0   : > { %v1009_v46 = vadd.f32 %v1008_v38, %v5148_v3  ;;  %v1010_v47 = vpop.f32.mrb[27].mxu0  ;;  %4245 = vtanh.f32 %v1105_v44  ;;  %v4238_v38 = vpop.eup %4237 }
 0x3d1   : > { %v1011_v61 = vadd.f32 %v1010_v47, %v5148_v3  ;;  %4247 = vtanh.f32 %v1106_v60  ;;  %v4240_v43 = vpop.eup %4239  ;;  %v5168_v44 = vpop.permute.xlu1 %841 }
 0x3d2   : > { %v1107_v12 = vmul.f32 0.5, %v1009_v46  ;;  %4249 = vtanh.f32 %v1077_v1  ;;  %6442 = vst [vmem:[#allocation31_spill] sm:$0xff] %v5168_v44  ;;  %v4242_v47 = vpop.eup %4241 }
 0x3d3   : > { %v1014_v23 = vpop.f32.mrb[28].mxu0  ;;  %v1108_v9 = vmul.f32 0.5, %v1011_v61  ;;  %v4244_v4 = vpop.eup %4243 }
 0x3d4   : > { %v1015_v15 = vadd.f32 %v1014_v23, %v5157_v48  ;;  %v1016_v8 = vpop.f32.mrb[29].mxu0  ;;  %4251 = vtanh.f32 %v1107_v12 }
 0x3d5   : > { %v1017_v51 = vadd.f32 %v1016_v8, %v5157_v48  ;;  %4253 = vtanh.f32 %v1078_v27  ;;  %v5172_v8 = vpop.permute.xlu0 %846 }
 0x3d6   : > { %v1109_v21 = vmul.f32 0.5, %v1015_v15  ;;  %4255 = vtanh.f32 %v1108_v9  ;;  %6443 = vst [vmem:[#allocation32_spill] sm:$0xff] %v5172_v8 }
 0x3d7   : > { %v1020_v63 = vpop.f32.mrb[30].mxu0  ;;  %v1110_v30 = vmul.f32 0.5, %v1017_v51  ;;  %4257 = vtanh.f32 %v1079_v53 }
 0x3d8   : > { %v1021_v32 = vadd.f32 %v1020_v63, %v5164_v55  ;;  %v1022_v33 = vpop.f32.mrb[31].mxu0  ;;  %4259 = vtanh.f32 %v1109_v21  ;;  %v1089_v63 = vmul.f32 0.5, %v4238_v38 }
 0x3d9   : > { %v1023_v26 = vadd.f32 %v1022_v33, %v5164_v55  ;;  %4261 = vtanh.f32 %v1110_v30  ;;  %v5180_v2 = vpop.permute.xlu0 %856 }
 0x3da   : > { %v1111_v60 = vmul.f32 0.5, %v1021_v32  ;;  %4263 = vtanh.f32 %v1080_v41  ;;  %v4246_v27 = vpop.eup %4245  ;;  %v1090_v41 = vmul.f32 0.5, %v4240_v43  ;;  %6445 = vst [vmem:[#allocation34_spill] sm:$0xff] %v5180_v2 }
 0x3db   : > { %v1026_v46 = vpop.f32.mrb[32].mxu0  ;;  %v1112_v12 = vmul.f32 0.5, %v1023_v26  ;;  %v4248_v15 = vpop.eup %4247  ;;  %v1121_v30 = vmul.f32 0.5, %v4246_v27 }
 0x3dc   : > { %v1027_v61 = vadd.f32 %v1026_v46, %v5168_v44  ;;  %v1028_v1 = vpop.f32.mrb[33].mxu0  ;;  %v4250_v9 = vpop.eup %4249  ;;  %v1122_v26 = vmul.f32 0.5, %v4248_v15  ;;  %v1098_v15 = vadd.f32 0.5, %v1090_v41 }
 0x3dd   : > { %v1029_v23 = vadd.f32 %v1028_v1, %v5168_v44  ;;  %v5176_v1 = vpop.permute.xlu1 %851  ;;  %v1092_v44 = vmul.f32 0.5, %v4244_v4  ;;  %v1129_v48 = vadd.f32 0.5, %v1121_v30  ;;  %v5192_v45 = vpop.permute.xlu0 %866 }
 0x3de   : > { %4265 = vtanh.f32 %v1027_v61  ;;  %v4252_v21 = vpop.eup %4251  ;;  %v1091_v61 = vmul.f32 0.5, %v4242_v47  ;;  %6444 = vst [vmem:[#allocation33_spill] sm:$0xff] %v5176_v1  ;;  %6446 = vst [vmem:[#allocation35_spill] sm:$0xff] %v5192_v45 }
 0x3df   : > { %4267 = vtanh.f32 %v1029_v23  ;;  %v1032_v29 = vpop.f32.mrb[34].mxu0  ;;  %v4254_v33 = vpop.eup %4253  ;;  %v1177_v41 = vmul.f32 0.0, %v1129_v48 }
 0x3e0   : > { %4269 = vtanh.f32 %v1111_v60  ;;  %v1033_v51 = vadd.f32 %v1032_v29, %v5172_v8  ;;  %v1034_v53 = vpop.f32.mrb[35].mxu0  ;;  %v4256_v46 = vpop.eup %4255  ;;  %v1123_v29 = vmul.f32 0.5, %v4252_v21  ;;  %v1099_v36 = vadd.f32 0.5, %v1091_v61 }
 0x3e1   : > { %4271 = vtanh.f32 %v1112_v12  ;;  %v1035_v32 = vadd.f32 %v1034_v53, %v5172_v8  ;;  %v4258_v60 = vpop.eup %4257  ;;  %v1097_v12 = vadd.f32 0.5, %v1089_v63  ;;  %v1124_v8 = vmul.f32 0.5, %v4256_v46 }
 0x3e2   : > { %4273 = vtanh.f32 %v1033_v51  ;;  %v4260_v27 = vpop.eup %4259  ;;  %v1130_v51 = vadd.f32 0.5, %v1122_v26  ;;  %v1094_v3 = vmul.f32 0.5, %v4254_v33  ;;  %v1131_v5 = vadd.f32 0.5, %v1123_v29 }
 0x3e3   : > { %4275 = vtanh.f32 %v1035_v32  ;;  %v1038_v23 = vpop.f32.mrb[36].mxu0  ;;  %v4262_v43 = vpop.eup %4261  ;;  %v1093_v32 = vmul.f32 0.5, %v4250_v9  ;;  %v1125_v63 = vmul.f32 0.5, %v4260_v27  ;;  %v1132_v33 = vadd.f32 0.5, %v1124_v8 }
 0x3e4   : > { %v1039_v55 = vadd.f32 %v1038_v23, %v5176_v1  ;;  %v1040_v38 = vpop.f32.mrb[37].mxu0  ;;  %v4264_v47 = vpop.eup %4263  ;;  %v1100_v23 = vadd.f32 0.5, %v1092_v44  ;;  %v1126_v26 = vmul.f32 0.5, %v4262_v43  ;;  %v1178_v9 = vmul.f32 0.0, %v1130_v51 }
 0x3e5   : > { %v1041_v53 = vadd.f32 %v1040_v38, %v5176_v1  ;;  %v1101_v17 = vadd.f32 0.5, %v1093_v32  ;;  %v1102_v0 = vadd.f32 0.5, %v1094_v3  ;;  %v5184_v44 = vpop.permute.xlu1 %861  ;;  %v1179_v48 = vmul.f32 0.0, %v1131_v5 }
 0x3e6   : > { %4277 = vtanh.f32 %v1039_v55  ;;  %v1133_v43 = vadd.f32 0.5, %v1125_v63  ;;  %v1180_v32 = vmul.f32 0.0, %v1132_v33 }
 0x3e7   : > { %4279 = vtanh.f32 %v1041_v53  ;;  %v1044_v4 = vpop.f32.mrb[38].mxu0 }
 0x3e8   : > { %v4266_v21 = vpop.eup %4265  ;;  %v1045_v30 = vadd.f32 %v1044_v4, %v5180_v2  ;;  %v1046_v38 = vpop.f32.mrb[39].mxu0 }
 0x3e9   : > { %v4268_v1 = vpop.eup %4267  ;;  %v1185_v46 = vmul.f32 %v4266_v21, %v1097_v12  ;;  %v1047_v55 = vadd.f32 %v1046_v38, %v5180_v2  ;;  %v1096_v2 = vmul.f32 0.5, %v4264_v47 }
 0x3ea   : > { %v4270_v61 = vpop.eup %4269  ;;  %v1186_v62 = vmul.f32 %v4268_v1, %v1098_v15  ;;  %4281 = vtanh.f32 %v1045_v30  ;;  %v1134_v1 = vadd.f32 0.5, %v1126_v26 }
 0x3eb   : > { %v4272_v53 = vpop.eup %4271  ;;  %v5186_v29 = vadd.f32 %v1185_v46, %v1177_v41  ;;  %4283 = vtanh.f32 %v1047_v55  ;;  %v1050_v27 = vpop.f32.mrb[40].mxu0  ;;  %v1127_v15 = vmul.f32 0.5, %v4270_v61  ;;  %v1095_v55 = vmul.f32 0.5, %v4258_v60 }
 0x3ec   : > { %v4274_v4 = vpop.eup %4273  ;;  %v5188_v12 = vadd.f32 %v1186_v62, %v1178_v9  ;;  %v1051_v21 = vadd.f32 %v1050_v27, %v5184_v44  ;;  %v1052_v51 = vpop.f32.mrb[41].mxu0  ;;  %v1128_v38 = vmul.f32 0.5, %v4272_v53  ;;  %v1181_v27 = vmul.f32 0.0, %v1133_v43 }
 0x3ed   : > { %v4276_v8 = vpop.eup %4275  ;;  %v1187_v30 = vmul.f32 %v4274_v4, %v1099_v36  ;;  %v1053_v3 = vadd.f32 %v1052_v51, %v5184_v44  ;;  %v1182_v33 = vmul.f32 0.0, %v1134_v1  ;;  %v5201_v51 = vpop.permute.xlu1 %871 }
 0x3ee   : > { %v1188_v41 = vmul.f32 %v4276_v8, %v1100_v23  ;;  %v1145_v46 = vmul.f32 0.5, %v1051_v21  ;;  %v1135_v23 = vadd.f32 0.5, %v1127_v15  ;;  %v1136_v47 = vadd.f32 0.5, %v1128_v38  ;;  %6447 = vst [vmem:[#allocation36_spill] sm:$0xff] %v5201_v51 }
 0x3ef   : > { %v5194_v5 = vadd.f32 %v1187_v30, %v1179_v48  ;;  %v1146_v62 = vmul.f32 0.5, %v1053_v3  ;;  %v1056_v63 = vpop.f32.mrb[42].mxu0  ;;  %v1103_v21 = vadd.f32 0.5, %v1095_v55 }
 0x3f0   : > { %v4278_v9 = vpop.eup %4277  ;;  %v5196_v34 = vadd.f32 %v1188_v41, %v1180_v32  ;;  %4285 = vtanh.f32 %v1145_v46  ;;  %v1057_v36 = vadd.f32 %v1056_v63, %v5192_v45  ;;  %v1058_v26 = vpop.f32.mrb[43].mxu0  ;;  %v1104_v32 = vadd.f32 0.5, %v1096_v2 }
 0x3f1   : > { %v4280_v61 = vpop.eup %4279  ;;  %v1189_v53 = vmul.f32 %v4278_v9, %v1101_v17  ;;  %v1059_v60 = vadd.f32 %v1058_v26, %v5192_v45  ;;  %4287 = vtanh.f32 %v5186_v29  ;;  %v1183_v41 = vmul.f32 0.0, %v1135_v23  ;;  %v5211_v9 = vpop.permute.xlu0 %876 }
 0x3f2   : > { %v1190_v4 = vmul.f32 %v4280_v61, %v1102_v0  ;;  %v1147_v48 = vmul.f32 0.5, %v1057_v36  ;;  %4289 = vtanh.f32 %v1146_v62  ;;  %v1184_v55 = vmul.f32 0.0, %v1136_v47  ;;  %6450 = vst [vmem:[#allocation39_spill] sm:$0xff] %v5211_v9 }
 0x3f3   : > { %v5203_v43 = vadd.f32 %v1189_v53, %v1181_v27  ;;  %v1148_v8 = vmul.f32 0.5, %v1059_v60  ;;  %v1062_v30 = vpop.f32.mrb[44].mxu0 }
 0x3f4   : > { %v4282_v3 = vpop.eup %4281  ;;  %v5205_v1 = vadd.f32 %v1190_v4, %v1182_v33  ;;  %4291 = vtanh.f32 %v1147_v48  ;;  %v1063_v17 = vadd.f32 %v1062_v30, %v5201_v51  ;;  %v1064_v15 = vpop.f32.mrb[45].mxu0 }
 0x3f5   : > { %6448 = vst [vmem:[#allocation37_spill] sm:$0xff] %v5203_v43  ;;  %v4284_v38 = vpop.eup %4283  ;;  %4293 = vtanh.f32 %v5188_v12  ;;  %v1191_v0 = vmul.f32 %v4282_v3, %v1103_v21  ;;  %v1065_v46 = vadd.f32 %v1064_v15, %v5201_v51 }
 0x3f6   : > { %6449 = vst [vmem:[#allocation38_spill] sm:$0xff] %v5205_v1  ;;  %4295 = vtanh.f32 %v5194_v5  ;;  %v1192_v62 = vmul.f32 %v4284_v38, %v1104_v32  ;;  %v1149_v63 = vmul.f32 0.5, %v1063_v17 }
 0x3f7   : > { %v5213_v2 = vadd.f32 %v1191_v0, %v1183_v41  ;;  %4297 = vtanh.f32 %v1148_v8  ;;  %v1150_v27 = vmul.f32 0.5, %v1065_v46  ;;  %v1068_v36 = vpop.f32.mrb[46].mxu0  ;;  %v5223_v41 = vpop.permute.xlu1 %1218 }
 0x3f8   : > { %v5215_v26 = vadd.f32 %v1192_v62, %v1184_v55  ;;  %4299 = vtanh.f32 %v1149_v63  ;;  %v1069_v61 = vadd.f32 %v1068_v36, %v5211_v9  ;;  %v1070_v33 = vpop.f32.mrb[47].mxu0  ;;  %6453 = vst [vmem:[#allocation42_spill] sm:$0xff] %v5223_v41 }
 0x3f9   : > { %6451 = vst [vmem:[#allocation40_spill] sm:$0xff] %v5213_v2  ;;  %4301 = vtanh.f32 %v5196_v34  ;;  %v1071_v23 = vadd.f32 %v1070_v33, %v5211_v9 }
 0x3fa   : > { %6452 = vst [vmem:[#allocation41_spill] sm:$0xff] %v5215_v26  ;;  %v4286_v53 = vpop.eup %4285  ;;  %4303 = vtanh.f32 %v5203_v43  ;;  %v1151_v60 = vmul.f32 0.5, %v1069_v61 }
 0x3fb   : > { %v1161_v47 = vmul.f32 0.5, %v4286_v53  ;;  %4305 = vtanh.f32 %v1150_v27  ;;  %v1152_v4 = vmul.f32 0.5, %v1071_v23  ;;  %v4288_v48 = vpop.eup %4287  ;;  %v5228_v27 = vpop.permute.xlu0 %1222 }
 0x3fc   : > { %4307 = vtanh.f32 %v1151_v60  ;;  %v4290_v21 = vpop.eup %4289  ;;  %6454 = vst [vmem:[#allocation43_spill] sm:$0xff] %v5228_v27 }
 0x3fd   : > { %v1169_v8 = vadd.f32 0.5, %v1161_v47  ;;  %4309 = vtanh.f32 %v1152_v4  ;;  %v1162_v3 = vmul.f32 0.5, %v4290_v21 }
 0x3fe   : > { %v4292_v30 = vpop.eup %4291  ;;  %4311 = vtanh.f32 %v5205_v1 }
 0x3ff   : > { %v4294_v32 = vpop.eup %4293  ;;  %v1163_v17 = vmul.f32 0.5, %v4292_v30  ;;  %4313 = vtanh.f32 %v5213_v2  ;;  %v1170_v38 = vadd.f32 0.5, %v1162_v3  ;;  %v5226_v46 = vmul.f32 %v4288_v48, %v1169_v8 }
 0x400   : > { %v4296_v15 = vpop.eup %4295  ;;  %4315 = vtanh.f32 %v5215_v26 }
 0x401   : > { %v4298_v0 = vpop.eup %4297  ;;  %v1171_v55 = vadd.f32 0.5, %v1163_v17  ;;  %v5230_v61 = vmul.f32 %v4294_v32, %v1170_v38  ;;  %v1233_v21 = vmul.f32 %v5223_v41, %v5226_v46  ;;  %v5242_v17 = vpop.permute.xlu1 %1226 }
 0x402   : > { %v4300_v62 = vpop.eup %4299  ;;  %v1164_v63 = vmul.f32 0.5, %v4298_v0  ;;  %6455 = vst [vmem:[#allocation44_spill] sm:$0xff] %v5242_v17 }
 0x403   : > { %v4302_v36 = vpop.eup %4301  ;;  %v5232_v33 = vmul.f32 %v4296_v15, %v1171_v55  ;;  %v1165_v23 = vmul.f32 0.5, %v4300_v62  ;;  %v1234_v55 = vmul.f32 %v5223_v41, %v5230_v61 }
 0x404   : > { %v4304_v53 = vpop.eup %4303  ;;  %v1172_v60 = vadd.f32 0.5, %v1164_v63 }
 0x405   : > { %v4306_v47 = vpop.eup %4305  ;;  %v1173_v4 = vadd.f32 0.5, %v1165_v23  ;;  %v1235_v48 = vmul.f32 %v5228_v27, %v5232_v33 }
 0x406   : > { %v4308_v30 = vpop.eup %4307  ;;  %v5240_v3 = vmul.f32 %v4302_v36, %v1172_v60  ;;  %v1166_v32 = vmul.f32 0.5, %v4306_v47  ;;  %v5262_v36 = vpop.permute.xlu1 %1230 }
 0x407   : > { %v4310_v15 = vpop.eup %4309  ;;  %v5244_v38 = vmul.f32 %v4304_v53, %v1173_v4  ;;  %v1167_v0 = vmul.f32 0.5, %v4308_v30  ;;  %v1241_v62 = vadd.f32 %v1235_v48, %v1233_v21  ;;  %6456 = vst [vmem:[#allocation45_spill] sm:$0xff] %v5262_v36 }
 0x408   : > { %v1174_v63 = vadd.f32 0.5, %v1166_v32  ;;  %v1168_v23 = vmul.f32 0.5, %v4310_v15  ;;  %v1236_v9 = vmul.f32 %v5228_v27, %v5240_v3  ;;  %v4312_v60 = vpop.eup %4311 }
 0x409   : > { %v1175_v47 = vadd.f32 0.5, %v1167_v0  ;;  %v1237_v8 = vmul.f32 %v5242_v17, %v5244_v38  ;;  %v4314_v53 = vpop.eup %4313 }
 0x40a   : > { %v5254_v4 = vmul.f32 %v4312_v60, %v1174_v63  ;;  %v1176_v30 = vadd.f32 0.5, %v1168_v23  ;;  %v1250_v26 = vadd.f32 %v1236_v9, %v1234_v55  ;;  %v4316_v41 = vpop.eup %4315 }
 0x40b   : > { %v5256_v21 = vmul.f32 %v4314_v53, %v1175_v47  ;;  %v1242_v48 = vadd.f32 %v1241_v62, %v1237_v8 }
 0x40c   : > { %v5258_v32 = vmul.f32 %v4316_v41, %v1176_v30  ;;  %v1238_v15 = vmul.f32 %v5242_v17, %v5254_v4  ;;  %v1267_v17 = vlaneseq }
 0x40d   : > { %v1239_v0 = vmul.f32 %v5262_v36, %v5256_v21 }
 0x40e   : > { %v1240_v9 = vmul.f32 %v5262_v36, %v5258_v32  ;;  %v1251_v55 = vadd.f32 %v1250_v26, %v1238_v15  ;;  %v1268_v63 = vshrl.u32 %v1267_v17, 7  ;;  %v5272_v36 = vpop.permute.xlu0 %1260 }
 0x40f   : > { %v1243_v41 = vadd.f32 %v1242_v48, %v1239_v0 }
 0x410   : > { %v1252_v62 = vadd.f32 %v1251_v55, %v1240_v9  ;;  %v5275_v48 = vsub.s32 0, %v1268_v63 }
 0x411   : > { %v1244_v23 = vrot.slane %v1243_v41, 4 }
 0x412   : > { %v1253_v60 = vrot.slane %v1252_v62, 4 }
 0x413   : > { %v1245_v47 = vadd.f32 %v1244_v23, %v1243_v41 }
 0x414   : > { %v1254_v53 = vadd.f32 %v1253_v60, %v1252_v62 }
 0x415   : > { %v1246_v30 = vrot.slane %v1245_v47, 2 }
 0x416   : > { %v1255_v27 = vrot.slane %v1254_v53, 2 }
 0x417   : > { %v1247_v2 = vadd.f32 %v1246_v30, %v1245_v47 }
 0x418   : > { %v1256_v51 = vadd.f32 %v1255_v27, %v1254_v53 }
 0x419   : > { %v1248_v1 = vrot.slane %v1247_v2, 1 }
 0x41a   : > { %v1257_v45 = vrot.slane %v1256_v51, 1 }
 0x41b   : > { %v1249_v43 = vadd.f32 %v1248_v1, %v1247_v2 }
 0x41c   : > { %v1258_v26 = vadd.f32 %v1257_v45, %v1256_v51 }
 0x41d   : > { %v1263_v15 = vadd.f32 %v5272_v36, %v1249_v43 }
 0x41e   : > { %v1264_v0 = vadd.f32 %v5272_v36, %v1258_v26 }
 0x41f   : > { %v5278_v9 = vadd.f32 0.05, %v1263_v15 }
 0x420   : > { %v5280_v55 = vadd.f32 0.05, %v1264_v0 }
 0x421   : > { %v1270_v27 = vrot.slane %v5278_v9, %v5275_v48 }
 0x422   : > { %v1274_v17 = vrot.slane %v5280_v55, %v5275_v48 }
 0x423   : > { %v1275_v1 = vmul.f32 %v1270_v27, %v4863_v14  ;;  %v1277_v45 = vmul.f32 %v1270_v27, %v4877_v25  ;;  %v1279_v51 = vmul.f32 %v1270_v27, %v4886_v35  ;;  %v1281_v43 = vmul.f32 %v1270_v27, %v4897_v50 }
 0x424   : > { %v1276_v2 = vmul.f32 %v1274_v17, %v4868_v18  ;;  %v1278_v63 = vmul.f32 %v1274_v17, %v4880_v28  ;;  %v1280_v41 = vmul.f32 %v1274_v17, %v4892_v39  ;;  %v1282_v62 = vmul.f32 %v1274_v17, %v4902_v54 }
 0x425   : > { %v1283_v23 = vadd.f32 %v1275_v1, %v4865_v16  ;;  %v1285_v60 = vadd.f32 %v1277_v45, %v4873_v22  ;;  %v1287_v47 = vadd.f32 %v1279_v51, %v4889_v37  ;;  %v1289_v53 = vadd.f32 %v1281_v43, %v4899_v52 }
 0x426   : > { %v1284_v30 = vadd.f32 %v1276_v2, %v4870_v19  ;;  %v1286_v26 = vadd.f32 %v1278_v63, %v4875_v24  ;;  %v1288_v15 = vadd.f32 %v1280_v41, %v4894_v42  ;;  %v1290_v0 = vadd.f32 %v1282_v62, %v4905_v56 }
 0x427   : > { %v1291_v27 = vmax.f32 %v1283_v23, 0.0  ;;  %v1293_v8 = vmax.f32 %v1285_v60, 0.0  ;;  %v1295_v39 = vmax.f32 %v1287_v47, 0.0  ;;  %v1297_v17 = vmax.f32 %v1289_v53, 0.0 }
 0x428   : > { %v1292_v54 = vmax.f32 %v1284_v30, 0.0  ;;  %v1294_v1 = vmax.f32 %v1286_v26, 0.0  ;;  %v1296_v16 = vmax.f32 %v1288_v15, 0.0  ;;  %v1298_v45 = vmax.f32 %v1290_v0, 0.0 }
 0x429   : > { %v3995_v22 = vpack.c.bf16 %v1293_v8, %v1291_v27  ;;  %v3999_v51 = vpack.c.bf16 %v1297_v17, %v1295_v39 }
 0x42a   : > { %v3993_v37 = vpack.c.bf16 %v1294_v1, %v1292_v54  ;;  %v3997_v43 = vpack.c.bf16 %v1298_v45, %v1296_v16 }
 0x42c   : > { %3994 = vmatprep.subr.bf16.mxu1 %v3993_v37 }
 0x42d   : > { %3996 = vmatpush1.bf16.msra.mxu1 %v3995_v22 }
 0x42e   : > { %3998 = vmatprep.subr.bf16.mxu1 %v3997_v43 }
 0x431   : > { %4000 = vmatpush1.bf16.msra.mxu1 %v3999_v51 }
 0x434   : > { %3854 = vmatmul.mubr.msk.f32.vlgmr.msra.gmra.mrb[16].mxu1 %vm564_vm2, %v4911_v6 }
 0x435   : > { %1369 = vmatprep.mubr.f32.mxu1 %v6433_v49 }
 0x438   : > { %3855 = vmatmul.mubr.msk.f32.gmra.mrb[18].mxu1 %vm564_vm2, %v4915_v7 }
 0x439   : > { %1375 = vmatprep.mubr.f32.mxu1 %v6433_v49 }
 0x43c   : > { %3856 = vmatmul.mubr.msk.f32.gmra.mrb[20].mxu1 %vm564_vm2, %v4920_v10 }
 0x43d   : > { %1381 = vmatprep.mubr.f32.mxu1 %v6433_v49 }
 0x440   : > { %3857 = vmatmul.mubr.msk.f32.gmra.mrb[22].mxu1 %vm564_vm2, %v4925_v11 }
 0x441   : > { %1460 = vmatprep.mubr.f32.mxu1 %v6433_v49 }
 0x507   : > { %v1365_v16 = vpop.f32.mrb[16].mxu1 }
 0x508   : > { %v1367_v22 = vpop.f32.mrb[17].mxu1  ;;  %v1366_v37 = vadd.f32 %v1365_v16, %v4935_v13 }
 0x509   : > { %v1368_v39 = vadd.f32 %v1367_v22, %v4935_v13 }
 0x50a   : > { %v1388_v41 = vmax.f32 %v1366_v37, 0.0 }
 0x50b   : > { %v1371_v54 = vpop.f32.mrb[18].mxu1  ;;  %v1389_v23 = vmax.f32 %v1368_v39, 0.0 }
 0x50c   : > { %v1372_v8 = vadd.f32 %v1371_v54, %v4937_v20  ;;  %v1373_v2 = vpop.f32.mrb[19].mxu1  ;;  %v6457_v54 = vld [vmem:[#allocation18_spill] sm:$0xff] }
 0x50d   : > { %v1374_v63 = vadd.f32 %v1373_v2, %v4937_v20 }
 0x50e   : > { %v1390_v62 = vmax.f32 %v1372_v8, 0.0 }
 0x50f   : > { %v1391_v60 = vmax.f32 %v1374_v63, 0.0  ;;  %v1377_v47 = vpop.f32.mrb[20].mxu1  ;;  %v6458_v63 = vld [vmem:[#allocation19_spill] sm:$0xff] }
 0x510   : > { %v4003_v53 = vpack.c.bf16 %v1390_v62, %v1388_v41  ;;  %v1379_v30 = vpop.f32.mrb[21].mxu1  ;;  %v1378_v15 = vadd.f32 %v1377_v47, %v4943_v31 }
 0x511   : > { %v4001_v26 = vpack.c.bf16 %v1391_v60, %v1389_v23  ;;  %v1380_v0 = vadd.f32 %v1379_v30, %v4943_v31  ;;  %v6459_v60 = vld [vmem:[#allocation20_spill] sm:$0xff] }
 0x512   : > { %v1392_v51 = vmax.f32 %v1378_v15, 0.0 }
 0x513   : > { %v1383_v27 = vpop.f32.mrb[22].mxu1  ;;  %4002 = vmatprep.subr.bf16.mxu1 %v4001_v26  ;;  %v1393_v16 = vmax.f32 %v1380_v0, 0.0 }
 0x514   : > { %v1384_v17 = vadd.f32 %v1383_v27, %v4946_v40  ;;  %v1385_v1 = vpop.f32.mrb[23].mxu1  ;;  %4004 = vmatpush1.bf16.msra.mxu1 %v4003_v53 }
 0x515   : > { %v1386_v45 = vadd.f32 %v1385_v1, %v4946_v40 }
 0x516   : > { %v1394_v43 = vmax.f32 %v1384_v17, 0.0 }
 0x517   : > { %v1395_v22 = vmax.f32 %v1386_v45, 0.0 }
 0x518   : > { %v4007_v37 = vpack.c.bf16 %v1394_v43, %v1392_v51  ;;  %v6460_v43 = vld [vmem:[#allocation21_spill] sm:$0xff] }
 0x519   : > { %v4005_v39 = vpack.c.bf16 %v1395_v22, %v1393_v16 }
 0x51b   : > { %4006 = vmatprep.subr.bf16.mxu1 %v4005_v39  ;;  %v6461_v39 = vld [vmem:[#allocation22_spill] sm:$0xff] }
 0x51c   : > { %4008 = vmatpush1.bf16.msra.mxu1 %v4007_v37 }
 0x51f   : > { %3858 = vmatmul.mubr.msk.f32.vlgmr.msra.gmra.mrb[24].mxu1 %vm564_vm2, %v4951_v57 }
 0x520   : > { %1466 = vmatprep.mubr.f32.mxu1 %v6433_v49 }
 0x523   : > { %3859 = vmatmul.mubr.msk.f32.gmra.mrb[26].mxu1 %vm564_vm2, %v4955_v58 }
 0x524   : > { %1472 = vmatprep.mubr.f32.mxu1 %v6433_v49 }
 0x527   : > { %3860 = vmatmul.mubr.msk.f32.gmra.mrb[28].mxu1 %vm564_vm2, %v4960_v59 }
 0x528   : > { %1478 = vmatprep.mubr.f32.mxu1 %v6433_v49 }
 0x52b   : > { %3861 = vmatmul.mubr.msk.f32.gmra.mrb[30].mxu1 %vm564_vm2, %v6457_v54  ;;  %v6493_v54 = vld [vmem:[#allocation34_spill] sm:$0xff] }
 0x52c   : > { %1557 = vmatprep.mubr.f32.mxu1 %v6433_v49 }
 0x5f2   : > { %v1462_v8 = vpop.f32.mrb[24].mxu1 }
 0x5f3   : > { %v1464_v2 = vpop.f32.mrb[25].mxu1  ;;  %v1463_v41 = vadd.f32 %v1462_v8, %v6458_v63 }
 0x5f4   : > { %v1465_v62 = vadd.f32 %v1464_v2, %v6458_v63 }
 0x5f5   : > { %v1485_v26 = vmax.f32 %v1463_v41, 0.0 }
 0x5f6   : > { %v1468_v23 = vpop.f32.mrb[26].mxu1  ;;  %v1486_v0 = vmax.f32 %v1465_v62, 0.0 }
 0x5f7   : > { %v1469_v47 = vadd.f32 %v1468_v23, %v6459_v60  ;;  %v1470_v53 = vpop.f32.mrb[27].mxu1 }
 0x5f8   : > { %v1471_v30 = vadd.f32 %v1470_v53, %v6459_v60 }
 0x5f9   : > { %v1487_v15 = vmax.f32 %v1469_v47, 0.0 }
 0x5fa   : > { %v1488_v27 = vmax.f32 %v1471_v30, 0.0  ;;  %v1474_v17 = vpop.f32.mrb[28].mxu1 }
 0x5fb   : > { %v4011_v1 = vpack.c.bf16 %v1487_v15, %v1485_v26  ;;  %v1476_v45 = vpop.f32.mrb[29].mxu1  ;;  %v1475_v16 = vadd.f32 %v1474_v17, %v6460_v43  ;;  %v6462_v15 = vpack.c.bf16 %v5240_v3, %v5230_v61  ;;  %v6465_v17 = vpack.c.bf16 %v5256_v21, %v5244_v38  ;;  %v5373_v61 = vld [vmem:[%s6270_s2 + $0x10] sm:$0xff]  ;;  %v5389_v3 = vld [vmem:[%s6270_s2 + $0x20] sm:$0xff]  ;;  %v5397_v38 = vld [vmem:[%s6270_s2 + $0x28] sm:$0xff] }
 0x5fc   : > { %v4009_v51 = vpack.c.bf16 %v1488_v27, %v1486_v0  ;;  %v1477_v22 = vadd.f32 %v1476_v45, %v6460_v43  ;;  %v6463_v0 = vpack.c.bf16 %v5232_v33, %v5226_v46  ;;  %v6464_v27 = vpack.c.bf16 %v5258_v32, %v5254_v4  ;;  %v5365_v46 = vld [vmem:[%s6270_s2 + $0x8] sm:$0xff]  ;;  %6468 = vst [vmem:[#allocation48_spill] sm:$0xff] %v5373_v61  ;;  %v5381_v33 = vld [vmem:[%s6270_s2 + $0x18] sm:$0xff]  ;;  %v5405_v4 = vld [vmem:[%s6270_s2 + $0x30] sm:$0xff] }
 0x5fd   : > { %v1489_v41 = vmax.f32 %v1475_v16, 0.0  ;;  %6467 = vst [vmem:[#allocation47_spill] sm:$0xff] %v5365_v46  ;;  %6469 = vst [vmem:[#allocation49_spill] sm:$0xff] %v5381_v33  ;;  %v5413_v21 = vld [vmem:[%s6270_s2 + $0x38] sm:$0xff]  ;;  %v5421_v32 = vld [vmem:[%s6270_s2 + $0x40] sm:$0xff] }
 0x5fe   : > { %v1480_v37 = vpop.f32.mrb[30].mxu1  ;;  %4010 = vmatprep.subr.bf16.mxu1 %v4009_v51  ;;  %v1490_v62 = vmax.f32 %v1477_v22, 0.0  ;;  %6470 = vst [vmem:[#allocation50_spill] sm:$0xff] %v5389_v3  ;;  %6471 = vst [vmem:[#allocation51_spill] sm:$0xff] %v5397_v38  ;;  %v5429_v45 = vld [vmem:[%s6270_s2 + $0x48] sm:$0xff]  ;;  %v5437_v51 = vld [vmem:[%s6270_s2 + $0x50] sm:$0xff] }
 0x5ff   : > { %v1481_v8 = vadd.f32 %v1480_v37, %v6461_v39  ;;  %v1482_v2 = vpop.f32.mrb[31].mxu1  ;;  %4012 = vmatpush1.bf16.msra.mxu1 %v4011_v1  ;;  %v5357_v1 = vld [vmem:[%s6270_s2] sm:$0xff]  ;;  %6472 = vst [vmem:[#allocation52_spill] sm:$0xff] %v5405_v4  ;;  %6473 = vst [vmem:[#allocation53_spill] sm:$0xff] %v5413_v21  ;;  %v5445_v16 = vld [vmem:[%s6270_s2 + $0x58] sm:$0xff] }
 0x600   : > { %v1483_v23 = vadd.f32 %v1482_v2, %v6461_v39  ;;  %6466 = vst [vmem:[#allocation46_spill] sm:$0xff] %v5357_v1  ;;  %6474 = vst [vmem:[#allocation54_spill] sm:$0xff] %v5421_v32  ;;  %v5453_v22 = vld [vmem:[%s6270_s2 + $0x60] sm:$0xff]  ;;  %v5461_v37 = vld [vmem:[%s6270_s2 + $0x68] sm:$0xff] }
 0x601   : > { %v1491_v47 = vmax.f32 %v1481_v8, 0.0  ;;  %6475 = vst [vmem:[#allocation55_spill] sm:$0xff] %v5429_v45  ;;  %6476 = vst [vmem:[#allocation56_spill] sm:$0xff] %v5437_v51  ;;  %v5469_v8 = vld [vmem:[%s6270_s2 + $0x70] sm:$0xff]  ;;  %v5477_v2 = vld [vmem:[%s6270_s2 + $0x78] sm:$0xff] }
 0x602   : > { %v1492_v53 = vmax.f32 %v1483_v23, 0.0  ;;  %6477 = vst [vmem:[#allocation57_spill] sm:$0xff] %v5445_v16  ;;  %6478 = vst [vmem:[#allocation58_spill] sm:$0xff] %v5453_v22 }
 0x603   : > { %v4015_v30 = vpack.c.bf16 %v1491_v47, %v1489_v41  ;;  %6479 = vst [vmem:[#allocation59_spill] sm:$0xff] %v5461_v37  ;;  %6480 = vst [vmem:[#allocation60_spill] sm:$0xff] %v5469_v8 }
 0x604   : > { %v4013_v26 = vpack.c.bf16 %v1492_v53, %v1490_v62  ;;  %6481 = vst [vmem:[#allocation61_spill] sm:$0xff] %v5477_v2 }
 0x606   : > { %4014 = vmatprep.subr.bf16.mxu1 %v4013_v26 }
 0x607   : > { %4016 = vmatpush1.bf16.msra.mxu1 %v4015_v30 }
 0x608   : > { %4018 = vmatprep.subr.bf16.mxu1 %v6462_v15  ;;  %v6482_v15 = vld [vmem:[#allocation25_spill] sm:$0xff] }
 0x60b   : > { %4020 = vmatpush1.bf16.msra.mxu1 %v6463_v0 }
 0x60c   : > { %4022 = vmatprep.subr.bf16.mxu1 %v6464_v27 }
 0x60f   : > { %4024 = vmatpush1.bf16.msra.mxu1 %v6465_v17 }
 0x612   : > { %3862 = vmatmul.mubr.msk.f32.vlgmr.msra.gmra.mrb[32].mxu1 %vm879_vm3, %v5357_v1 }
 0x613   : > { %1563 = vmatprep.mubr.f32.mxu1 %v6433_v49 }
 0x616   : > { %3863 = vmatmul.mubr.msk.f32.gmra.mrb[34].mxu1 %vm879_vm3, %v5365_v46 }
 0x617   : > { %1569 = vmatprep.mubr.f32.mxu1 %v6433_v49 }
 0x61a   : > { %3864 = vmatmul.mubr.msk.f32.gmra.mrb[36].mxu1 %vm879_vm3, %v5373_v61 }
 0x61b   : > { %1575 = vmatprep.mubr.f32.mxu1 %v6433_v49 }
 0x61e   : > { %3865 = vmatmul.mubr.msk.f32.gmra.mrb[38].mxu1 %vm879_vm3, %v5381_v33 }
 0x61f   : > { %1581 = vmatprep.mubr.f32.mxu1 %v6433_v49 }
 0x622   : > { %3866 = vmatmul.mubr.msk.f32.gmra.mrb[40].mxu1 %vm879_vm3, %v5389_v3  ;;  %v6485_v3 = vld [vmem:[#allocation26_spill] sm:$0xff] }
 0x623   : > { %1587 = vmatprep.mubr.f32.mxu1 %v6433_v49 }
 0x626   : > { %3867 = vmatmul.mubr.msk.f32.gmra.mrb[42].mxu1 %vm879_vm3, %v5397_v38 }
 0x627   : > { %1593 = vmatprep.mubr.f32.mxu1 %v6433_v49 }
 0x62a   : > { %3868 = vmatmul.mubr.msk.f32.gmra.mrb[44].mxu1 %vm879_vm3, %v5405_v4 }
 0x62b   : > { %1599 = vmatprep.mubr.f32.mxu1 %v6433_v49 }
 0x62e   : > { %3869 = vmatmul.mubr.msk.f32.gmra.mrb[46].mxu1 %vm879_vm3, %v5413_v21 }
 0x62f   : > { %1605 = vmatprep.mubr.f32.mxu1 %v6433_v49 }
 0x632   : > { %3870 = vmatmul.mubr.msk.f32.gmra.mrb[48].mxu1 %vm879_vm3, %v5421_v32 }
 0x633   : > { %1611 = vmatprep.mubr.f32.mxu1 %v6433_v49 }
 0x636   : > { %3871 = vmatmul.mubr.msk.f32.gmra.mrb[50].mxu1 %vm879_vm3, %v5429_v45 }
 0x637   : > { %1617 = vmatprep.mubr.f32.mxu1 %v6433_v49 }
 0x63a   : > { %3872 = vmatmul.mubr.msk.f32.gmra.mrb[52].mxu1 %vm879_vm3, %v5437_v51  ;;  %v6484_v51 = vld [vmem:[#allocation24_spill] sm:$0xff] }
 0x63b   : > { %1623 = vmatprep.mubr.f32.mxu1 %v6433_v49 }
 0x63e   : > { %3873 = vmatmul.mubr.msk.f32.gmra.mrb[54].mxu1 %vm879_vm3, %v5445_v16 }
 0x63f   : > { %1629 = vmatprep.mubr.f32.mxu1 %v6433_v49 }
 0x642   : > { %3874 = vmatmul.mubr.msk.f32.gmra.mrb[56].mxu1 %vm879_vm3, %v5453_v22 }
 0x643   : > { %1635 = vmatprep.mubr.f32.mxu1 %v6433_v49 }
 0x646   : > { %3875 = vmatmul.mubr.msk.f32.gmra.mrb[58].mxu1 %vm879_vm3, %v5461_v37 }
 0x647   : > { %1641 = vmatprep.mubr.f32.mxu1 %v6433_v49 }
 0x64a   : > { %3876 = vmatmul.mubr.msk.f32.gmra.mrb[60].mxu1 %vm879_vm3, %v5469_v8  ;;  %v6483_v8 = vld [vmem:[#allocation23_spill] sm:$0xff] }
 0x64b   : > { %1647 = vmatprep.mubr.f32.mxu1 %v6433_v49 }
 0x64e   : > { %3877 = vmatmul.mubr.msk.f32.gmra.mrb[62].mxu1 %vm879_vm3, %v5477_v2 }
 0x64f   : > { %2485 = vmatprep.mubr.f32.mxu1 %v6433_v49 }
 0x6e5   : > { %v1559_v23 = vpop.f32.mrb[32].mxu1 }
 0x6e6   : > { %v1561_v41 = vpop.f32.mrb[33].mxu1  ;;  %v1560_v0 = vadd.f32 %v1559_v23, %v6482_v15 }
 0x6e7   : > { %v1562_v17 = vadd.f32 %v1561_v41, %v6482_v15 }
 0x6e8   : > { %v1654_v2 = vmul.f32 0.5, %v1560_v0 }
 0x6e9   : > { %v1565_v47 = vpop.f32.mrb[34].mxu1  ;;  %v1655_v21 = vmul.f32 0.5, %v1562_v17 }
 0x6ea   : > { %v1567_v62 = vpop.f32.mrb[35].mxu1  ;;  %v1566_v37 = vadd.f32 %v1565_v47, %v6483_v8  ;;  %4317 = vtanh.f32 %v1654_v2  ;;  %v6486_v47 = vld [vmem:[#allocation27_spill] sm:$0xff]  ;;  %v6488_v2 = vld [vmem:[#allocation29_spill] sm:$0xff] }
 0x6eb   : > { %v1568_v22 = vadd.f32 %v1567_v62, %v6483_v8  ;;  %4319 = vtanh.f32 %v1655_v21  ;;  %v6487_v8 = vld [vmem:[#allocation28_spill] sm:$0xff] }
 0x6ec   : > { %v1656_v38 = vmul.f32 0.5, %v1566_v37 }
 0x6ed   : > { %v1571_v53 = vpop.f32.mrb[36].mxu1  ;;  %v1657_v61 = vmul.f32 0.5, %v1568_v22 }
 0x6ee   : > { %v1573_v30 = vpop.f32.mrb[37].mxu1  ;;  %v1572_v33 = vadd.f32 %v1571_v53, %v6485_v3  ;;  %4321 = vtanh.f32 %v1656_v38 }
 0x6ef   : > { %v1574_v41 = vadd.f32 %v1573_v30, %v6485_v3  ;;  %4323 = vtanh.f32 %v1657_v61  ;;  %v6492_v3 = vld [vmem:[#allocation33_spill] sm:$0xff] }
 0x6f0   : > { %v1658_v17 = vmul.f32 0.5, %v1572_v33 }
 0x6f1   : > { %v1577_v26 = vpop.f32.mrb[38].mxu1  ;;  %v1659_v22 = vmul.f32 0.5, %v1574_v41 }
 0x6f2   : > { %v1579_v27 = vpop.f32.mrb[39].mxu1 }
 0x6f5   : > { %v1583_v16 = vpop.f32.mrb[40].mxu1 }
 0x6f6   : > { %v1584_v45 = vadd.f32 %v1583_v16, %v6484_v51  ;;  %v1585_v32 = vpop.f32.mrb[41].mxu1 }
 0x6f7   : > { %v1586_v4 = vadd.f32 %v1585_v32, %v6484_v51  ;;  %v1578_v32 = vadd.f32 %v1577_v26, %v6487_v8 }
 0x6f8   : > { %v1686_v15 = vmul.f32 0.5, %v1584_v45  ;;  %v1580_v45 = vadd.f32 %v1579_v27, %v6487_v8 }
 0x6f9   : > { %v1589_v23 = vpop.f32.mrb[42].mxu1  ;;  %v1687_v0 = vmul.f32 0.5, %v1586_v4  ;;  %v1660_v21 = vmul.f32 0.5, %v1578_v32  ;;  %v6490_v32 = vld [vmem:[#allocation31_spill] sm:$0xff] }
 0x6fa   : > { %v1590_v46 = vadd.f32 %v1589_v23, %v6486_v47  ;;  %v1591_v62 = vpop.f32.mrb[43].mxu1  ;;  %4325 = vtanh.f32 %v1686_v15  ;;  %v1661_v15 = vmul.f32 0.5, %v1580_v45 }
 0x6fb   : > { %v1592_v16 = vadd.f32 %v1591_v62, %v6486_v47  ;;  %4327 = vtanh.f32 %v1687_v0 }
 0x6fc   : > { %v1688_v37 = vmul.f32 0.5, %v1590_v46  ;;  %4329 = vtanh.f32 %v1658_v17  ;;  %v6489_v46 = vld [vmem:[#allocation30_spill] sm:$0xff] }
 0x6fd   : > { %v1595_v53 = vpop.f32.mrb[44].mxu1  ;;  %v1689_v23 = vmul.f32 0.5, %v1592_v16 }
 0x6fe   : > { %v1596_v51 = vadd.f32 %v1595_v53, %v6488_v2  ;;  %v1597_v30 = vpop.f32.mrb[45].mxu1  ;;  %4331 = vtanh.f32 %v1688_v37  ;;  %v4318_v53 = vpop.eup %4317 }
 0x6ff   : > { %v1598_v4 = vadd.f32 %v1597_v30, %v6488_v2  ;;  %4333 = vtanh.f32 %v1659_v22  ;;  %v4320_v27 = vpop.eup %4319 }
 0x700   : > { %v1690_v33 = vmul.f32 0.5, %v1596_v51  ;;  %4335 = vtanh.f32 %v1689_v23  ;;  %v4322_v16 = vpop.eup %4321 }
 0x701   : > { %v1601_v38 = vpop.f32.mrb[46].mxu1  ;;  %v1691_v61 = vmul.f32 0.5, %v1598_v4  ;;  %4337 = vtanh.f32 %v1660_v21  ;;  %v4324_v22 = vpop.eup %4323 }
 0x702   : > { %v1602_v26 = vadd.f32 %v1601_v38, %v6489_v46  ;;  %v1603_v41 = vpop.f32.mrb[47].mxu1  ;;  %4339 = vtanh.f32 %v1690_v33  ;;  %v6491_v33 = vld [vmem:[#allocation32_spill] sm:$0xff]  ;;  %v1673_v47 = vmul.f32 0.5, %v4324_v22 }
 0x703   : > { %v1604_v62 = vadd.f32 %v1603_v41, %v6489_v46  ;;  %4341 = vtanh.f32 %v1691_v61 }
 0x704   : > { %v1692_v17 = vmul.f32 0.5, %v1602_v26  ;;  %4343 = vtanh.f32 %v1661_v15  ;;  %v4326_v45 = vpop.eup %4325  ;;  %v1670_v26 = vmul.f32 0.5, %v4318_v53  ;;  %v1681_v60 = vadd.f32 0.5, %v1673_v47 }
 0x705   : > { %v1607_v0 = vpop.f32.mrb[48].mxu1  ;;  %v1693_v30 = vmul.f32 0.5, %v1604_v62  ;;  %v4328_v23 = vpop.eup %4327  ;;  %v1702_v2 = vmul.f32 0.5, %v4326_v45  ;;  %v1671_v62 = vmul.f32 0.5, %v4320_v27 }
 0x706   : > { %v1608_v51 = vadd.f32 %v1607_v0, %v6490_v32  ;;  %v1609_v37 = vpop.f32.mrb[49].mxu1  ;;  %v4330_v21 = vpop.eup %4329  ;;  %v1703_v8 = vmul.f32 0.5, %v4328_v23  ;;  %v1678_v53 = vadd.f32 0.5, %v1670_v26 }
 0x707   : > { %v1610_v4 = vadd.f32 %v1609_v37, %v6490_v32  ;;  %v1710_v45 = vadd.f32 0.5, %v1702_v2 }
 0x708   : > { %4345 = vtanh.f32 %v1608_v51  ;;  %v4332_v61 = vpop.eup %4331  ;;  %v1672_v51 = vmul.f32 0.5, %v4322_v16  ;;  %v1711_v27 = vadd.f32 0.5, %v1703_v8 }
 0x709   : > { %4347 = vtanh.f32 %v1610_v4  ;;  %v1613_v38 = vpop.f32.mrb[50].mxu1  ;;  %v4334_v15 = vpop.eup %4333 }
 0x70a   : > { %4349 = vtanh.f32 %v1692_v17  ;;  %v1614_v41 = vadd.f32 %v1613_v38, %v6491_v33  ;;  %v1615_v46 = vpop.f32.mrb[51].mxu1  ;;  %v4336_v37 = vpop.eup %4335  ;;  %v1704_v17 = vmul.f32 0.5, %v4332_v61  ;;  %v1680_v16 = vadd.f32 0.5, %v1672_v51 }
 0x70b   : > { %4351 = vtanh.f32 %v1693_v30  ;;  %v1616_v0 = vadd.f32 %v1615_v46, %v6491_v33  ;;  %v4338_v32 = vpop.eup %4337  ;;  %v1679_v33 = vadd.f32 0.5, %v1671_v62  ;;  %v1705_v23 = vmul.f32 0.5, %v4336_v37 }
 0x70c   : > { %4353 = vtanh.f32 %v1614_v41  ;;  %v4340_v39 = vpop.eup %4339  ;;  %v1675_v43 = vmul.f32 0.5, %v4334_v15 }
 0x70d   : > { %4355 = vtanh.f32 %v1616_v0  ;;  %v1619_v4 = vpop.f32.mrb[52].mxu1  ;;  %v4342_v46 = vpop.eup %4341  ;;  %v1674_v0 = vmul.f32 0.5, %v4330_v21  ;;  %v1706_v63 = vmul.f32 0.5, %v4340_v39  ;;  %v1759_v21 = vmul.f32 %v1711_v27, %v5188_v12 }
 0x70e   : > { %v1620_v38 = vadd.f32 %v1619_v4, %v6492_v3  ;;  %v1621_v1 = vpop.f32.mrb[53].mxu1  ;;  %v4344_v41 = vpop.eup %4343  ;;  %v1712_v4 = vadd.f32 0.5, %v1704_v17  ;;  %v1707_v62 = vmul.f32 0.5, %v4342_v46  ;;  %v1713_v15 = vadd.f32 0.5, %v1705_v23 }
 0x70f   : > { %v1622_v30 = vadd.f32 %v1621_v1, %v6492_v3  ;;  %v1758_v1 = vmul.f32 %v1710_v45, %v5186_v29  ;;  %v1682_v47 = vadd.f32 0.5, %v1674_v0  ;;  %v1683_v17 = vadd.f32 0.5, %v1675_v43 }
 0x710   : > { %4357 = vtanh.f32 %v1620_v38  ;;  %v1760_v29 = vmul.f32 %v1712_v4, %v5194_v5  ;;  %v1714_v45 = vadd.f32 0.5, %v1706_v63  ;;  %v1715_v27 = vadd.f32 0.5, %v1707_v62 }
 0x711   : > { %4359 = vtanh.f32 %v1622_v30  ;;  %v1625_v22 = vpop.f32.mrb[54].mxu1  ;;  %v1761_v43 = vmul.f32 %v1713_v15, %v5196_v34  ;;  %v6496_v34 = vld [vmem:[#allocation38_spill] sm:$0xff] }
 0x712   : > { %v4346_v61 = vpop.eup %4345  ;;  %v1626_v26 = vadd.f32 %v1625_v22, %v6493_v54  ;;  %v1627_v2 = vpop.f32.mrb[55].mxu1  ;;  %v1763_v15 = vmul.f32 %v1715_v27, %v6496_v34  ;;  %v6497_v27 = vld [vmem:[#allocation36_spill] sm:$0xff]  ;;  %v6502_v34 = vld [vmem:[#allocation39_spill] sm:$0xff] }
 0x713   : > { %v4348_v59 = vpop.eup %4347  ;;  %v1766_v8 = vmul.f32 %v4346_v61, %v1678_v53  ;;  %v1628_v37 = vadd.f32 %v1627_v2, %v6493_v54 }
 0x714   : > { %v4350_v38 = vpop.eup %4349  ;;  %v1767_v51 = vmul.f32 %v4348_v59, %v1679_v33  ;;  %4361 = vtanh.f32 %v1626_v26 }
 0x715   : > { %v4352_v30 = vpop.eup %4351  ;;  %v5508_v39 = vadd.f32 %v1766_v8, %v1758_v1  ;;  %4363 = vtanh.f32 %v1628_v37  ;;  %v1631_v22 = vpop.f32.mrb[56].mxu1  ;;  %v1708_v59 = vmul.f32 0.5, %v4350_v38  ;;  %v1676_v1 = vmul.f32 0.5, %v4338_v32 }
 0x716   : > { %v4354_v3 = vpop.eup %4353  ;;  %v5511_v53 = vadd.f32 %v1767_v51, %v1759_v21  ;;  %v1632_v46 = vadd.f32 %v1631_v22, %v5184_v44  ;;  %v1633_v61 = vpop.f32.mrb[57].mxu1  ;;  %v1709_v0 = vmul.f32 0.5, %v4352_v30  ;;  %v1677_v8 = vmul.f32 0.5, %v4344_v41  ;;  %v6494_v21 = vld [vmem:[#allocation37_spill] sm:$0xff] }
 0x717   : > { %v4356_v12 = vpop.eup %4355  ;;  %v1768_v33 = vmul.f32 %v4354_v3, %v1680_v16  ;;  %v1634_v23 = vadd.f32 %v1633_v61, %v5184_v44  ;;  %v1762_v51 = vmul.f32 %v1714_v45, %v6494_v21  ;;  %v6495_v3 = vld [vmem:[#allocation35_spill] sm:$0xff]  ;;  %v1684_v61 = vadd.f32 0.5, %v1676_v1 }
 0x718   : > { %v1769_v26 = vmul.f32 %v4356_v12, %v1681_v60  ;;  %v1726_v2 = vmul.f32 0.5, %v1632_v46  ;;  %v1716_v60 = vadd.f32 0.5, %v1708_v59  ;;  %v1717_v41 = vadd.f32 0.5, %v1709_v0  ;;  %v6498_v0 = vld [vmem:[#allocation40_spill] sm:$0xff] }
 0x719   : > { %v5516_v5 = vadd.f32 %v1768_v33, %v1760_v29  ;;  %v1727_v63 = vmul.f32 0.5, %v1634_v23  ;;  %v1637_v4 = vpop.f32.mrb[58].mxu1 }
 0x71a   : > { %v4358_v37 = vpop.eup %4357  ;;  %v5519_v22 = vadd.f32 %v1769_v26, %v1761_v43  ;;  %4365 = vtanh.f32 %v1726_v2  ;;  %v1638_v16 = vadd.f32 %v1637_v4, %v6495_v3  ;;  %v1639_v62 = vpop.f32.mrb[59].mxu1  ;;  %v1685_v43 = vadd.f32 0.5, %v1677_v8 }
 0x71b   : > { %v4360_v38 = vpop.eup %4359  ;;  %v1770_v30 = vmul.f32 %v4358_v37, %v1682_v47  ;;  %v1640_v32 = vadd.f32 %v1639_v62, %v6495_v3  ;;  %4367 = vtanh.f32 %v5508_v39  ;;  %v1764_v4 = vmul.f32 %v1716_v60, %v6498_v0  ;;  %v6499_v37 = vld [vmem:[#allocation41_spill] sm:$0xff] }
 0x71c   : > { %v1771_v29 = vmul.f32 %v4360_v38, %v1683_v17  ;;  %v1728_v46 = vmul.f32 0.5, %v1638_v16  ;;  %4369 = vtanh.f32 %v1727_v63  ;;  %v1765_v63 = vmul.f32 %v1717_v41, %v6499_v37 }
 0x71d   : > { %v5525_v45 = vadd.f32 %v1770_v30, %v1762_v51  ;;  %v1729_v12 = vmul.f32 0.5, %v1640_v32  ;;  %v1643_v33 = vpop.f32.mrb[60].mxu1 }
 0x71e   : > { %v4362_v23 = vpop.eup %4361  ;;  %v5527_v26 = vadd.f32 %v1771_v29, %v1763_v15  ;;  %4371 = vtanh.f32 %v1728_v46  ;;  %v1644_v47 = vadd.f32 %v1643_v33, %v6497_v27  ;;  %v1645_v59 = vpop.f32.mrb[61].mxu1 }
 0x71f   : > { %v4364_v2 = vpop.eup %4363  ;;  %4373 = vtanh.f32 %v5511_v53  ;;  %v1772_v17 = vmul.f32 %v4362_v23, %v1684_v61  ;;  %v1646_v1 = vadd.f32 %v1645_v59, %v6497_v27 }
 0x720   : > { %4375 = vtanh.f32 %v5516_v5  ;;  %v1773_v21 = vmul.f32 %v4364_v2, %v1685_v43  ;;  %v1730_v8 = vmul.f32 0.5, %v1644_v47 }
 0x721   : > { %v5535_v51 = vadd.f32 %v1772_v17, %v1764_v4  ;;  %4377 = vtanh.f32 %v1729_v12  ;;  %v1731_v16 = vmul.f32 0.5, %v1646_v1  ;;  %v1649_v62 = vpop.f32.mrb[62].mxu1 }
 0x722   : > { %v5537_v38 = vadd.f32 %v1773_v21, %v1765_v63  ;;  %4379 = vtanh.f32 %v1730_v8  ;;  %v1650_v15 = vadd.f32 %v1649_v62, %v6502_v34  ;;  %v1651_v60 = vpop.f32.mrb[63].mxu1 }
 0x723   : > { %6500 = vst [vmem:[#allocation34_spill] sm:$0xff] %v5535_v51  ;;  %4381 = vtanh.f32 %v5519_v22  ;;  %v1652_v30 = vadd.f32 %v1651_v60, %v6502_v34 }
 0x724   : > { %6501 = vst [vmem:[#allocation37_spill] sm:$0xff] %v5537_v38  ;;  %v4366_v32 = vpop.eup %4365  ;;  %4383 = vtanh.f32 %v5525_v45  ;;  %v1732_v41 = vmul.f32 0.5, %v1650_v15 }
 0x725   : > { %v1742_v29 = vmul.f32 0.5, %v4366_v32  ;;  %4385 = vtanh.f32 %v1731_v16  ;;  %v1733_v46 = vmul.f32 0.5, %v1652_v30  ;;  %v4368_v61 = vpop.eup %4367  ;;  %v6503_v32 = vld [vmem:[#allocation42_spill] sm:$0xff] }
 0x726   : > { %4387 = vtanh.f32 %v1732_v41  ;;  %v4370_v12 = vpop.eup %4369 }
 0x727   : > { %v1750_v33 = vadd.f32 0.5, %v1742_v29  ;;  %4389 = vtanh.f32 %v1733_v46  ;;  %v1743_v43 = vmul.f32 0.5, %v4370_v12  ;;  %v6504_v29 = vld [vmem:[#allocation43_spill] sm:$0xff] }
 0x728   : > { %v4372_v23 = vpop.eup %4371  ;;  %4391 = vtanh.f32 %v5527_v26 }
 0x729   : > { %v4374_v47 = vpop.eup %4373  ;;  %v1744_v59 = vmul.f32 0.5, %v4372_v23  ;;  %4393 = vtanh.f32 %v5535_v51  ;;  %v1751_v0 = vadd.f32 0.5, %v1743_v43  ;;  %v5546_v17 = vmul.f32 %v4368_v61, %v1750_v33 }
 0x72a   : > { %v4376_v2 = vpop.eup %4375  ;;  %4395 = vtanh.f32 %v5537_v38 }
 0x72b   : > { %v4378_v4 = vpop.eup %4377  ;;  %v1752_v1 = vadd.f32 0.5, %v1744_v59  ;;  %v5548_v8 = vmul.f32 %v4374_v47, %v1751_v0  ;;  %v1798_v41 = vmul.f32 %v5546_v17, %v6503_v32 }
 0x72c   : > { %v4380_v37 = vpop.eup %4379  ;;  %v1745_v63 = vmul.f32 0.5, %v4378_v4 }
 0x72d   : > { %v4382_v21 = vpop.eup %4381  ;;  %v5550_v16 = vmul.f32 %v4376_v2, %v1752_v1  ;;  %v1746_v62 = vmul.f32 0.5, %v4380_v37  ;;  %v1799_v59 = vmul.f32 %v5548_v8, %v6503_v32 }
 0x72e   : > { %v4384_v15 = vpop.eup %4383  ;;  %v1753_v60 = vadd.f32 0.5, %v1745_v63 }
 0x72f   : > { %v4386_v30 = vpop.eup %4385  ;;  %v1800_v46 = vmul.f32 %v5550_v16, %v6504_v29  ;;  %v1754_v61 = vadd.f32 0.5, %v1746_v62 }
 0x730   : > { %v4388_v33 = vpop.eup %4387  ;;  %v5558_v23 = vmul.f32 %v4382_v21, %v1753_v60  ;;  %v1747_v43 = vmul.f32 0.5, %v4386_v30  ;;  %v6505_v21 = vld [vmem:[#allocation44_spill] sm:$0xff] }
 0x731   : > { %v4390_v47 = vpop.eup %4389  ;;  %v1806_v2 = vadd.f32 %v1800_v46, %v1798_v41  ;;  %v5562_v0 = vmul.f32 %v4384_v15, %v1754_v61  ;;  %v1748_v4 = vmul.f32 0.5, %v4388_v33 }
 0x732   : > { %v1801_v1 = vmul.f32 %v5558_v23, %v6504_v29  ;;  %v1755_v37 = vadd.f32 0.5, %v1747_v43  ;;  %v1749_v63 = vmul.f32 0.5, %v4390_v47  ;;  %v4392_v12 = vpop.eup %4391  ;;  %v6506_v47 = vld [vmem:[#allocation45_spill] sm:$0xff] }
 0x733   : > { %v1802_v60 = vmul.f32 %v5562_v0, %v6505_v21  ;;  %v1756_v30 = vadd.f32 0.5, %v1748_v4  ;;  %v4394_v34 = vpop.eup %4393 }
 0x734   : > { %v1815_v38 = vadd.f32 %v1801_v1, %v1799_v59  ;;  %v5570_v32 = vmul.f32 %v4392_v12, %v1755_v37  ;;  %v1757_v15 = vadd.f32 0.5, %v1749_v63  ;;  %v4396_v41 = vpop.eup %4395 }
 0x735   : > { %v1807_v46 = vadd.f32 %v1806_v2, %v1802_v60  ;;  %v5572_v61 = vmul.f32 %v4394_v34, %v1756_v30 }
 0x736   : > { %v1803_v33 = vmul.f32 %v5570_v32, %v6505_v21  ;;  %v5576_v43 = vmul.f32 %v4396_v41, %v1757_v15 }
 0x737   : > { %v1804_v62 = vmul.f32 %v5572_v61, %v6506_v47 }
 0x738   : > { %v1816_v29 = vadd.f32 %v1815_v38, %v1803_v33  ;;  %v1805_v12 = vmul.f32 %v5576_v43, %v6506_v47 }
 0x739   : > { %v1808_v34 = vadd.f32 %v1807_v46, %v1804_v62 }
 0x73a   : > { %v1817_v2 = vadd.f32 %v1816_v29, %v1805_v12 }
 0x73b   : > { %v1809_v1 = vrot.slane %v1808_v34, 4 }
 0x73c   : > { %v1818_v37 = vrot.slane %v1817_v2, 4 }
 0x73d   : > { %v1810_v63 = vadd.f32 %v1809_v1, %v1808_v34  ;;  %v6508_v34 = vld [vmem:[#allocation15_spill] sm:$0xff]  ;;  %v6509_v1 = vld [vmem:[#allocation6_spill] sm:$0xff] }
 0x73e   : > { %v1819_v60 = vadd.f32 %v1818_v37, %v1817_v2 }
 0x73f   : > { %v1811_v30 = vrot.slane %v1810_v63, 2 }
 0x740   : > { %v1820_v15 = vrot.slane %v1819_v60, 2 }
 0x741   : > { %v1812_v41 = vadd.f32 %v1811_v30, %v1810_v63  ;;  %v6510_v63 = vld [vmem:[#allocation8_spill] sm:$0xff] }
 0x742   : > { %v1821_v21 = vadd.f32 %v1820_v15, %v1819_v60  ;;  %v6511_v30 = vld [vmem:[#allocation12_spill] sm:$0xff] }
 0x743   : > { %v1813_v51 = vrot.slane %v1812_v41, 1 }
 0x744   : > { %v1822_v27 = vrot.slane %v1821_v21, 1 }
 0x745   : > { %v1814_v4 = vadd.f32 %v1813_v51, %v1812_v41 }
 0x746   : > { %v1823_v38 = vadd.f32 %v1822_v27, %v1821_v21 }
 0x747   : > { %v1824_v33 = vadd.f32 %v1814_v4, %v5272_v36 }
 0x748   : > { %v1825_v47 = vadd.f32 %v1823_v38, %v5272_v36 }
 0x749   : > { %v5589_v59 = vadd.f32 %v1824_v33, %v5278_v9 }
 0x74a   : > { %v5592_v29 = vadd.f32 %v1825_v47, %v5280_v55  ;;  %v6507_v55 = vld [vmem:[#allocation13_spill] sm:$0xff] }
 0x74b   : > { %v1831_v62 = vrot.slane %v5589_v59, %v5275_v48 }
 0x74c   : > { %v1835_v46 = vrot.slane %v5592_v29, %v5275_v48 }
 0x74d   : > { %v1836_v12 = vmul.f32 %v1831_v62, %v4863_v14  ;;  %v1838_v27 = vmul.f32 %v1831_v62, %v4877_v25  ;;  %v1840_v51 = vmul.f32 %v1831_v62, %v4886_v35  ;;  %v1842_v21 = vmul.f32 %v1831_v62, %v4897_v50 }
 0x74e   : > { %v1837_v9 = vmul.f32 %v1835_v46, %v4868_v18  ;;  %v1839_v4 = vmul.f32 %v1835_v46, %v4880_v28  ;;  %v1841_v47 = vmul.f32 %v1835_v46, %v6507_v55  ;;  %v1843_v2 = vmul.f32 %v1835_v46, %v6508_v34 }
 0x74f   : > { %v1844_v37 = vadd.f32 %v1836_v12, %v6509_v1  ;;  %v1846_v60 = vadd.f32 %v1838_v27, %v6510_v63  ;;  %v1848_v15 = vadd.f32 %v1840_v51, %v6511_v30  ;;  %v1850_v41 = vadd.f32 %v1842_v21, %v4899_v52 }
 0x750   : > { %v1845_v38 = vadd.f32 %v1837_v9, %v4870_v19  ;;  %v1847_v33 = vadd.f32 %v1839_v4, %v4875_v24  ;;  %v1849_v62 = vadd.f32 %v1841_v47, %v4894_v42  ;;  %v1851_v28 = vadd.f32 %v1843_v2, %v4905_v56 }
 0x751   : > { %v1852_v18 = vmax.f32 %v1844_v37, 0.0  ;;  %v1854_v55 = vmax.f32 %v1846_v60, 0.0  ;;  %v1856_v50 = vmax.f32 %v1848_v15, 0.0  ;;  %v1858_v46 = vmax.f32 %v1850_v41, 0.0 }
 0x752   : > { %v1853_v34 = vmax.f32 %v1845_v38, 0.0  ;;  %v1855_v12 = vmax.f32 %v1847_v33, 0.0  ;;  %v1857_v1 = vmax.f32 %v1849_v62, 0.0  ;;  %v1859_v27 = vmax.f32 %v1851_v28, 0.0 }
 0x753   : > { %v4027_v63 = vpack.c.bf16 %v1854_v55, %v1852_v18  ;;  %v4031_v51 = vpack.c.bf16 %v1858_v46, %v1856_v50 }
 0x754   : > { %v4025_v30 = vpack.c.bf16 %v1855_v12, %v1853_v34  ;;  %v4029_v21 = vpack.c.bf16 %v1859_v27, %v1857_v1 }
 0x756   : > { %4026 = vmatprep.subr.bf16.mxu0 %v4025_v30 }
 0x757   : > { %4028 = vmatpush1.bf16.msra.mxu0 %v4027_v63 }
 0x758   : > { %4030 = vmatprep.subr.bf16.mxu0 %v4029_v21 }
 0x75b   : > { %4032 = vmatpush1.bf16.msra.mxu0 %v4031_v51 }
 0x75e   : > { %3878 = vmatmul.mubr.msk.f32.vlgmr.msra.gmra.mrb[48].mxu0 %vm564_vm2, %v4911_v6 }
 0x75f   : > { %1930 = vmatprep.mubr.f32.mxu0 %v6433_v49 }
 0x762   : > { %3879 = vmatmul.mubr.msk.f32.gmra.mrb[50].mxu0 %vm564_vm2, %v4915_v7 }
 0x763   : > { %1936 = vmatprep.mubr.f32.mxu0 %v6433_v49 }
 0x766   : > { %3880 = vmatmul.mubr.msk.f32.gmra.mrb[52].mxu0 %vm564_vm2, %v4920_v10 }
 0x767   : > { %1942 = vmatprep.mubr.f32.mxu0 %v6433_v49 }
 0x76a   : > { %3881 = vmatmul.mubr.msk.f32.gmra.mrb[54].mxu0 %vm564_vm2, %v4925_v11 }
 0x76b   : > { %2021 = vmatprep.mubr.f32.mxu0 %v6433_v49 }
 0x831   : > { %v1926_v18 = vpop.f32.mrb[48].mxu0 }
 0x832   : > { %v1928_v28 = vpop.f32.mrb[49].mxu0  ;;  %v1927_v50 = vadd.f32 %v1926_v18, %v4935_v13 }
 0x833   : > { %v1929_v9 = vadd.f32 %v1928_v28, %v4935_v13 }
 0x834   : > { %v1949_v2 = vmax.f32 %v1927_v50, 0.0 }
 0x835   : > { %v1932_v4 = vpop.f32.mrb[50].mxu0  ;;  %v1950_v37 = vmax.f32 %v1929_v9, 0.0 }
 0x836   : > { %v1933_v55 = vadd.f32 %v1932_v4, %v4937_v20  ;;  %v1934_v47 = vpop.f32.mrb[51].mxu0  ;;  %v6512_v4 = vld [vmem:[#allocation17_spill] sm:$0xff] }
 0x837   : > { %v1935_v34 = vadd.f32 %v1934_v47, %v4937_v20 }
 0x838   : > { %v1951_v1 = vmax.f32 %v1933_v55, 0.0  ;;  %v6513_v55 = vld [vmem:[#allocation18_spill] sm:$0xff] }
 0x839   : > { %v1952_v63 = vmax.f32 %v1935_v34, 0.0  ;;  %v1938_v60 = vpop.f32.mrb[52].mxu0 }
 0x83a   : > { %v4035_v30 = vpack.c.bf16 %v1951_v1, %v1949_v2  ;;  %v1940_v15 = vpop.f32.mrb[53].mxu0  ;;  %v1939_v38 = vadd.f32 %v1938_v60, %v4943_v31  ;;  %v6514_v2 = vld [vmem:[#allocation19_spill] sm:$0xff]  ;;  %v6515_v60 = vld [vmem:[#allocation20_spill] sm:$0xff] }
 0x83b   : > { %v4033_v41 = vpack.c.bf16 %v1952_v63, %v1950_v37  ;;  %v1941_v33 = vadd.f32 %v1940_v15, %v4943_v31 }
 0x83c   : > { %v1953_v51 = vmax.f32 %v1939_v38, 0.0 }
 0x83d   : > { %v1944_v62 = vpop.f32.mrb[54].mxu0  ;;  %4034 = vmatprep.subr.bf16.mxu0 %v4033_v41  ;;  %v1954_v18 = vmax.f32 %v1941_v33, 0.0 }
 0x83e   : > { %v1945_v46 = vadd.f32 %v1944_v62, %v4946_v40  ;;  %v1946_v12 = vpop.f32.mrb[55].mxu0  ;;  %4036 = vmatpush1.bf16.msra.mxu0 %v4035_v30 }
 0x83f   : > { %v1947_v27 = vadd.f32 %v1946_v12, %v4946_v40 }
 0x840   : > { %v1955_v21 = vmax.f32 %v1945_v46, 0.0 }
 0x841   : > { %v1956_v28 = vmax.f32 %v1947_v27, 0.0 }
 0x842   : > { %v4039_v50 = vpack.c.bf16 %v1955_v21, %v1953_v51 }
 0x843   : > { %v4037_v9 = vpack.c.bf16 %v1956_v28, %v1954_v18  ;;  %v6516_v18 = vld [vmem:[#allocation21_spill] sm:$0xff] }
 0x845   : > { %4038 = vmatprep.subr.bf16.mxu0 %v4037_v9 }
 0x846   : > { %4040 = vmatpush1.bf16.msra.mxu0 %v4039_v50 }
 0x849   : > { %3882 = vmatmul.mubr.msk.f32.vlgmr.msra.gmra.mrb[56].mxu0 %vm564_vm2, %v4951_v57 }
 0x84a   : > { %2027 = vmatprep.mubr.f32.mxu0 %v6433_v49 }
 0x84d   : > { %3883 = vmatmul.mubr.msk.f32.gmra.mrb[58].mxu0 %vm564_vm2, %v4955_v58 }
 0x84e   : > { %2033 = vmatprep.mubr.f32.mxu0 %v6433_v49 }
 0x851   : > { %3884 = vmatmul.mubr.msk.f32.gmra.mrb[60].mxu0 %vm564_vm2, %v6512_v4 }
 0x852   : > { %2039 = vmatprep.mubr.f32.mxu0 %v6433_v49 }
 0x855   : > { %3885 = vmatmul.mubr.msk.f32.gmra.mrb[62].mxu0 %vm564_vm2, %v6513_v55 }
 0x856   : > { %2118 = vmatprep.mubr.f32.mxu0 %v6433_v49 }
 0x91c   : > { %v2023_v47 = vpop.f32.mrb[56].mxu0 }
 0x91d   : > { %v2025_v34 = vpop.f32.mrb[57].mxu0  ;;  %v2024_v1 = vadd.f32 %v2023_v47, %v6514_v2  ;;  %v6517_v47 = vld [vmem:[#allocation22_spill] sm:$0xff] }
 0x91e   : > { %v2026_v37 = vadd.f32 %v2025_v34, %v6514_v2 }
 0x91f   : > { %v2046_v38 = vmax.f32 %v2024_v1, 0.0 }
 0x920   : > { %v2029_v63 = vpop.f32.mrb[58].mxu0  ;;  %v2047_v62 = vmax.f32 %v2026_v37, 0.0 }
 0x921   : > { %v2030_v30 = vadd.f32 %v2029_v63, %v6515_v60  ;;  %v2031_v15 = vpop.f32.mrb[59].mxu0 }
 0x922   : > { %v2032_v41 = vadd.f32 %v2031_v15, %v6515_v60 }
 0x923   : > { %v2048_v33 = vmax.f32 %v2030_v30, 0.0 }
 0x924   : > { %v2049_v46 = vmax.f32 %v2032_v41, 0.0  ;;  %v2035_v12 = vpop.f32.mrb[60].mxu0 }
 0x925   : > { %v4043_v27 = vpack.c.bf16 %v2048_v33, %v2046_v38  ;;  %v2037_v51 = vpop.f32.mrb[61].mxu0  ;;  %v2036_v28 = vadd.f32 %v2035_v12, %v6516_v18  ;;  %v6518_v33 = vpack.c.bf16 %v5558_v23, %v5548_v8  ;;  %v6521_v12 = vpack.c.bf16 %v5572_v61, %v5562_v0  ;;  %v6525_v8 = vld [vmem:[#allocation49_spill] sm:$0xff]  ;;  %v6528_v23 = vld [vmem:[#allocation52_spill] sm:$0xff]  ;;  %v6530_v61 = vld [vmem:[#allocation54_spill] sm:$0xff] }
 0x926   : > { %v4041_v21 = vpack.c.bf16 %v2049_v46, %v2047_v62  ;;  %v2038_v50 = vadd.f32 %v2037_v51, %v6516_v18  ;;  %v6519_v62 = vpack.c.bf16 %v5550_v16, %v5546_v17  ;;  %v6520_v46 = vpack.c.bf16 %v5576_v43, %v5570_v32  ;;  %v6524_v17 = vld [vmem:[#allocation48_spill] sm:$0xff]  ;;  %v6526_v16 = vld [vmem:[#allocation50_spill] sm:$0xff]  ;;  %v6527_v32 = vld [vmem:[#allocation51_spill] sm:$0xff] }
 0x927   : > { %v2050_v1 = vmax.f32 %v2036_v28, 0.0  ;;  %v6529_v0 = vld [vmem:[#allocation53_spill] sm:$0xff]  ;;  %v6531_v43 = vld [vmem:[#allocation55_spill] sm:$0xff]  ;;  %v6532_v51 = vld [vmem:[#allocation56_spill] sm:$0xff] }
 0x928   : > { %v2041_v9 = vpop.f32.mrb[62].mxu0  ;;  %4042 = vmatprep.subr.bf16.mxu0 %v4041_v21  ;;  %v2051_v37 = vmax.f32 %v2038_v50, 0.0  ;;  %v6533_v21 = vld [vmem:[#allocation57_spill] sm:$0xff]  ;;  %v6534_v28 = vld [vmem:[#allocation58_spill] sm:$0xff]  ;;  %v6535_v50 = vld [vmem:[#allocation59_spill] sm:$0xff] }
 0x929   : > { %v2042_v34 = vadd.f32 %v2041_v9, %v6517_v47  ;;  %v2043_v63 = vpop.f32.mrb[63].mxu0  ;;  %4044 = vmatpush1.bf16.msra.mxu0 %v4043_v27  ;;  %v6522_v27 = vld [vmem:[#allocation46_spill] sm:$0xff]  ;;  %v6536_v9 = vld [vmem:[#allocation60_spill] sm:$0xff] }
 0x92a   : > { %v2044_v15 = vadd.f32 %v2043_v63, %v6517_v47 }
 0x92b   : > { %v2052_v30 = vmax.f32 %v2042_v34, 0.0  ;;  %v6537_v34 = vld [vmem:[#allocation61_spill] sm:$0xff] }
 0x92c   : > { %v2053_v41 = vmax.f32 %v2044_v15, 0.0 }
 0x92d   : > { %v4047_v60 = vpack.c.bf16 %v2052_v30, %v2050_v1 }
 0x92e   : > { %v4045_v38 = vpack.c.bf16 %v2053_v41, %v2051_v37 }
 0x930   : > { %4046 = vmatprep.subr.bf16.mxu0 %v4045_v38 }
 0x931   : > { %4048 = vmatpush1.bf16.msra.mxu0 %v4047_v60  ;;  %v6523_v60 = vld [vmem:[#allocation47_spill] sm:$0xff] }
 0x932   : > { %4050 = vmatprep.subr.bf16.mxu0 %v6518_v33  ;;  %v6538_v33 = vld [vmem:[#allocation25_spill] sm:$0xff] }
 0x935   : > { %4052 = vmatpush1.bf16.msra.mxu0 %v6519_v62 }
 0x936   : > { %4054 = vmatprep.subr.bf16.mxu0 %v6520_v46 }
 0x939   : > { %4056 = vmatpush1.bf16.msra.mxu0 %v6521_v12 }
 0x93c   : > { %3886 = vmatmul.mubr.msk.f32.vlgmr.msra.gmra.mrb[64].mxu0 %vm879_vm3, %v6522_v27  ;;  %v6539_v27 = vld [vmem:[#allocation23_spill] sm:$0xff] }
 0x93d   : > { %2124 = vmatprep.mubr.f32.mxu0 %v6433_v49 }
 0x940   : > { %3887 = vmatmul.mubr.msk.f32.gmra.mrb[66].mxu0 %vm879_vm3, %v6523_v60 }
 0x941   : > { %2130 = vmatprep.mubr.f32.mxu0 %v6433_v49 }
 0x944   : > { %3888 = vmatmul.mubr.msk.f32.gmra.mrb[68].mxu0 %vm879_vm3, %v6524_v17 }
 0x945   : > { %2136 = vmatprep.mubr.f32.mxu0 %v6433_v49 }
 0x948   : > { %3889 = vmatmul.mubr.msk.f32.gmra.mrb[70].mxu0 %vm879_vm3, %v6525_v8 }
 0x949   : > { %2142 = vmatprep.mubr.f32.mxu0 %v6433_v49 }
 0x94c   : > { %3890 = vmatmul.mubr.msk.f32.gmra.mrb[72].mxu0 %vm879_vm3, %v6526_v16 }
 0x94d   : > { %2148 = vmatprep.mubr.f32.mxu0 %v6433_v49 }
 0x950   : > { %3891 = vmatmul.mubr.msk.f32.gmra.mrb[74].mxu0 %vm879_vm3, %v6527_v32  ;;  %v6540_v32 = vld [vmem:[#allocation24_spill] sm:$0xff] }
 0x951   : > { %2154 = vmatprep.mubr.f32.mxu0 %v6433_v49 }
 0x954   : > { %3892 = vmatmul.mubr.msk.f32.gmra.mrb[76].mxu0 %vm879_vm3, %v6528_v23 }
 0x955   : > { %2160 = vmatprep.mubr.f32.mxu0 %v6433_v49 }
 0x958   : > { %3893 = vmatmul.mubr.msk.f32.gmra.mrb[78].mxu0 %vm879_vm3, %v6529_v0 }
 0x959   : > { %2166 = vmatprep.mubr.f32.mxu0 %v6433_v49 }
 0x95c   : > { %3894 = vmatmul.mubr.msk.f32.gmra.mrb[80].mxu0 %vm879_vm3, %v6530_v61 }
 0x95d   : > { %2172 = vmatprep.mubr.f32.mxu0 %v6433_v49 }
 0x960   : > { %3895 = vmatmul.mubr.msk.f32.gmra.mrb[82].mxu0 %vm879_vm3, %v6531_v43 }
 0x961   : > { %2178 = vmatprep.mubr.f32.mxu0 %v6433_v49 }
 0x964   : > { %3896 = vmatmul.mubr.msk.f32.gmra.mrb[84].mxu0 %vm879_vm3, %v6532_v51 }
 0x965   : > { %2184 = vmatprep.mubr.f32.mxu0 %v6433_v49 }
 0x968   : > { %3897 = vmatmul.mubr.msk.f32.gmra.mrb[86].mxu0 %vm879_vm3, %v6533_v21  ;;  %v6541_v21 = vld [vmem:[#allocation26_spill] sm:$0xff] }
 0x969   : > { %2190 = vmatprep.mubr.f32.mxu0 %v6433_v49 }
 0x96c   : > { %3898 = vmatmul.mubr.msk.f32.gmra.mrb[88].mxu0 %vm879_vm3, %v6534_v28 }
 0x96d   : > { %2196 = vmatprep.mubr.f32.mxu0 %v6433_v49 }
 0x970   : > { %3899 = vmatmul.mubr.msk.f32.gmra.mrb[90].mxu0 %vm879_vm3, %v6535_v50 }
 0x971   : > { %2202 = vmatprep.mubr.f32.mxu0 %v6433_v49 }
 0x974   : > { %3900 = vmatmul.mubr.msk.f32.gmra.mrb[92].mxu0 %vm879_vm3, %v6536_v9 }
 0x975   : > { %2208 = vmatprep.mubr.f32.mxu0 %v6433_v49 }
 0x978   : > { %3901 = vmatmul.mubr.msk.f32.gmra.mrb[94].mxu0 %vm879_vm3, %v6537_v34 }
 0x979   : > { %3046 = vmatprep.mubr.f32.mxu0 %v6433_v49 }
 0xa0f   : > { %v2120_v63 = vpop.f32.mrb[64].mxu0 }
 0xa10   : > { %v2122_v15 = vpop.f32.mrb[65].mxu0  ;;  %v2121_v62 = vadd.f32 %v2120_v63, %v6538_v33 }
 0xa11   : > { %v2123_v12 = vadd.f32 %v2122_v15, %v6538_v33  ;;  %v6542_v15 = vld [vmem:[#allocation27_spill] sm:$0xff] }
 0xa12   : > { %v2215_v16 = vmul.f32 0.5, %v2121_v62 }
 0xa13   : > { %v2126_v1 = vpop.f32.mrb[66].mxu0  ;;  %v2216_v61 = vmul.f32 0.5, %v2123_v12 }
 0xa14   : > { %v2128_v30 = vpop.f32.mrb[67].mxu0  ;;  %v2127_v60 = vadd.f32 %v2126_v1, %v6539_v27  ;;  %4397 = vtanh.f32 %v2215_v16  ;;  %v6544_v16 = vld [vmem:[#allocation29_spill] sm:$0xff] }
 0xa15   : > { %v2129_v17 = vadd.f32 %v2128_v30, %v6539_v27  ;;  %4399 = vtanh.f32 %v2216_v61  ;;  %v6543_v27 = vld [vmem:[#allocation28_spill] sm:$0xff] }
 0xa16   : > { %v2217_v51 = vmul.f32 0.5, %v2127_v60 }
 0xa17   : > { %v2132_v37 = vpop.f32.mrb[68].mxu0  ;;  %v2218_v50 = vmul.f32 0.5, %v2129_v17 }
 0xa18   : > { %v2134_v41 = vpop.f32.mrb[69].mxu0  ;;  %v2133_v28 = vadd.f32 %v2132_v37, %v6541_v21  ;;  %4401 = vtanh.f32 %v2217_v51 }
 0xa19   : > { %v2135_v34 = vadd.f32 %v2134_v41, %v6541_v21  ;;  %4403 = vtanh.f32 %v2218_v50  ;;  %v6545_v50 = vld [vmem:[#allocation30_spill] sm:$0xff]  ;;  %v6548_v21 = vld [vmem:[#allocation33_spill] sm:$0xff] }
 0xa1a   : > { %v2219_v12 = vmul.f32 0.5, %v2133_v28 }
 0xa1b   : > { %v2138_v38 = vpop.f32.mrb[70].mxu0  ;;  %v2220_v17 = vmul.f32 0.5, %v2135_v34 }
 0xa1c   : > { %v2140_v46 = vpop.f32.mrb[71].mxu0 }
 0xa1f   : > { %v2144_v8 = vpop.f32.mrb[72].mxu0 }
 0xa20   : > { %v2145_v23 = vadd.f32 %v2144_v8, %v6540_v32  ;;  %v2146_v0 = vpop.f32.mrb[73].mxu0 }
 0xa21   : > { %v2147_v43 = vadd.f32 %v2146_v0, %v6540_v32  ;;  %v2139_v0 = vadd.f32 %v2138_v38, %v6543_v27 }
 0xa22   : > { %v2247_v63 = vmul.f32 0.5, %v2145_v23  ;;  %v2141_v23 = vadd.f32 %v2140_v46, %v6543_v27 }
 0xa23   : > { %v2150_v9 = vpop.f32.mrb[74].mxu0  ;;  %v2248_v62 = vmul.f32 0.5, %v2147_v43  ;;  %v2221_v43 = vmul.f32 0.5, %v2139_v0  ;;  %v6546_v0 = vld [vmem:[#allocation31_spill] sm:$0xff] }
 0xa24   : > { %v2151_v1 = vadd.f32 %v2150_v9, %v6542_v15  ;;  %v2152_v30 = vpop.f32.mrb[75].mxu0  ;;  %4405 = vtanh.f32 %v2247_v63  ;;  %v2222_v63 = vmul.f32 0.5, %v2141_v23 }
 0xa25   : > { %v2153_v8 = vadd.f32 %v2152_v30, %v6542_v15  ;;  %4407 = vtanh.f32 %v2248_v62 }
 0xa26   : > { %v2249_v60 = vmul.f32 0.5, %v2151_v1  ;;  %4409 = vtanh.f32 %v2219_v12 }
 0xa27   : > { %v2156_v37 = vpop.f32.mrb[76].mxu0  ;;  %v2250_v9 = vmul.f32 0.5, %v2153_v8 }
 0xa28   : > { %v2157_v32 = vadd.f32 %v2156_v37, %v6544_v16  ;;  %v2158_v41 = vpop.f32.mrb[77].mxu0  ;;  %4411 = vtanh.f32 %v2249_v60  ;;  %v4398_v37 = vpop.eup %4397 }
 0xa29   : > { %v2159_v61 = vadd.f32 %v2158_v41, %v6544_v16  ;;  %4413 = vtanh.f32 %v2220_v17  ;;  %v4400_v46 = vpop.eup %4399 }
 0xa2a   : > { %v2251_v51 = vmul.f32 0.5, %v2157_v32  ;;  %4415 = vtanh.f32 %v2250_v9  ;;  %v4402_v8 = vpop.eup %4401 }
 0xa2b   : > { %v2162_v28 = vpop.f32.mrb[78].mxu0  ;;  %v2252_v38 = vmul.f32 0.5, %v2159_v61  ;;  %4417 = vtanh.f32 %v2221_v43  ;;  %v4404_v17 = vpop.eup %4403 }
 0xa2c   : > { %v2163_v1 = vadd.f32 %v2162_v28, %v6545_v50  ;;  %v2164_v34 = vpop.f32.mrb[79].mxu0  ;;  %4419 = vtanh.f32 %v2251_v51  ;;  %v6547_v51 = vld [vmem:[#allocation32_spill] sm:$0xff]  ;;  %v2234_v15 = vmul.f32 0.5, %v4404_v17 }
 0xa2d   : > { %v2165_v30 = vadd.f32 %v2164_v34, %v6545_v50  ;;  %4421 = vtanh.f32 %v2252_v38 }
 0xa2e   : > { %v2253_v12 = vmul.f32 0.5, %v2163_v1  ;;  %4423 = vtanh.f32 %v2222_v63  ;;  %v4406_v23 = vpop.eup %4405  ;;  %v2231_v1 = vmul.f32 0.5, %v4398_v37  ;;  %v2242_v2 = vadd.f32 0.5, %v2234_v15 }
 0xa2f   : > { %v2168_v62 = vpop.f32.mrb[80].mxu0  ;;  %v2254_v41 = vmul.f32 0.5, %v2165_v30  ;;  %v4408_v9 = vpop.eup %4407  ;;  %v2263_v16 = vmul.f32 0.5, %v4406_v23  ;;  %v2232_v30 = vmul.f32 0.5, %v4400_v46 }
 0xa30   : > { %v2169_v32 = vadd.f32 %v2168_v62, %v6546_v0  ;;  %v2170_v60 = vpop.f32.mrb[81].mxu0  ;;  %v4410_v43 = vpop.eup %4409  ;;  %v2264_v27 = vmul.f32 0.5, %v4408_v9  ;;  %v2239_v37 = vadd.f32 0.5, %v2231_v1 }
 0xa31   : > { %v2171_v61 = vadd.f32 %v2170_v60, %v6546_v0  ;;  %v2271_v23 = vadd.f32 0.5, %v2263_v16 }
 0xa32   : > { %4425 = vtanh.f32 %v2169_v32  ;;  %v4412_v38 = vpop.eup %4411  ;;  %v2233_v32 = vmul.f32 0.5, %v4402_v8  ;;  %v2272_v46 = vadd.f32 0.5, %v2264_v27 }
 0xa33   : > { %4427 = vtanh.f32 %v2171_v61  ;;  %v2174_v28 = vpop.f32.mrb[82].mxu0  ;;  %v4414_v63 = vpop.eup %4413 }
 0xa34   : > { %4429 = vtanh.f32 %v2253_v12  ;;  %v2175_v34 = vadd.f32 %v2174_v28, %v6547_v51  ;;  %v2176_v50 = vpop.f32.mrb[83].mxu0  ;;  %v4416_v60 = vpop.eup %4415  ;;  %v2265_v12 = vmul.f32 0.5, %v4412_v38  ;;  %v2241_v8 = vadd.f32 0.5, %v2233_v32 }
 0xa35   : > { %4431 = vtanh.f32 %v2254_v41  ;;  %v2177_v62 = vadd.f32 %v2176_v50, %v6547_v51  ;;  %v4418_v0 = vpop.eup %4417  ;;  %v2240_v51 = vadd.f32 0.5, %v2232_v30  ;;  %v2266_v9 = vmul.f32 0.5, %v4416_v60 }
 0xa36   : > { %4433 = vtanh.f32 %v2175_v34  ;;  %v4420_v47 = vpop.eup %4419  ;;  %v2236_v18 = vmul.f32 0.5, %v4414_v63 }
 0xa37   : > { %4435 = vtanh.f32 %v2177_v62  ;;  %v2180_v61 = vpop.f32.mrb[84].mxu0  ;;  %v4422_v50 = vpop.eup %4421  ;;  %v2235_v62 = vmul.f32 0.5, %v4410_v43  ;;  %v2267_v55 = vmul.f32 0.5, %v4420_v47  ;;  %v2320_v43 = vmul.f32 %v2272_v46, %v5511_v53 }
 0xa38   : > { %v2181_v28 = vadd.f32 %v2180_v61, %v6548_v21  ;;  %v2182_v33 = vpop.f32.mrb[85].mxu0  ;;  %v4424_v34 = vpop.eup %4423  ;;  %v2273_v61 = vadd.f32 0.5, %v2265_v12  ;;  %v2268_v30 = vmul.f32 0.5, %v4422_v50  ;;  %v2274_v63 = vadd.f32 0.5, %v2266_v9 }
 0xa39   : > { %v2183_v41 = vadd.f32 %v2182_v33, %v6548_v21  ;;  %v2319_v33 = vmul.f32 %v2271_v23, %v5508_v39  ;;  %v2243_v15 = vadd.f32 0.5, %v2235_v62  ;;  %v2244_v12 = vadd.f32 0.5, %v2236_v18 }
 0xa3a   : > { %4437 = vtanh.f32 %v2181_v28  ;;  %v2321_v39 = vmul.f32 %v2273_v61, %v5516_v5  ;;  %v2275_v23 = vadd.f32 0.5, %v2267_v55  ;;  %v2276_v46 = vadd.f32 0.5, %v2268_v30 }
 0xa3b   : > { %4439 = vtanh.f32 %v2183_v41  ;;  %v2186_v17 = vpop.f32.mrb[86].mxu0  ;;  %v2322_v18 = vmul.f32 %v2274_v63, %v5519_v22 }
 0xa3c   : > { %v4426_v38 = vpop.eup %4425  ;;  %v2187_v1 = vadd.f32 %v2186_v17, %v6493_v54  ;;  %v2188_v16 = vpop.f32.mrb[87].mxu0  ;;  %v2324_v22 = vmul.f32 %v2276_v46, %v5527_v26  ;;  %v6549_v26 = vld [vmem:[#allocation36_spill] sm:$0xff] }
 0xa3d   : > { %v4428_v4 = vpop.eup %4427  ;;  %v2327_v27 = vmul.f32 %v4426_v38, %v2239_v37  ;;  %v2189_v60 = vadd.f32 %v2188_v16, %v6493_v54 }
 0xa3e   : > { %v4430_v28 = vpop.eup %4429  ;;  %v2328_v32 = vmul.f32 %v4428_v4, %v2240_v51  ;;  %4441 = vtanh.f32 %v2187_v1 }
 0xa3f   : > { %v4432_v41 = vpop.eup %4431  ;;  %v5740_v47 = vadd.f32 %v2327_v27, %v2319_v33  ;;  %4443 = vtanh.f32 %v2189_v60  ;;  %v2192_v17 = vpop.f32.mrb[88].mxu0  ;;  %v2269_v4 = vmul.f32 0.5, %v4430_v28  ;;  %v2237_v33 = vmul.f32 0.5, %v4418_v0 }
 0xa40   : > { %v4434_v21 = vpop.eup %4433  ;;  %v5743_v37 = vadd.f32 %v2328_v32, %v2320_v43  ;;  %v2193_v50 = vadd.f32 %v2192_v17, %v5184_v44  ;;  %v2194_v38 = vpop.f32.mrb[89].mxu0  ;;  %v2270_v62 = vmul.f32 0.5, %v4432_v41  ;;  %v2238_v27 = vmul.f32 0.5, %v4424_v34 }
 0xa41   : > { %v4436_v53 = vpop.eup %4435  ;;  %v2329_v51 = vmul.f32 %v4434_v21, %v2241_v8  ;;  %v2195_v9 = vadd.f32 %v2194_v38, %v5184_v44  ;;  %v2323_v43 = vmul.f32 %v2275_v23, %v5525_v45  ;;  %v2245_v17 = vadd.f32 0.5, %v2237_v33 }
 0xa42   : > { %v2330_v1 = vmul.f32 %v4436_v53, %v2242_v2  ;;  %v2287_v16 = vmul.f32 0.5, %v2193_v50  ;;  %v2277_v2 = vadd.f32 0.5, %v2269_v4  ;;  %v2278_v34 = vadd.f32 0.5, %v2270_v62  ;;  %v6551_v62 = vld [vmem:[#allocation37_spill] sm:$0xff] }
 0xa43   : > { %v5748_v5 = vadd.f32 %v2329_v51, %v2321_v39  ;;  %v2288_v55 = vmul.f32 0.5, %v2195_v9  ;;  %v2198_v61 = vpop.f32.mrb[90].mxu0  ;;  %v2246_v38 = vadd.f32 0.5, %v2238_v27  ;;  %v6550_v51 = vld [vmem:[#allocation34_spill] sm:$0xff] }
 0xa44   : > { %v4438_v60 = vpop.eup %4437  ;;  %v5751_v32 = vadd.f32 %v2330_v1, %v2322_v18  ;;  %4445 = vtanh.f32 %v2287_v16  ;;  %v2199_v21 = vadd.f32 %v2198_v61, %v6495_v3  ;;  %v2200_v8 = vpop.f32.mrb[91].mxu0  ;;  %v2325_v9 = vmul.f32 %v2277_v2, %v6550_v51 }
 0xa45   : > { %v4440_v30 = vpop.eup %4439  ;;  %v2331_v28 = vmul.f32 %v4438_v60, %v2243_v15  ;;  %v2201_v0 = vadd.f32 %v2200_v8, %v6495_v3  ;;  %4447 = vtanh.f32 %v5740_v47  ;;  %v2326_v1 = vmul.f32 %v2278_v34, %v6551_v62 }
 0xa46   : > { %v2332_v63 = vmul.f32 %v4440_v30, %v2244_v12  ;;  %v2289_v41 = vmul.f32 0.5, %v2199_v21  ;;  %4449 = vtanh.f32 %v2288_v55 }
 0xa47   : > { %v5757_v45 = vadd.f32 %v2331_v28, %v2323_v43  ;;  %v2290_v39 = vmul.f32 0.5, %v2201_v0  ;;  %v2204_v23 = vpop.f32.mrb[92].mxu0  ;;  %v6552_v43 = vld [vmem:[#allocation39_spill] sm:$0xff] }
 0xa48   : > { %v4442_v50 = vpop.eup %4441  ;;  %v5759_v53 = vadd.f32 %v2332_v63, %v2324_v22  ;;  %4451 = vtanh.f32 %v2289_v41  ;;  %v2205_v15 = vadd.f32 %v2204_v23, %v6549_v26  ;;  %v2206_v46 = vpop.f32.mrb[93].mxu0 }
 0xa49   : > { %v4444_v4 = vpop.eup %4443  ;;  %4453 = vtanh.f32 %v5743_v37  ;;  %v2333_v12 = vmul.f32 %v4442_v50, %v2245_v17  ;;  %v2207_v18 = vadd.f32 %v2206_v46, %v6549_v26 }
 0xa4a   : > { %4455 = vtanh.f32 %v5748_v5  ;;  %v2334_v16 = vmul.f32 %v4444_v4, %v2246_v38  ;;  %v2291_v33 = vmul.f32 0.5, %v2205_v15 }
 0xa4b   : > { %v5767_v27 = vadd.f32 %v2333_v12, %v2325_v9  ;;  %4457 = vtanh.f32 %v2290_v39  ;;  %v2292_v55 = vmul.f32 0.5, %v2207_v18  ;;  %v2210_v61 = vpop.f32.mrb[94].mxu0 }
 0xa4c   : > { %v5769_v60 = vadd.f32 %v2334_v16, %v2326_v1  ;;  %4459 = vtanh.f32 %v2291_v33  ;;  %v2211_v21 = vadd.f32 %v2210_v61, %v6552_v43  ;;  %v2212_v8 = vpop.f32.mrb[95].mxu0 }
 0xa4d   : > { %4461 = vtanh.f32 %v5751_v32  ;;  %v2213_v30 = vadd.f32 %v2212_v8, %v6552_v43 }
 0xa4e   : > { %v4446_v22 = vpop.eup %4445  ;;  %4463 = vtanh.f32 %v5757_v45  ;;  %v2293_v2 = vmul.f32 0.5, %v2211_v21  ;;  %v6553_v21 = vld [vmem:[#allocation42_spill] sm:$0xff] }
 0xa4f   : > { %v2303_v28 = vmul.f32 0.5, %v4446_v22  ;;  %4465 = vtanh.f32 %v2292_v55  ;;  %v2294_v0 = vmul.f32 0.5, %v2213_v30  ;;  %v4448_v34 = vpop.eup %4447  ;;  %v6554_v30 = vld [vmem:[#allocation43_spill] sm:$0xff] }
 0xa50   : > { %4467 = vtanh.f32 %v2293_v2  ;;  %v4450_v63 = vpop.eup %4449 }
 0xa51   : > { %v2311_v41 = vadd.f32 0.5, %v2303_v28  ;;  %4469 = vtanh.f32 %v2294_v0  ;;  %v2304_v39 = vmul.f32 0.5, %v4450_v63 }
 0xa52   : > { %v4452_v17 = vpop.eup %4451  ;;  %4471 = vtanh.f32 %v5759_v53 }
 0xa53   : > { %v4454_v23 = vpop.eup %4453  ;;  %v2305_v50 = vmul.f32 0.5, %v4452_v17  ;;  %4473 = vtanh.f32 %v5767_v27  ;;  %v2312_v15 = vadd.f32 0.5, %v2304_v39  ;;  %v5778_v4 = vmul.f32 %v4448_v34, %v2311_v41 }
 0xa54   : > { %v4456_v38 = vpop.eup %4455  ;;  %4475 = vtanh.f32 %v5769_v60 }
 0xa55   : > { %v4458_v46 = vpop.eup %4457  ;;  %v2313_v51 = vadd.f32 0.5, %v2305_v50  ;;  %v5780_v62 = vmul.f32 %v4454_v23, %v2312_v15  ;;  %v2359_v8 = vmul.f32 %v5778_v4, %v6553_v21 }
 0xa56   : > { %v4460_v9 = vpop.eup %4459  ;;  %v2306_v12 = vmul.f32 0.5, %v4458_v46 }
 0xa57   : > { %v4462_v18 = vpop.eup %4461  ;;  %v5782_v1 = vmul.f32 %v4456_v38, %v2313_v51  ;;  %v2307_v16 = vmul.f32 0.5, %v4460_v9  ;;  %v2360_v17 = vmul.f32 %v5780_v62, %v6553_v21 }
 0xa58   : > { %v4464_v33 = vpop.eup %4463  ;;  %v2314_v55 = vadd.f32 0.5, %v2306_v12  ;;  %v6555_v12 = vld [vmem:[#allocation44_spill] sm:$0xff] }
 0xa59   : > { %v4466_v61 = vpop.eup %4465  ;;  %v2361_v22 = vmul.f32 %v5782_v1, %v6554_v30  ;;  %v2315_v2 = vadd.f32 0.5, %v2307_v16 }
 0xa5a   : > { %v4468_v0 = vpop.eup %4467  ;;  %v5790_v34 = vmul.f32 %v4462_v18, %v2314_v55  ;;  %v2308_v63 = vmul.f32 0.5, %v4466_v61 }
 0xa5b   : > { %v4470_v41 = vpop.eup %4469  ;;  %v2367_v39 = vadd.f32 %v2361_v22, %v2359_v8  ;;  %v5794_v23 = vmul.f32 %v4464_v33, %v2315_v2  ;;  %v2309_v50 = vmul.f32 0.5, %v4468_v0 }
 0xa5c   : > { %v2362_v38 = vmul.f32 %v5790_v34, %v6554_v30  ;;  %v2316_v15 = vadd.f32 0.5, %v2308_v63  ;;  %v2310_v46 = vmul.f32 0.5, %v4470_v41  ;;  %v4472_v9 = vpop.eup %4471  ;;  %v6556_v41 = vld [vmem:[#allocation45_spill] sm:$0xff] }
 0xa5d   : > { %v2363_v18 = vmul.f32 %v5794_v23, %v6555_v12  ;;  %v2317_v16 = vadd.f32 0.5, %v2309_v50  ;;  %v4474_v55 = vpop.eup %4473 }
 0xa5e   : > { %v2376_v61 = vadd.f32 %v2362_v38, %v2360_v17  ;;  %v5802_v28 = vmul.f32 %v4472_v9, %v2316_v15  ;;  %v2318_v33 = vadd.f32 0.5, %v2310_v46  ;;  %v4476_v8 = vpop.eup %4475 }
 0xa5f   : > { %v2368_v22 = vadd.f32 %v2367_v39, %v2363_v18  ;;  %v5804_v2 = vmul.f32 %v4474_v55, %v2317_v16 }
 0xa60   : > { %v2364_v0 = vmul.f32 %v5802_v28, %v6555_v12  ;;  %v5808_v63 = vmul.f32 %v4476_v8, %v2318_v33 }
 0xa61   : > { %v2365_v51 = vmul.f32 %v5804_v2, %v6556_v41 }
 0xa62   : > { %v2377_v30 = vadd.f32 %v2376_v61, %v2364_v0  ;;  %v2366_v17 = vmul.f32 %v5808_v63, %v6556_v41 }
 0xa63   : > { %v2369_v38 = vadd.f32 %v2368_v22, %v2365_v51 }
 0xa64   : > { %v2378_v15 = vadd.f32 %v2377_v30, %v2366_v17 }
 0xa65   : > { %v2370_v46 = vrot.slane %v2369_v38, 4 }
 0xa66   : > { %v2379_v9 = vrot.slane %v2378_v15, 4 }
 0xa67   : > { %v2371_v18 = vadd.f32 %v2370_v46, %v2369_v38  ;;  %v6558_v38 = vld [vmem:[#allocation7_spill] sm:$0xff] }
 0xa68   : > { %v2380_v16 = vadd.f32 %v2379_v9, %v2378_v15  ;;  %v6559_v15 = vld [vmem:[#allocation10_spill] sm:$0xff]  ;;  %v6561_v9 = vld [vmem:[#allocation15_spill] sm:$0xff] }
 0xa69   : > { %v2372_v55 = vrot.slane %v2371_v18, 2 }
 0xa6a   : > { %v2381_v33 = vrot.slane %v2380_v16, 2 }
 0xa6b   : > { %v2373_v8 = vadd.f32 %v2372_v55, %v2371_v18 }
 0xa6c   : > { %v2382_v12 = vadd.f32 %v2381_v33, %v2380_v16  ;;  %v6562_v16 = vld [vmem:[#allocation6_spill] sm:$0xff]  ;;  %v6563_v33 = vld [vmem:[#allocation8_spill] sm:$0xff] }
 0xa6d   : > { %v2374_v21 = vrot.slane %v2373_v8, 1 }
 0xa6e   : > { %v2383_v43 = vrot.slane %v2382_v12, 1 }
 0xa6f   : > { %v2375_v50 = vadd.f32 %v2374_v21, %v2373_v8 }
 0xa70   : > { %v2384_v61 = vadd.f32 %v2383_v43, %v2382_v12  ;;  %v6557_v12 = vld [vmem:[#allocation14_spill] sm:$0xff] }
 0xa71   : > { %v2385_v0 = vadd.f32 %v2375_v50, %v5272_v36 }
 0xa72   : > { %v2386_v41 = vadd.f32 %v2384_v61, %v5272_v36  ;;  %v6564_v61 = vld [vmem:[#allocation12_spill] sm:$0xff] }
 0xa73   : > { %v5821_v39 = vadd.f32 %v2385_v0, %v5589_v59 }
 0xa74   : > { %v5824_v30 = vadd.f32 %v2386_v41, %v5592_v29  ;;  %v6560_v29 = vld [vmem:[#allocation13_spill] sm:$0xff] }
 0xa75   : > { %v2392_v51 = vrot.slane %v5821_v39, %v5275_v48 }
 0xa76   : > { %v2396_v22 = vrot.slane %v5824_v30, %v5275_v48 }
 0xa77   : > { %v2397_v17 = vmul.f32 %v2392_v51, %v4863_v14  ;;  %v2399_v43 = vmul.f32 %v2392_v51, %v4877_v25  ;;  %v2401_v21 = vmul.f32 %v2392_v51, %v4886_v35  ;;  %v2403_v50 = vmul.f32 %v2392_v51, %v6557_v12 }
 0xa78   : > { %v2398_v59 = vmul.f32 %v2396_v22, %v6558_v38  ;;  %v2400_v46 = vmul.f32 %v2396_v22, %v6559_v15  ;;  %v2402_v41 = vmul.f32 %v2396_v22, %v6560_v29  ;;  %v2404_v18 = vmul.f32 %v2396_v22, %v6561_v9 }
 0xa79   : > { %v2405_v55 = vadd.f32 %v2397_v17, %v6562_v16  ;;  %v2407_v8 = vadd.f32 %v2399_v43, %v6563_v33  ;;  %v2409_v0 = vadd.f32 %v2401_v21, %v6564_v61  ;;  %v2411_v25 = vadd.f32 %v2403_v50, %v4899_v52 }
 0xa7a   : > { %v2406_v35 = vadd.f32 %v2398_v59, %v4870_v19  ;;  %v2408_v51 = vadd.f32 %v2400_v46, %v4875_v24  ;;  %v2410_v38 = vadd.f32 %v2402_v41, %v4894_v42  ;;  %v2412_v15 = vadd.f32 %v2404_v18, %v4905_v56 }
 0xa7b   : > { %v2413_v12 = vmax.f32 %v2405_v55, 0.0  ;;  %v2415_v29 = vmax.f32 %v2407_v8, 0.0  ;;  %v2417_v14 = vmax.f32 %v2409_v0, 0.0  ;;  %v2419_v22 = vmax.f32 %v2411_v25, 0.0 }
 0xa7c   : > { %v2414_v9 = vmax.f32 %v2406_v35, 0.0  ;;  %v2416_v17 = vmax.f32 %v2408_v51, 0.0  ;;  %v2418_v16 = vmax.f32 %v2410_v38, 0.0  ;;  %v2420_v43 = vmax.f32 %v2412_v15, 0.0 }
 0xa7d   : > { %v4059_v33 = vpack.c.bf16 %v2415_v29, %v2413_v12  ;;  %v4063_v21 = vpack.c.bf16 %v2419_v22, %v2417_v14 }
 0xa7e   : > { %v4057_v61 = vpack.c.bf16 %v2416_v17, %v2414_v9  ;;  %v4061_v50 = vpack.c.bf16 %v2420_v43, %v2418_v16 }
 0xa80   : > { %4058 = vmatprep.subr.bf16.mxu1 %v4057_v61 }
 0xa81   : > { %4060 = vmatpush1.bf16.msra.mxu1 %v4059_v33 }
 0xa82   : > { %4062 = vmatprep.subr.bf16.mxu1 %v4061_v50 }
 0xa85   : > { %4064 = vmatpush1.bf16.msra.mxu1 %v4063_v21 }
 0xa88   : > { %3902 = vmatmul.mubr.msk.f32.vlgmr.msra.gmra.mrb[64].mxu1 %vm564_vm2, %v4911_v6 }
 0xa89   : > { %2491 = vmatprep.mubr.f32.mxu1 %v6433_v49 }
 0xa8c   : > { %3903 = vmatmul.mubr.msk.f32.gmra.mrb[66].mxu1 %vm564_vm2, %v4915_v7 }
 0xa8d   : > { %2497 = vmatprep.mubr.f32.mxu1 %v6433_v49 }
 0xa90   : > { %3904 = vmatmul.mubr.msk.f32.gmra.mrb[68].mxu1 %vm564_vm2, %v4920_v10 }
 0xa91   : > { %2503 = vmatprep.mubr.f32.mxu1 %v6433_v49 }
 0xa94   : > { %3905 = vmatmul.mubr.msk.f32.gmra.mrb[70].mxu1 %vm564_vm2, %v4925_v11 }
 0xa95   : > { %2582 = vmatprep.mubr.f32.mxu1 %v6433_v49 }
 0xb5b   : > { %v2487_v14 = vpop.f32.mrb[64].mxu1 }
 0xb5c   : > { %v2489_v25 = vpop.f32.mrb[65].mxu1  ;;  %v2488_v35 = vadd.f32 %v2487_v14, %v4935_v13 }
 0xb5d   : > { %v2490_v12 = vadd.f32 %v2489_v25, %v4935_v13 }
 0xb5e   : > { %v2510_v29 = vmax.f32 %v2488_v35, 0.0 }
 0xb5f   : > { %v2493_v38 = vpop.f32.mrb[66].mxu1  ;;  %v2511_v9 = vmax.f32 %v2490_v12, 0.0 }
 0xb60   : > { %v2494_v59 = vadd.f32 %v2493_v38, %v4937_v20  ;;  %v2495_v15 = vpop.f32.mrb[67].mxu1  ;;  %v6565_v38 = vld [vmem:[#allocation17_spill] sm:$0xff] }
 0xb61   : > { %v2496_v46 = vadd.f32 %v2495_v15, %v4937_v20 }
 0xb62   : > { %v2512_v41 = vmax.f32 %v2494_v59, 0.0  ;;  %v6566_v59 = vld [vmem:[#allocation18_spill] sm:$0xff] }
 0xb63   : > { %v2513_v18 = vmax.f32 %v2496_v46, 0.0  ;;  %v2499_v16 = vpop.f32.mrb[68].mxu1 }
 0xb64   : > { %v4067_v55 = vpack.c.bf16 %v2512_v41, %v2510_v29  ;;  %v2501_v33 = vpop.f32.mrb[69].mxu1  ;;  %v2500_v61 = vadd.f32 %v2499_v16, %v4943_v31  ;;  %v6567_v29 = vld [vmem:[#allocation19_spill] sm:$0xff]  ;;  %v6568_v16 = vld [vmem:[#allocation20_spill] sm:$0xff] }
 0xb65   : > { %v4065_v8 = vpack.c.bf16 %v2513_v18, %v2511_v9  ;;  %v2502_v0 = vadd.f32 %v2501_v33, %v4943_v31 }
 0xb66   : > { %v2514_v21 = vmax.f32 %v2500_v61, 0.0 }
 0xb67   : > { %v2505_v51 = vpop.f32.mrb[70].mxu1  ;;  %4066 = vmatprep.subr.bf16.mxu1 %v4065_v8  ;;  %v2515_v14 = vmax.f32 %v2502_v0, 0.0 }
 0xb68   : > { %v2506_v22 = vadd.f32 %v2505_v51, %v4946_v40  ;;  %v2507_v17 = vpop.f32.mrb[71].mxu1  ;;  %4068 = vmatpush1.bf16.msra.mxu1 %v4067_v55 }
 0xb69   : > { %v2508_v43 = vadd.f32 %v2507_v17, %v4946_v40 }
 0xb6a   : > { %v2516_v50 = vmax.f32 %v2506_v22, 0.0 }
 0xb6b   : > { %v2517_v25 = vmax.f32 %v2508_v43, 0.0 }
 0xb6c   : > { %v4071_v35 = vpack.c.bf16 %v2516_v50, %v2514_v21 }
 0xb6d   : > { %v4069_v12 = vpack.c.bf16 %v2517_v25, %v2515_v14  ;;  %v6569_v14 = vld [vmem:[#allocation21_spill] sm:$0xff] }
 0xb6f   : > { %4070 = vmatprep.subr.bf16.mxu1 %v4069_v12 }
 0xb70   : > { %4072 = vmatpush1.bf16.msra.mxu1 %v4071_v35 }
 0xb73   : > { %3906 = vmatmul.mubr.msk.f32.vlgmr.msra.gmra.mrb[72].mxu1 %vm564_vm2, %v4951_v57 }
 0xb74   : > { %2588 = vmatprep.mubr.f32.mxu1 %v6433_v49 }
 0xb77   : > { %3907 = vmatmul.mubr.msk.f32.gmra.mrb[74].mxu1 %vm564_vm2, %v4955_v58 }
 0xb78   : > { %2594 = vmatprep.mubr.f32.mxu1 %v6433_v49 }
 0xb7b   : > { %3908 = vmatmul.mubr.msk.f32.gmra.mrb[76].mxu1 %vm564_vm2, %v6565_v38 }
 0xb7c   : > { %2600 = vmatprep.mubr.f32.mxu1 %v6433_v49 }
 0xb7f   : > { %3909 = vmatmul.mubr.msk.f32.gmra.mrb[78].mxu1 %vm564_vm2, %v6566_v59 }
 0xb80   : > { %2679 = vmatprep.mubr.f32.mxu1 %v6433_v49 }
 0xc46   : > { %v2584_v15 = vpop.f32.mrb[72].mxu1 }
 0xc47   : > { %v2586_v46 = vpop.f32.mrb[73].mxu1  ;;  %v2585_v41 = vadd.f32 %v2584_v15, %v6567_v29  ;;  %v6570_v15 = vld [vmem:[#allocation22_spill] sm:$0xff] }
 0xc48   : > { %v2587_v9 = vadd.f32 %v2586_v46, %v6567_v29 }
 0xc49   : > { %v2607_v61 = vmax.f32 %v2585_v41, 0.0 }
 0xc4a   : > { %v2590_v18 = vpop.f32.mrb[74].mxu1  ;;  %v2608_v51 = vmax.f32 %v2587_v9, 0.0 }
 0xc4b   : > { %v2591_v55 = vadd.f32 %v2590_v18, %v6568_v16  ;;  %v2592_v33 = vpop.f32.mrb[75].mxu1 }
 0xc4c   : > { %v2593_v8 = vadd.f32 %v2592_v33, %v6568_v16 }
 0xc4d   : > { %v2609_v0 = vmax.f32 %v2591_v55, 0.0 }
 0xc4e   : > { %v2610_v22 = vmax.f32 %v2593_v8, 0.0  ;;  %v2596_v17 = vpop.f32.mrb[76].mxu1 }
 0xc4f   : > { %v4075_v43 = vpack.c.bf16 %v2609_v0, %v2607_v61  ;;  %v2598_v21 = vpop.f32.mrb[77].mxu1  ;;  %v2597_v25 = vadd.f32 %v2596_v17, %v6569_v14  ;;  %v6571_v0 = vpack.c.bf16 %v5790_v34, %v5780_v62  ;;  %v6574_v17 = vpack.c.bf16 %v5804_v2, %v5794_v23  ;;  %v4575_v62 = vld [vmem:[%s6270_s2 + $0x10] sm:$0xff]  ;;  %v4578_v34 = vld [vmem:[%s6270_s2 + $0x28] sm:$0xff]  ;;  %v4580_v2 = vld [vmem:[%s6270_s2 + $0x38] sm:$0xff] }
 0xc50   : > { %v4073_v50 = vpack.c.bf16 %v2610_v22, %v2608_v51  ;;  %v2599_v35 = vadd.f32 %v2598_v21, %v6569_v14  ;;  %v6572_v51 = vpack.c.bf16 %v5782_v1, %v5778_v4  ;;  %v6573_v22 = vpack.c.bf16 %v5808_v63, %v5802_v28  ;;  %v4574_v4 = vld [vmem:[%s6270_s2 + $0x8] sm:$0xff]  ;;  %v4576_v1 = vld [vmem:[%s6270_s2 + $0x18] sm:$0xff]  ;;  %v4577_v28 = vld [vmem:[%s6270_s2 + $0x20] sm:$0xff] }
 0xc51   : > { %v2611_v41 = vmax.f32 %v2597_v25, 0.0  ;;  %v4579_v23 = vld [vmem:[%s6270_s2 + $0x30] sm:$0xff]  ;;  %v4581_v63 = vld [vmem:[%s6270_s2 + $0x40] sm:$0xff] }
 0xc52   : > { %v2602_v12 = vpop.f32.mrb[78].mxu1  ;;  %4074 = vmatprep.subr.bf16.mxu1 %v4073_v50  ;;  %v2612_v9 = vmax.f32 %v2599_v35, 0.0  ;;  %v4583_v21 = vld [vmem:[%s6270_s2 + $0x50] sm:$0xff]  ;;  %v4584_v50 = vld [vmem:[%s6270_s2 + $0x58] sm:$0xff]  ;;  %v4585_v25 = vld [vmem:[%s6270_s2 + $0x60] sm:$0xff] }
 0xc53   : > { %v2603_v46 = vadd.f32 %v2602_v12, %v6570_v15  ;;  %v2604_v18 = vpop.f32.mrb[79].mxu1  ;;  %4076 = vmatpush1.bf16.msra.mxu1 %v4075_v43  ;;  %v4582_v43 = vld [vmem:[%s6270_s2 + $0x48] sm:$0xff]  ;;  %v4587_v12 = vld [vmem:[%s6270_s2 + $0x70] sm:$0xff] }
 0xc54   : > { %v2605_v33 = vadd.f32 %v2604_v18, %v6570_v15  ;;  %v4586_v35 = vld [vmem:[%s6270_s2 + $0x68] sm:$0xff] }
 0xc55   : > { %v2613_v55 = vmax.f32 %v2603_v46, 0.0  ;;  %v4588_v46 = vld [vmem:[%s6270_s2 + $0x78] sm:$0xff] }
 0xc56   : > { %v2614_v8 = vmax.f32 %v2605_v33, 0.0 }
 0xc57   : > { %v4079_v16 = vpack.c.bf16 %v2613_v55, %v2611_v41 }
 0xc58   : > { %v4077_v61 = vpack.c.bf16 %v2614_v8, %v2612_v9 }
 0xc5a   : > { %4078 = vmatprep.subr.bf16.mxu1 %v4077_v61 }
 0xc5b   : > { %4080 = vmatpush1.bf16.msra.mxu1 %v4079_v16  ;;  %v4573_v16 = vld [vmem:[%s6270_s2] sm:$0xff] }
 0xc5c   : > { %4082 = vmatprep.subr.bf16.mxu1 %v6571_v0  ;;  %v6575_v0 = vld [vmem:[#allocation25_spill] sm:$0xff] }
 0xc5f   : > { %4084 = vmatpush1.bf16.msra.mxu1 %v6572_v51 }
 0xc60   : > { %4086 = vmatprep.subr.bf16.mxu1 %v6573_v22 }
 0xc63   : > { %4088 = vmatpush1.bf16.msra.mxu1 %v6574_v17 }
 0xc66   : > { %3910 = vmatmul.mubr.msk.f32.vlgmr.msra.gmra.mrb[80].mxu1 %vm879_vm3, %v4573_v16  ;;  %v6576_v16 = vld [vmem:[#allocation23_spill] sm:$0xff] }
 0xc67   : > { %2685 = vmatprep.mubr.f32.mxu1 %v6433_v49 }
 0xc6a   : > { %3911 = vmatmul.mubr.msk.f32.gmra.mrb[82].mxu1 %vm879_vm3, %v4574_v4 }
 0xc6b   : > { %2691 = vmatprep.mubr.f32.mxu1 %v6433_v49 }
 0xc6e   : > { %3912 = vmatmul.mubr.msk.f32.gmra.mrb[84].mxu1 %vm879_vm3, %v4575_v62 }
 0xc6f   : > { %2697 = vmatprep.mubr.f32.mxu1 %v6433_v49 }
 0xc72   : > { %3913 = vmatmul.mubr.msk.f32.gmra.mrb[86].mxu1 %vm879_vm3, %v4576_v1 }
 0xc73   : > { %2703 = vmatprep.mubr.f32.mxu1 %v6433_v49 }
 0xc76   : > { %3914 = vmatmul.mubr.msk.f32.gmra.mrb[88].mxu1 %vm879_vm3, %v4577_v28 }
 0xc77   : > { %2709 = vmatprep.mubr.f32.mxu1 %v6433_v49 }
 0xc7a   : > { %3915 = vmatmul.mubr.msk.f32.gmra.mrb[90].mxu1 %vm879_vm3, %v4578_v34  ;;  %v6577_v34 = vld [vmem:[#allocation24_spill] sm:$0xff] }
 0xc7b   : > { %2715 = vmatprep.mubr.f32.mxu1 %v6433_v49 }
 0xc7e   : > { %3916 = vmatmul.mubr.msk.f32.gmra.mrb[92].mxu1 %vm879_vm3, %v4579_v23 }
 0xc7f   : > { %2721 = vmatprep.mubr.f32.mxu1 %v6433_v49 }
 0xc82   : > { %3917 = vmatmul.mubr.msk.f32.gmra.mrb[94].mxu1 %vm879_vm3, %v4580_v2 }
 0xc83   : > { %2727 = vmatprep.mubr.f32.mxu1 %v6433_v49 }
 0xc86   : > { %3918 = vmatmul.mubr.msk.f32.gmra.mrb[96].mxu1 %vm879_vm3, %v4581_v63 }
 0xc87   : > { %2733 = vmatprep.mubr.f32.mxu1 %v6433_v49 }
 0xc8a   : > { %3919 = vmatmul.mubr.msk.f32.gmra.mrb[98].mxu1 %vm879_vm3, %v4582_v43 }
 0xc8b   : > { %2739 = vmatprep.mubr.f32.mxu1 %v6433_v49 }
 0xc8e   : > { %3920 = vmatmul.mubr.msk.f32.gmra.mrb[100].mxu1 %vm879_vm3, %v4583_v21 }
 0xc8f   : > { %2745 = vmatprep.mubr.f32.mxu1 %v6433_v49 }
 0xc92   : > { %3921 = vmatmul.mubr.msk.f32.gmra.mrb[102].mxu1 %vm879_vm3, %v4584_v50  ;;  %v6578_v50 = vld [vmem:[#allocation26_spill] sm:$0xff] }
 0xc93   : > { %2751 = vmatprep.mubr.f32.mxu1 %v6433_v49 }
 0xc96   : > { %3922 = vmatmul.mubr.msk.f32.gmra.mrb[104].mxu1 %vm879_vm3, %v4585_v25 }
 0xc97   : > { %2757 = vmatprep.mubr.f32.mxu1 %v6433_v49 }
 0xc9a   : > { %3923 = vmatmul.mubr.msk.f32.gmra.mrb[106].mxu1 %vm879_vm3, %v4586_v35 }
 0xc9b   : > { %2763 = vmatprep.mubr.f32.mxu1 %v6433_v49 }
 0xc9e   : > { %3924 = vmatmul.mubr.msk.f32.gmra.mrb[108].mxu1 %vm879_vm3, %v4587_v12 }
 0xc9f   : > { %2769 = vmatprep.mubr.f32.mxu1 %v6433_v49 }
 0xca2   : > { %3925 = vmatmul.mubr.msk.f32.gmra.mrb[110].mxu1 %vm879_vm3, %v4588_v46 }
 0xca3   : > { %3410 = vmatprep.mubr.f32.mxu1 %v6433_v49 }
 0xd39   : > { %v2681_v18 = vpop.f32.mrb[80].mxu1 }
 0xd3a   : > { %v2683_v33 = vpop.f32.mrb[81].mxu1  ;;  %v2682_v51 = vadd.f32 %v2681_v18, %v6575_v0 }
 0xd3b   : > { %v2684_v17 = vadd.f32 %v2683_v33, %v6575_v0  ;;  %v6579_v33 = vld [vmem:[#allocation27_spill] sm:$0xff] }
 0xd3c   : > { %v2776_v28 = vmul.f32 0.5, %v2682_v51 }
 0xd3d   : > { %v2687_v41 = vpop.f32.mrb[82].mxu1  ;;  %v2777_v63 = vmul.f32 0.5, %v2684_v17 }
 0xd3e   : > { %v2689_v55 = vpop.f32.mrb[83].mxu1  ;;  %v2688_v4 = vadd.f32 %v2687_v41, %v6576_v16  ;;  %4477 = vtanh.f32 %v2776_v28  ;;  %v6581_v28 = vld [vmem:[#allocation29_spill] sm:$0xff] }
 0xd3f   : > { %v2690_v62 = vadd.f32 %v2689_v55, %v6576_v16  ;;  %4479 = vtanh.f32 %v2777_v63  ;;  %v6580_v16 = vld [vmem:[#allocation28_spill] sm:$0xff] }
 0xd40   : > { %v2778_v21 = vmul.f32 0.5, %v2688_v4 }
 0xd41   : > { %v2693_v9 = vpop.f32.mrb[84].mxu1  ;;  %v2779_v35 = vmul.f32 0.5, %v2690_v62 }
 0xd42   : > { %v2695_v8 = vpop.f32.mrb[85].mxu1  ;;  %v2694_v25 = vadd.f32 %v2693_v9, %v6578_v50  ;;  %4481 = vtanh.f32 %v2778_v21 }
 0xd43   : > { %v2696_v46 = vadd.f32 %v2695_v8, %v6578_v50  ;;  %4483 = vtanh.f32 %v2779_v35 }
 0xd44   : > { %v2780_v17 = vmul.f32 0.5, %v2694_v25  ;;  %v6582_v25 = vld [vmem:[#allocation30_spill] sm:$0xff] }
 0xd45   : > { %v2699_v61 = vpop.f32.mrb[86].mxu1  ;;  %v2781_v62 = vmul.f32 0.5, %v2696_v46 }
 0xd46   : > { %v2701_v22 = vpop.f32.mrb[87].mxu1 }
 0xd49   : > { %v2705_v1 = vpop.f32.mrb[88].mxu1 }
 0xd4a   : > { %v2706_v23 = vadd.f32 %v2705_v1, %v6577_v34  ;;  %v2707_v2 = vpop.f32.mrb[89].mxu1  ;;  %v2700_v1 = vadd.f32 %v2699_v61, %v6580_v16 }
 0xd4b   : > { %v2708_v43 = vadd.f32 %v2707_v2, %v6577_v34 }
 0xd4c   : > { %v2808_v18 = vmul.f32 0.5, %v2706_v23  ;;  %v2702_v23 = vadd.f32 %v2701_v22, %v6580_v16 }
 0xd4d   : > { %v2711_v12 = vpop.f32.mrb[90].mxu1  ;;  %v2809_v0 = vmul.f32 0.5, %v2708_v43  ;;  %v2782_v43 = vmul.f32 0.5, %v2700_v1 }
 0xd4e   : > { %v2712_v41 = vadd.f32 %v2711_v12, %v6579_v33  ;;  %v2713_v55 = vpop.f32.mrb[91].mxu1  ;;  %4485 = vtanh.f32 %v2808_v18  ;;  %v2783_v46 = vmul.f32 0.5, %v2702_v23  ;;  %v6584_v23 = vld [vmem:[#allocation32_spill] sm:$0xff] }
 0xd4f   : > { %v2714_v51 = vadd.f32 %v2713_v55, %v6579_v33  ;;  %4487 = vtanh.f32 %v2809_v0  ;;  %v4478_v33 = vpop.eup %4477 }
 0xd50   : > { %v2810_v4 = vmul.f32 0.5, %v2712_v41  ;;  %4489 = vtanh.f32 %v2780_v17  ;;  %v4480_v22 = vpop.eup %4479 }
 0xd51   : > { %v2717_v9 = vpop.f32.mrb[92].mxu1  ;;  %v2811_v2 = vmul.f32 0.5, %v2714_v51  ;;  %v4482_v55 = vpop.eup %4481  ;;  %v6583_v51 = vld [vmem:[#allocation31_spill] sm:$0xff] }
 0xd52   : > { %v2718_v34 = vadd.f32 %v2717_v9, %v6581_v28  ;;  %v2719_v8 = vpop.f32.mrb[93].mxu1  ;;  %4491 = vtanh.f32 %v2810_v4  ;;  %v4484_v1 = vpop.eup %4483 }
 0xd53   : > { %v2720_v63 = vadd.f32 %v2719_v8, %v6581_v28  ;;  %4493 = vtanh.f32 %v2781_v62 }
 0xd54   : > { %v2812_v21 = vmul.f32 0.5, %v2718_v34  ;;  %4495 = vtanh.f32 %v2811_v2 }
 0xd55   : > { %v2723_v50 = vpop.f32.mrb[94].mxu1  ;;  %v2813_v61 = vmul.f32 0.5, %v2720_v63  ;;  %4497 = vtanh.f32 %v2782_v43 }
 0xd56   : > { %v2724_v35 = vadd.f32 %v2723_v50, %v6582_v25  ;;  %v2725_v12 = vpop.f32.mrb[95].mxu1  ;;  %4499 = vtanh.f32 %v2812_v21  ;;  %v2792_v21 = vmul.f32 0.5, %v4478_v33 }
 0xd57   : > { %v2726_v18 = vadd.f32 %v2725_v12, %v6582_v25  ;;  %4501 = vtanh.f32 %v2813_v61 }
 0xd58   : > { %v2814_v0 = vmul.f32 0.5, %v2724_v35  ;;  %4503 = vtanh.f32 %v2783_v46  ;;  %v4486_v62 = vpop.eup %4485  ;;  %v2793_v35 = vmul.f32 0.5, %v4480_v22  ;;  %v2800_v33 = vadd.f32 0.5, %v2792_v21 }
 0xd59   : > { %v2729_v41 = vpop.f32.mrb[96].mxu1  ;;  %v2815_v4 = vmul.f32 0.5, %v2726_v18  ;;  %v4488_v28 = vpop.eup %4487  ;;  %v2824_v50 = vmul.f32 0.5, %v4486_v62  ;;  %v2794_v18 = vmul.f32 0.5, %v4482_v55 }
 0xd5a   : > { %v2730_v17 = vadd.f32 %v2729_v41, %v6583_v51  ;;  %v2731_v16 = vpop.f32.mrb[97].mxu1  ;;  %v4490_v8 = vpop.eup %4489  ;;  %v2825_v12 = vmul.f32 0.5, %v4488_v28 }
 0xd5b   : > { %v2732_v9 = vadd.f32 %v2731_v16, %v6583_v51  ;;  %v6585_v16 = vld [vmem:[#allocation33_spill] sm:$0xff]  ;;  %v2832_v62 = vadd.f32 0.5, %v2824_v50  ;;  %v2802_v55 = vadd.f32 0.5, %v2794_v18 }
 0xd5c   : > { %4505 = vtanh.f32 %v2730_v17  ;;  %v4492_v43 = vpop.eup %4491  ;;  %v2795_v17 = vmul.f32 0.5, %v4484_v1  ;;  %v2833_v22 = vadd.f32 0.5, %v2825_v12 }
 0xd5d   : > { %4507 = vtanh.f32 %v2732_v9  ;;  %v2735_v34 = vpop.f32.mrb[98].mxu1  ;;  %v4494_v25 = vpop.eup %4493 }
 0xd5e   : > { %4509 = vtanh.f32 %v2814_v0  ;;  %v2736_v2 = vadd.f32 %v2735_v34, %v6584_v23  ;;  %v2737_v63 = vpop.f32.mrb[99].mxu1  ;;  %v4496_v46 = vpop.eup %4495  ;;  %v2826_v0 = vmul.f32 0.5, %v4492_v43  ;;  %v2797_v14 = vmul.f32 0.5, %v4494_v25 }
 0xd5f   : > { %4511 = vtanh.f32 %v2815_v4  ;;  %v2738_v61 = vadd.f32 %v2737_v63, %v6584_v23  ;;  %v4498_v51 = vpop.eup %4497  ;;  %v2801_v63 = vadd.f32 0.5, %v2793_v35  ;;  %v2827_v28 = vmul.f32 0.5, %v4496_v46 }
 0xd60   : > { %4513 = vtanh.f32 %v2736_v2  ;;  %v4500_v15 = vpop.eup %4499  ;;  %v2803_v29 = vadd.f32 0.5, %v2795_v17 }
 0xd61   : > { %4515 = vtanh.f32 %v2738_v61  ;;  %v2741_v41 = vpop.f32.mrb[100].mxu1  ;;  %v4502_v23 = vpop.eup %4501  ;;  %v2796_v61 = vmul.f32 0.5, %v4490_v8  ;;  %v2828_v59 = vmul.f32 0.5, %v4500_v15  ;;  %v2881_v8 = vmul.f32 %v2833_v22, %v5743_v37 }
 0xd62   : > { %v2742_v9 = vadd.f32 %v2741_v41, %v6585_v16  ;;  %v2743_v34 = vpop.f32.mrb[101].mxu1  ;;  %v4504_v2 = vpop.eup %4503  ;;  %v2834_v41 = vadd.f32 0.5, %v2826_v0  ;;  %v2829_v35 = vmul.f32 0.5, %v4502_v23  ;;  %v2835_v25 = vadd.f32 0.5, %v2827_v28 }
 0xd63   : > { %v2744_v4 = vadd.f32 %v2743_v34, %v6585_v16  ;;  %v2880_v16 = vmul.f32 %v2832_v62, %v5740_v47  ;;  %v2804_v17 = vadd.f32 0.5, %v2796_v61  ;;  %v2805_v0 = vadd.f32 0.5, %v2797_v14 }
 0xd64   : > { %4517 = vtanh.f32 %v2742_v9  ;;  %v2882_v58 = vmul.f32 %v2834_v41, %v5748_v5  ;;  %v2836_v47 = vadd.f32 0.5, %v2828_v59 }
 0xd65   : > { %4519 = vtanh.f32 %v2744_v4  ;;  %v2747_v1 = vpop.f32.mrb[102].mxu1 }
 0xd66   : > { %v4506_v43 = vpop.eup %4505  ;;  %v2748_v21 = vadd.f32 %v2747_v1, %v6493_v54  ;;  %v2749_v50 = vpop.f32.mrb[103].mxu1 }
 0xd67   : > { %v4508_v38 = vpop.eup %4507  ;;  %v2888_v12 = vmul.f32 %v4506_v43, %v2800_v33  ;;  %v2750_v46 = vadd.f32 %v2749_v50, %v6493_v54  ;;  %v2837_v43 = vadd.f32 0.5, %v2829_v35  ;;  %v2799_v50 = vmul.f32 0.5, %v4504_v2 }
 0xd68   : > { %v4510_v9 = vpop.eup %4509  ;;  %v2889_v18 = vmul.f32 %v4508_v38, %v2801_v63  ;;  %4521 = vtanh.f32 %v2748_v21  ;;  %v2883_v63 = vmul.f32 %v2835_v25, %v5751_v32  ;;  %v2798_v21 = vmul.f32 0.5, %v4498_v51 }
 0xd69   : > { %v4512_v34 = vpop.eup %4511  ;;  %v2896_v15 = vadd.f32 %v2888_v12, %v2880_v16  ;;  %4523 = vtanh.f32 %v2750_v46  ;;  %v2753_v4 = vpop.f32.mrb[104].mxu1  ;;  %v2830_v37 = vmul.f32 0.5, %v4510_v9  ;;  %v2884_v12 = vmul.f32 %v2836_v47, %v5757_v45 }
 0xd6a   : > { %v4514_v1 = vpop.eup %4513  ;;  %v2897_v62 = vadd.f32 %v2889_v18, %v2881_v8  ;;  %v2754_v33 = vadd.f32 %v2753_v4, %v5184_v44  ;;  %v2755_v54 = vpop.f32.mrb[105].mxu1  ;;  %v2831_v14 = vmul.f32 0.5, %v4512_v34  ;;  %v2806_v25 = vadd.f32 0.5, %v2798_v21 }
 0xd6b   : > { %v4516_v23 = vpop.eup %4515  ;;  %v2890_v22 = vmul.f32 %v4514_v1, %v2802_v55  ;;  %v2756_v38 = vadd.f32 %v2755_v54, %v5184_v44  ;;  %v2885_v44 = vmul.f32 %v2837_v43, %v5759_v53  ;;  %v2838_v32 = vadd.f32 0.5, %v2830_v37 }
 0xd6c   : > { %v2891_v28 = vmul.f32 %v4516_v23, %v2803_v29  ;;  %v2848_v61 = vmul.f32 0.5, %v2754_v33  ;;  %v2839_v51 = vadd.f32 0.5, %v2831_v14  ;;  %v2807_v1 = vadd.f32 0.5, %v2799_v50  ;;  %v6586_v14 = vld [vmem:[#allocation39_spill] sm:$0xff] }
 0xd6d   : > { %v2898_v16 = vadd.f32 %v2890_v22, %v2882_v58  ;;  %v2849_v5 = vmul.f32 0.5, %v2756_v38  ;;  %v2759_v59 = vpop.f32.mrb[106].mxu1 }
 0xd6e   : > { %v4518_v41 = vpop.eup %4517  ;;  %v2899_v46 = vadd.f32 %v2891_v28, %v2883_v63  ;;  %4525 = vtanh.f32 %v2848_v61  ;;  %v2760_v35 = vadd.f32 %v2759_v59, %v6495_v3  ;;  %v2761_v55 = vpop.f32.mrb[107].mxu1 }
 0xd6f   : > { %v4520_v9 = vpop.eup %4519  ;;  %v2892_v8 = vmul.f32 %v4518_v41, %v2804_v17  ;;  %v2762_v29 = vadd.f32 %v2761_v55, %v6495_v3  ;;  %4527 = vtanh.f32 %v2896_v15  ;;  %v2886_v17 = vmul.f32 %v2838_v32, %v5767_v27 }
 0xd70   : > { %v2893_v58 = vmul.f32 %v4520_v9, %v2805_v0  ;;  %v2850_v2 = vmul.f32 0.5, %v2760_v35  ;;  %4529 = vtanh.f32 %v2849_v5  ;;  %v2887_v15 = vmul.f32 %v2839_v51, %v5769_v60 }
 0xd71   : > { %v2900_v18 = vadd.f32 %v2892_v8, %v2884_v12  ;;  %v2851_v45 = vmul.f32 0.5, %v2762_v29  ;;  %v2765_v34 = vpop.f32.mrb[108].mxu1 }
 0xd72   : > { %v4522_v4 = vpop.eup %4521  ;;  %v2901_v47 = vadd.f32 %v2893_v58, %v2885_v44  ;;  %4531 = vtanh.f32 %v2850_v2  ;;  %v2766_v33 = vadd.f32 %v2765_v34, %v6549_v26  ;;  %v2767_v53 = vpop.f32.mrb[109].mxu1 }
 0xd73   : > { %v4524_v54 = vpop.eup %4523  ;;  %4533 = vtanh.f32 %v2897_v62  ;;  %v2894_v3 = vmul.f32 %v4522_v4, %v2806_v25  ;;  %v2768_v0 = vadd.f32 %v2767_v53, %v6549_v26  ;;  %v6587_v4 = vld [vmem:[#allocation42_spill] sm:$0xff] }
 0xd74   : > { %4535 = vtanh.f32 %v2898_v16  ;;  %v2895_v23 = vmul.f32 %v4524_v54, %v2807_v1  ;;  %v2852_v43 = vmul.f32 0.5, %v2766_v33 }
 0xd75   : > { %v2902_v37 = vadd.f32 %v2894_v3, %v2886_v17  ;;  %4537 = vtanh.f32 %v2851_v45  ;;  %v2853_v22 = vmul.f32 0.5, %v2768_v0  ;;  %v2771_v38 = vpop.f32.mrb[110].mxu1 }
 0xd76   : > { %v2903_v63 = vadd.f32 %v2895_v23, %v2887_v15  ;;  %4539 = vtanh.f32 %v2852_v43  ;;  %v2772_v28 = vadd.f32 %v2771_v38, %v6586_v14  ;;  %v2773_v61 = vpop.f32.mrb[111].mxu1 }
 0xd77   : > { %4541 = vtanh.f32 %v2899_v46  ;;  %v2774_v27 = vadd.f32 %v2773_v61, %v6586_v14 }
 0xd78   : > { %v4526_v62 = vpop.eup %4525  ;;  %4543 = vtanh.f32 %v2900_v18  ;;  %v2854_v26 = vmul.f32 0.5, %v2772_v28  ;;  %v6589_v28 = vld [vmem:[#allocation44_spill] sm:$0xff] }
 0xd79   : > { %v2864_v21 = vmul.f32 0.5, %v4526_v62  ;;  %4545 = vtanh.f32 %v2853_v22  ;;  %v2855_v60 = vmul.f32 0.5, %v2774_v27  ;;  %v4528_v50 = vpop.eup %4527 }
 0xd7a   : > { %4547 = vtanh.f32 %v2854_v26  ;;  %v4530_v16 = vpop.eup %4529 }
 0xd7b   : > { %v2872_v5 = vadd.f32 0.5, %v2864_v21  ;;  %4549 = vtanh.f32 %v2855_v60  ;;  %v2865_v41 = vmul.f32 0.5, %v4530_v16 }
 0xd7c   : > { %v4532_v59 = vpop.eup %4531  ;;  %4551 = vtanh.f32 %v2901_v47  ;;  %v6588_v47 = vld [vmem:[#allocation43_spill] sm:$0xff] }
 0xd7d   : > { %v4534_v12 = vpop.eup %4533  ;;  %v2912_v35 = vmul.f32 %v4528_v50, %v2872_v5  ;;  %v2866_v55 = vmul.f32 0.5, %v4532_v59  ;;  %4553 = vtanh.f32 %v2902_v37  ;;  %v2873_v9 = vadd.f32 0.5, %v2865_v41 }
 0xd7e   : > { %v4536_v46 = vpop.eup %4535  ;;  %4555 = vtanh.f32 %v2903_v63 }
 0xd7f   : > { %v4538_v44 = vpop.eup %4537  ;;  %v2874_v32 = vadd.f32 0.5, %v2866_v55  ;;  %v2913_v29 = vmul.f32 %v4534_v12, %v2873_v9  ;;  %v2920_v1 = vmul.f32 %v2912_v35, %v6587_v4  ;;  %v6590_v12 = vld [vmem:[#allocation45_spill] sm:$0xff] }
 0xd80   : > { %v4540_v8 = vpop.eup %4539  ;;  %v2867_v51 = vmul.f32 0.5, %v4538_v44 }
 0xd81   : > { %v4542_v58 = vpop.eup %4541  ;;  %v2914_v2 = vmul.f32 %v4536_v46, %v2874_v32  ;;  %v2868_v25 = vmul.f32 0.5, %v4540_v8  ;;  %v2921_v37 = vmul.f32 %v2913_v29, %v6587_v4 }
 0xd82   : > { %v4544_v18 = vpop.eup %4543  ;;  %v2875_v45 = vadd.f32 0.5, %v2867_v51 }
 0xd83   : > { %v4546_v34 = vpop.eup %4545  ;;  %v2922_v33 = vmul.f32 %v2914_v2, %v6588_v47  ;;  %v2876_v53 = vadd.f32 0.5, %v2868_v25 }
 0xd84   : > { %v4548_v54 = vpop.eup %4547  ;;  %v2915_v17 = vmul.f32 %v4542_v58, %v2875_v45  ;;  %v2869_v3 = vmul.f32 0.5, %v4546_v34 }
 0xd85   : > { %v4550_v0 = vpop.eup %4549  ;;  %v2928_v15 = vadd.f32 %v2922_v33, %v2920_v1  ;;  %v2916_v23 = vmul.f32 %v4544_v18, %v2876_v53  ;;  %v2870_v43 = vmul.f32 0.5, %v4548_v54 }
 0xd86   : > { %v2923_v22 = vmul.f32 %v2915_v17, %v6588_v47  ;;  %v2877_v38 = vadd.f32 0.5, %v2869_v3  ;;  %v2871_v63 = vmul.f32 0.5, %v4550_v0  ;;  %v4552_v14 = vpop.eup %4551  ;;  %v6591_v0 = vld [vmem:[#allocation5_spill] sm:$0xff] }
 0xd87   : > { %v2924_v61 = vmul.f32 %v2916_v23, %v6589_v28  ;;  %v2878_v27 = vadd.f32 0.5, %v2870_v43  ;;  %v4554_v62 = vpop.eup %4553  ;;  %v6592_v23 = vld [vmem:[#allocation9_spill] sm:$0xff] }
 0xd88   : > { %v2937_v26 = vadd.f32 %v2923_v22, %v2921_v37  ;;  %v2917_v21 = vmul.f32 %v4552_v14, %v2877_v38  ;;  %v2879_v60 = vadd.f32 0.5, %v2871_v63  ;;  %v4556_v50 = vpop.eup %4555  ;;  %v6593_v37 = vld [vmem:[#allocation11_spill] sm:$0xff]  ;;  %v6594_v38 = vld [vmem:[#allocation14_spill] sm:$0xff] }
 0xd89   : > { %v2929_v16 = vadd.f32 %v2928_v15, %v2924_v61  ;;  %v2918_v5 = vmul.f32 %v4554_v62, %v2878_v27  ;;  %v6595_v63 = vld [vmem:[#allocation7_spill] sm:$0xff]  ;;  %v6596_v14 = vld [vmem:[#allocation10_spill] sm:$0xff] }
 0xd8a   : > { %v2925_v59 = vmul.f32 %v2917_v21, %v6589_v28  ;;  %v2919_v41 = vmul.f32 %v4556_v50, %v2879_v60  ;;  %v6598_v27 = vld [vmem:[#allocation15_spill] sm:$0xff]  ;;  %v6600_v60 = vld [vmem:[#allocation8_spill] sm:$0xff] }
 0xd8b   : > { %v2926_v35 = vmul.f32 %v2918_v5, %v6590_v12  ;;  %v6601_v50 = vld [vmem:[#allocation12_spill] sm:$0xff] }
 0xd8c   : > { %v2938_v55 = vadd.f32 %v2937_v26, %v2925_v59  ;;  %v2927_v46 = vmul.f32 %v2919_v41, %v6590_v12  ;;  %v6599_v26 = vld [vmem:[#allocation6_spill] sm:$0xff] }
 0xd8d   : > { %v2930_v9 = vadd.f32 %v2929_v16, %v2926_v35 }
 0xd8e   : > { %v2939_v44 = vadd.f32 %v2938_v55, %v2927_v46 }
 0xd8f   : > { %v2931_v32 = vrot.slane %v2930_v9, 4 }
 0xd90   : > { %v2940_v8 = vrot.slane %v2939_v44, 4 }
 0xd91   : > { %v2932_v29 = vadd.f32 %v2931_v32, %v2930_v9 }
 0xd92   : > { %v2941_v51 = vadd.f32 %v2940_v8, %v2939_v44 }
 0xd93   : > { %v2933_v58 = vrot.slane %v2932_v29, 2 }
 0xd94   : > { %v2942_v2 = vrot.slane %v2941_v51, 2 }
 0xd95   : > { %v2934_v25 = vadd.f32 %v2933_v58, %v2932_v29 }
 0xd96   : > { %v2943_v18 = vadd.f32 %v2942_v2, %v2941_v51 }
 0xd97   : > { %v2935_v45 = vrot.slane %v2934_v25, 1 }
 0xd98   : > { %v2944_v34 = vrot.slane %v2943_v18, 1 }
 0xd99   : > { %v2936_v4 = vadd.f32 %v2935_v45, %v2934_v25 }
 0xd9a   : > { %v2945_v1 = vadd.f32 %v2944_v34, %v2943_v18 }
 0xd9b   : > { %v2946_v47 = vadd.f32 %v2936_v4, %v5272_v36 }
 0xd9c   : > { %v2947_v33 = vadd.f32 %v2945_v1, %v5272_v36 }
 0xd9d   : > { %v6029_v53 = vadd.f32 %v2946_v47, %v5821_v39 }
 0xd9e   : > { %v6032_v54 = vadd.f32 %v2947_v33, %v5824_v30  ;;  %v6597_v30 = vld [vmem:[#allocation13_spill] sm:$0xff] }
 0xd9f   : > { %v2953_v17 = vrot.slane %v6029_v53, %v5275_v48 }
 0xda0   : > { %v2957_v3 = vrot.slane %v6032_v54, %v5275_v48 }
 0xda1   : > { %v2958_v15 = vmul.f32 %v2953_v17, %v6591_v0  ;;  %v2960_v43 = vmul.f32 %v2953_v17, %v6592_v23  ;;  %v2962_v22 = vmul.f32 %v2953_v17, %v6593_v37  ;;  %v2964_v36 = vmul.f32 %v2953_v17, %v6594_v38 }
 0xda2   : > { %v2959_v39 = vmul.f32 %v2957_v3, %v6595_v63  ;;  %v2961_v28 = vmul.f32 %v2957_v3, %v6596_v14  ;;  %v2963_v61 = vmul.f32 %v2957_v3, %v6597_v30  ;;  %v2965_v62 = vmul.f32 %v2957_v3, %v6598_v27  ;;  %v6094_v14 = vld [vmem:[%s6272_s4 + $0x8] sm:$0xff]  ;;  %v6101_v30 = vld [vmem:[%s6272_s4 + $0x10] sm:$0xff] }
 0xda3   : > { %v2966_v21 = vadd.f32 %v2958_v15, %v6599_v26  ;;  %v2968_v48 = vadd.f32 %v2960_v43, %v6600_v60  ;;  %v2970_v16 = vadd.f32 %v2962_v22, %v6601_v50  ;;  %v2972_v5 = vadd.f32 %v2964_v36, %v4899_v52  ;;  %v6605_v26 = vld [vmem:[#allocation19_spill] sm:$0xff]  ;;  %v6606_v50 = vld [vmem:[#allocation20_spill] sm:$0xff] }
 0xda4   : > { %v2967_v59 = vadd.f32 %v2959_v39, %v4870_v19  ;;  %v2969_v41 = vadd.f32 %v2961_v28, %v4875_v24  ;;  %v2971_v12 = vadd.f32 %v2963_v61, %v4894_v42  ;;  %v2973_v35 = vadd.f32 %v2965_v62, %v4905_v56  ;;  %v6603_v39 = vld [vmem:[#allocation17_spill] sm:$0xff]  ;;  %v6107_v61 = vld [vmem:[%s6272_s4 + $0x18] sm:$0xff] }
 0xda5   : > { %v2974_v55 = vmax.f32 %v2966_v21, 0.0  ;;  %v2976_v46 = vmax.f32 %v2968_v48, 0.0  ;;  %v2978_v9 = vmax.f32 %v2970_v16, 0.0  ;;  %v2980_v44 = vmax.f32 %v2972_v5, 0.0 }
 0xda6   : > { %v2975_v32 = vmax.f32 %v2967_v59, 0.0  ;;  %v2977_v8 = vmax.f32 %v2969_v41, 0.0  ;;  %v2979_v29 = vmax.f32 %v2971_v12, 0.0  ;;  %v2981_v51 = vmax.f32 %v2973_v35, 0.0 }
 0xda7   : > { %v4091_v58 = vpack.c.bf16 %v2976_v46, %v2974_v55  ;;  %v4095_v2 = vpack.c.bf16 %v2980_v44, %v2978_v9  ;;  %v4693_v28 = vmov 0  }
 0xda8   : > { %v4089_v25 = vpack.c.bf16 %v2977_v8, %v2975_v32  ;;  %v4093_v52 = vpack.c.bf16 %v2981_v51, %v2979_v29  ;;  %4230 = vset.pattern.permute.xlu1 %v4693_v28  ;;  %4231 = vset.pattern.permute.xlu0 %v4693_v28  ;;  %v6607_v8 = vld [vmem:[#allocation21_spill] sm:$0xff] }
 0xda9   : > { %3191 = vperm.xlu0 %4231, %v6094_v14  }
 0xdaa   : > { %4090 = vmatprep.subr.bf16.mxu0 %v4089_v25 }
 0xdab   : > { %4092 = vmatpush1.bf16.msra.mxu0 %v4091_v58 }
 0xdac   : > { %4094 = vmatprep.subr.bf16.mxu0 %v4093_v52 }
 0xdaf   : > { %4096 = vmatpush1.bf16.msra.mxu0 %v4095_v2  ;;  %v6608_v2 = vld [vmem:[#allocation22_spill] sm:$0xff] }
 0xdb2   : > { %3926 = vmatmul.mubr.msk.f32.vlgmr.msra.gmra.mrb[96].mxu0 %vm564_vm2, %v4911_v6 }
 0xdb3   : > { %3052 = vmatprep.mubr.f32.mxu0 %v6433_v49 }
 0xdb6   : > { %3927 = vmatmul.mubr.msk.f32.gmra.mrb[98].mxu0 %vm564_vm2, %v4915_v7 }
 0xdb7   : > { %3058 = vmatprep.mubr.f32.mxu0 %v6433_v49 }
 0xdba   : > { %3928 = vmatmul.mubr.msk.f32.gmra.mrb[100].mxu0 %vm564_vm2, %v4920_v10 }
 0xdbb   : > { %3064 = vmatprep.mubr.f32.mxu0 %v6433_v49 }
 0xdbe   : > { %3929 = vmatmul.mubr.msk.f32.gmra.mrb[102].mxu0 %vm564_vm2, %v4925_v11 }
 0xdbf   : > { %3143 = vmatprep.mubr.f32.mxu0 %v6433_v49 }
 0xe85   : > { %v3048_v19 = vpop.f32.mrb[96].mxu0 }
 0xe86   : > { %v3050_v24 = vpop.f32.mrb[97].mxu0  ;;  %v3049_v42 = vadd.f32 %v3048_v19, %v4935_v13 }
 0xe87   : > { %v3051_v56 = vadd.f32 %v3050_v24, %v4935_v13 }
 0xe88   : > { %v3071_v10 = vmax.f32 %v3049_v42, 0.0 }
 0xe89   : > { %v3054_v6 = vpop.f32.mrb[98].mxu0  ;;  %v3072_v4 = vmax.f32 %v3051_v56, 0.0 }
 0xe8a   : > { %v3055_v7 = vadd.f32 %v3054_v6, %v4937_v20  ;;  %v3056_v18 = vpop.f32.mrb[99].mxu0 }
 0xe8b   : > { %v3057_v45 = vadd.f32 %v3056_v18, %v4937_v20 }
 0xe8c   : > { %v3073_v34 = vmax.f32 %v3055_v7, 0.0 }
 0xe8d   : > { %v3074_v1 = vmax.f32 %v3057_v45, 0.0  ;;  %v3060_v47 = vpop.f32.mrb[100].mxu0  ;;  %v3180_v45 = vld [vmem:[%s6271_s3] sm:$0xff] }
 0xe8e   : > { %v4099_v11 = vpack.c.bf16 %v3073_v34, %v3071_v10  ;;  %v3062_v33 = vpop.f32.mrb[101].mxu0  ;;  %v3061_v3 = vadd.f32 %v3060_v47, %v4943_v31  ;;  %v3181_v10 = vld [vmem:[%s6271_s3 + $0x8] sm:$0xff]  ;;  %v3182_v34 = vld [vmem:[%s6271_s3 + $0x10] sm:$0xff] }
 0xe8f   : > { %v4097_v17 = vpack.c.bf16 %v3074_v1, %v3072_v4  ;;  %v3063_v0 = vadd.f32 %v3062_v33, %v4943_v31  ;;  %v6602_v31 = vld [vmem:[#allocation16_spill] sm:$0xff]  ;;  %v3183_v4 = vld [vmem:[%s6271_s3 + $0x18] sm:$0xff]  ;;  %v4694_v1 = vmov 1  }
 0xe90   : > { %v3075_v43 = vmax.f32 %v3061_v3, 0.0  ;;  %4232 = vset.pattern.permute.xlu0 %v4694_v1 }
 0xe91   : > { %v3066_v15 = vpop.f32.mrb[102].mxu0  ;;  %4098 = vmatprep.subr.bf16.mxu0 %v4097_v17  ;;  %v3076_v22 = vmax.f32 %v3063_v0, 0.0  ;;  %v3192_v17 = vpop.permute.xlu0 %3191 }
 0xe92   : > { %v3067_v13 = vadd.f32 %v3066_v15, %v4946_v40  ;;  %v3068_v23 = vpop.f32.mrb[103].mxu0  ;;  %4100 = vmatpush1.bf16.msra.mxu0 %v4099_v11 }
 0xe93   : > { %v3069_v20 = vadd.f32 %v3068_v23, %v4946_v40  ;;  %v6604_v40 = vld [vmem:[#allocation18_spill] sm:$0xff] }
 0xe94   : > { %v3077_v37 = vmax.f32 %v3067_v13, 0.0 }
 0xe95   : > { %v3078_v38 = vmax.f32 %v3069_v20, 0.0 }
 0xe96   : > { %v4103_v36 = vpack.c.bf16 %v3077_v37, %v3075_v43 }
 0xe97   : > { %v4101_v63 = vpack.c.bf16 %v3078_v38, %v3076_v22 }
 0xe99   : > { %4102 = vmatprep.subr.bf16.mxu0 %v4101_v63 }
 0xe9a   : > { %4104 = vmatpush1.bf16.msra.mxu0 %v4103_v36 }
 0xe9d   : > { %3930 = vmatmul.mubr.msk.f32.vlgmr.msra.gmra.mrb[104].mxu0 %vm564_vm2, %v4951_v57  ;;  %v6089_v57 = vld [vmem:[%s6272_s4] sm:$0xff] }
 0xe9e   : > { %3149 = vmatprep.mubr.f32.mxu0 %v6433_v49  ;;  %3186 = vperm.xlu1 %4230, %v6089_v57  }
 0xe9f   : > { %3319 = vperm.xlu0 %4232, %v6089_v57  }
 0xea1   : > { %3931 = vmatmul.mubr.msk.f32.gmra.mrb[106].mxu0 %vm564_vm2, %v6602_v31 }
 0xea2   : > { %3155 = vmatprep.mubr.f32.mxu0 %v6433_v49  ;;  %3196 = vperm.xlu1 %4230, %v6101_v30  }
 0xea3   : > { %3331 = vperm.xlu0 %4232, %v6107_v61  }
 0xea5   : > { %3932 = vmatmul.mubr.msk.f32.gmra.mrb[108].mxu0 %vm564_vm2, %v6603_v39 }
 0xea6   : > { %3161 = vmatprep.mubr.f32.mxu0 %v6433_v49  ;;  %3201 = vperm.xlu1 %4230, %v6107_v61  }
 0xea9   : > { %3933 = vmatmul.mubr.msk.f32.gmra.mrb[110].mxu0 %vm564_vm2, %v6604_v40 }
 0xeaa   : > { %3280 = vmatprep.mubr.f32.mxu0 %v6433_v49  ;;  %4233 = vset.pattern.permute.xlu1 %v4694_v1 }
 0xeab   : > { %3323 = vperm.xlu1 %4233, %v6094_v14  }
 0xeaf   : > { %3327 = vperm.xlu1 %4233, %v6101_v30  }
 0xf1d   : > { %v3187_v47 = vpop.permute.xlu1 %3186 }
 0xf21   : > { %v3197_v20 = vpop.permute.xlu1 %3196 }
 0xf70   : > { %v3145_v27 = vpop.f32.mrb[104].mxu0 }
 0xf71   : > { %v3147_v62 = vpop.f32.mrb[105].mxu0  ;;  %v3146_v21 = vadd.f32 %v3145_v27, %v6605_v26  ;;  %v3202_v27 = vpop.permute.xlu1 %3201 }
 0xf72   : > { %v3148_v60 = vadd.f32 %v3147_v62, %v6605_v26 }
 0xf73   : > { %v3168_v41 = vmax.f32 %v3146_v21, 0.0 }
 0xf74   : > { %v3151_v48 = vpop.f32.mrb[106].mxu0  ;;  %v3169_v35 = vmax.f32 %v3148_v60, 0.0 }
 0xf75   : > { %v3152_v16 = vadd.f32 %v3151_v48, %v6606_v50  ;;  %v3153_v5 = vpop.f32.mrb[107].mxu0 }
 0xf76   : > { %v3154_v59 = vadd.f32 %v3153_v5, %v6606_v50 }
 0xf77   : > { %v3170_v12 = vmax.f32 %v3152_v16, 0.0 }
 0xf78   : > { %v3171_v55 = vmax.f32 %v3154_v59, 0.0  ;;  %v3157_v46 = vpop.f32.mrb[108].mxu0 }
 0xf79   : > { %v4107_v9 = vpack.c.bf16 %v3170_v12, %v3168_v41  ;;  %v3159_v44 = vpop.f32.mrb[109].mxu0  ;;  %v3158_v29 = vadd.f32 %v3157_v46, %v6607_v8  ;;  %v3940_v46 = vld [vmem:[%s6271_s3 + $0x30] sm:$0xff] }
 0xf7a   : > { %v4105_v32 = vpack.c.bf16 %v3171_v55, %v3169_v35  ;;  %v3160_v51 = vadd.f32 %v3159_v44, %v6607_v8  ;;  %v3938_v35 = vld [vmem:[%s6271_s3 + $0x20] sm:$0xff]  ;;  %v3939_v55 = vld [vmem:[%s6271_s3 + $0x28] sm:$0xff]  ;;  %v4695_v44 = vmov 2   ;;  %v3320_v8 = vpop.permute.xlu0 %3319 }
 0xf7b   : > { %v3172_v24 = vmax.f32 %v3158_v29, 0.0  ;;  %4234 = vset.pattern.permute.xlu1 %v4695_v44  ;;  %4235 = vset.pattern.permute.xlu0 %v4695_v44 }
 0xf7c   : > { %v3163_v58 = vpop.f32.mrb[110].mxu0  ;;  %4106 = vmatprep.subr.bf16.mxu0 %v4105_v32  ;;  %v3173_v56 = vmax.f32 %v3160_v51, 0.0  ;;  %3449 = vperm.xlu1 %4234, %v6089_v57   ;;  %v3324_v51 = vpop.permute.xlu1 %3323 }
 0xf7d   : > { %v3164_v25 = vadd.f32 %v3163_v58, %v6608_v2  ;;  %v3165_v52 = vpop.f32.mrb[111].mxu0  ;;  %4108 = vmatpush1.bf16.msra.mxu0 %v4107_v9  ;;  %v3941_v9 = vld [vmem:[%s6271_s3 + $0x38] sm:$0xff]  ;;  %3453 = vperm.xlu0 %4235, %v6094_v14  }
 0xf7e   : > { %v3166_v19 = vadd.f32 %v3165_v52, %v6608_v2  ;;  %v3332_v1 = vpop.permute.xlu0 %3331 }
 0xf7f   : > { %v3174_v42 = vmax.f32 %v3164_v25, 0.0 }
 0xf80   : > { %v3175_v6 = vmax.f32 %v3166_v19, 0.0  ;;  %3457 = vperm.xlu1 %4234, %v6101_v30   ;;  %v3328_v14 = vpop.permute.xlu1 %3327 }
 0xf81   : > { %v4111_v7 = vpack.c.bf16 %v3174_v42, %v3172_v24 }
 0xf82   : > { %v4109_v18 = vpack.c.bf16 %v3175_v6, %v3173_v56 }
 0xf84   : > { %4110 = vmatprep.subr.bf16.mxu0 %v4109_v18  ;;  %3461 = vperm.xlu1 %4234, %v6107_v61  }
 0xf85   : > { %4112 = vmatpush1.bf16.msra.mxu0 %v4111_v7 }
 0xf88   : > { %3934 = vmatmul.mubr.msk.f32.vlgmr.msra.gmra.mrb[112].mxu0 %vm564_vm2, %v3180_v45 }
 0xf89   : > { %3286 = vmatprep.mubr.f32.mxu0 %v6433_v49 }
 0xf8c   : > { %3935 = vmatmul.mubr.msk.f32.gmra.mrb[114].mxu0 %vm564_vm2, %v3181_v10 }
 0xf8d   : > { %3292 = vmatprep.mubr.f32.mxu0 %v6433_v49 }
 0xf90   : > { %3936 = vmatmul.mubr.msk.f32.gmra.mrb[116].mxu0 %vm564_vm2, %v3182_v34 }
 0xf91   : > { %3298 = vmatprep.mubr.f32.mxu0 %v6433_v49 }
 0xf94   : > { %3937 = vmatmul.mubr.msk.f32.gmra.mrb[118].mxu0 %vm564_vm2, %v3183_v4 }
 0xf95   : > { %3540 = vmatprep.mubr.f32.mxu0 %v6433_v49 }
0x105b   : > { %v3282_v11 = vpop.f32.mrb[112].mxu0 }
0x105c   : > { %v3284_v33 = vpop.f32.mrb[113].mxu0  ;;  %v3283_v3 = vadd.f32 %v3282_v11, %v3187_v47 }
0x105d   : > { %v3285_v0 = vadd.f32 %v3284_v33, %v3187_v47 }
0x105e   : > { %v3305_v37 = vmax.f32 %v3283_v3, 0.0 }
0x105f   : > { %v3288_v15 = vpop.f32.mrb[114].mxu0  ;;  %v3306_v38 = vmax.f32 %v3285_v0, 0.0 }
0x1060   : > { %v3289_v13 = vadd.f32 %v3288_v15, %v3192_v17  ;;  %v3290_v23 = vpop.f32.mrb[115].mxu0 }
0x1061   : > { %v3291_v43 = vadd.f32 %v3290_v23, %v3192_v17 }
0x1062   : > { %v3307_v22 = vmax.f32 %v3289_v13, 0.0 }
0x1063   : > { %v3308_v36 = vmax.f32 %v3291_v43, 0.0  ;;  %v3294_v63 = vpop.f32.mrb[116].mxu0  ;;  %v3947_v43 = vld [vmem:[%s6271_s3 + $0x48] sm:$0xff] }
0x1064   : > { %v4115_v31 = vpack.c.bf16 %v3307_v22, %v3305_v37  ;;  %v3296_v39 = vpop.f32.mrb[117].mxu0  ;;  %v3295_v28 = vadd.f32 %v3294_v63, %v3197_v20  ;;  %v3948_v37 = vld [vmem:[%s6271_s3 + $0x50] sm:$0xff]  ;;  %v3949_v22 = vld [vmem:[%s6271_s3 + $0x58] sm:$0xff] }
0x1065   : > { %v4113_v40 = vpack.c.bf16 %v3308_v36, %v3306_v38  ;;  %v3297_v62 = vadd.f32 %v3296_v39, %v3197_v20  ;;  %v3946_v20 = vld [vmem:[%s6271_s3 + $0x40] sm:$0xff]  ;;  %v4696_v38 = vmov 3   ;;  %v3450_v36 = vpop.permute.xlu1 %3449  ;;  %v3454_v39 = vpop.permute.xlu0 %3453 }
0x1066   : > { %v3309_v50 = vmax.f32 %v3295_v28, 0.0  ;;  %4236 = vset.pattern.permute.xlu0 %v4696_v38 }
0x1067   : > { %v3300_v26 = vpop.f32.mrb[118].mxu0  ;;  %4114 = vmatprep.subr.bf16.mxu1 %v4113_v40  ;;  %v3310_v5 = vmax.f32 %v3297_v62, 0.0  ;;  %3579 = vperm.xlu0 %4236, %v6089_v57  }
0x1068   : > { %v3301_v21 = vadd.f32 %v3300_v26, %v3202_v27  ;;  %v3302_v60 = vpop.f32.mrb[119].mxu0  ;;  %4116 = vmatpush1.bf16.msra.mxu1 %v4115_v31 }
0x1069   : > { %v3303_v48 = vadd.f32 %v3302_v60, %v3202_v27 }
0x106a   : > { %v3311_v16 = vmax.f32 %v3301_v21, 0.0  ;;  %v3458_v21 = vpop.permute.xlu1 %3457 }
0x106b   : > { %v3312_v59 = vmax.f32 %v3303_v48, 0.0 }
0x106c   : > { %v4119_v41 = vpack.c.bf16 %v3311_v16, %v3309_v50 }
0x106d   : > { %v4117_v12 = vpack.c.bf16 %v3312_v59, %v3310_v5 }
0x106f   : > { %4118 = vmatprep.subr.bf16.mxu1 %v4117_v12 }
0x1070   : > { %4120 = vmatpush1.bf16.msra.mxu1 %v4119_v41 }
0x1073   : > { %3942 = vmatmul.mubr.msk.f32.vlgmr.msra.gmra.mrb[112].mxu1 %vm564_vm2, %v3938_v35 }
0x1074   : > { %3416 = vmatprep.mubr.f32.mxu1 %v6433_v49 }
0x1077   : > { %3943 = vmatmul.mubr.msk.f32.gmra.mrb[114].mxu1 %vm564_vm2, %v3939_v55 }
0x1078   : > { %3422 = vmatprep.mubr.f32.mxu1 %v6433_v49 }
0x107b   : > { %3944 = vmatmul.mubr.msk.f32.gmra.mrb[116].mxu1 %vm564_vm2, %v3940_v46 }
0x107c   : > { %3428 = vmatprep.mubr.f32.mxu1 %v6433_v49 }
0x107f   : > { %3945 = vmatmul.mubr.msk.f32.gmra.mrb[118].mxu1 %vm564_vm2, %v3941_v9  ;;  %v3462_v9 = vpop.permute.xlu1 %3461 }
0x1080   : > { %3667 = vmatprep.mubr.f32.mxu1 %v6433_v49 }
0x1146   : > { %v3412_v32 = vpop.f32.mrb[112].mxu1 }
0x1147   : > { %v3414_v29 = vpop.f32.mrb[113].mxu1  ;;  %v3413_v58 = vadd.f32 %v3412_v32, %v3320_v8 }
0x1148   : > { %v3415_v25 = vadd.f32 %v3414_v29, %v3320_v8 }
0x1149   : > { %v3435_v56 = vmax.f32 %v3413_v58, 0.0 }
0x114a   : > { %v3418_v2 = vpop.f32.mrb[114].mxu1  ;;  %v3436_v6 = vmax.f32 %v3415_v25, 0.0 }
0x114b   : > { %v3419_v52 = vadd.f32 %v3418_v2, %v3324_v51  ;;  %v3420_v19 = vpop.f32.mrb[115].mxu1 }
0x114c   : > { %v3421_v24 = vadd.f32 %v3420_v19, %v3324_v51  ;;  %v3954_v19 = vld [vmem:[%s6271_s3 + $0x60] sm:$0xff] }
0x114d   : > { %v3437_v42 = vmax.f32 %v3419_v52, 0.0 }
0x114e   : > { %v3438_v7 = vmax.f32 %v3421_v24, 0.0  ;;  %v3424_v18 = vpop.f32.mrb[116].mxu1  ;;  %v3955_v24 = vld [vmem:[%s6271_s3 + $0x68] sm:$0xff] }
0x114f   : > { %v4123_v45 = vpack.c.bf16 %v3437_v42, %v3435_v56  ;;  %v3426_v30 = vpop.f32.mrb[117].mxu1  ;;  %v3425_v61 = vadd.f32 %v3424_v18, %v3328_v14  ;;  %v3956_v42 = vld [vmem:[%s6271_s3 + $0x70] sm:$0xff]  ;;  %v3957_v56 = vld [vmem:[%s6271_s3 + $0x78] sm:$0xff] }
0x1150   : > { %v4121_v10 = vpack.c.bf16 %v3438_v7, %v3436_v6  ;;  %v3427_v4 = vadd.f32 %v3426_v30, %v3328_v14  ;;  %v3580_v6 = vpop.permute.xlu0 %3579  ;;  %v3688_v14 = vrot.slane %v6029_v53, 5 }
0x1151   : > { %v3439_v17 = vmax.f32 %v3425_v61, 0.0 }
0x1152   : > { %v3430_v34 = vpop.f32.mrb[118].mxu1  ;;  %4122 = vmatprep.subr.bf16.mxu0 %v4121_v10  ;;  %v3440_v0 = vmax.f32 %v3427_v4, 0.0  ;;  %v3689_v10 = vrot.slane %v6032_v54, 5 }
0x1153   : > { %v3431_v47 = vadd.f32 %v3430_v34, %v3332_v1  ;;  %v3432_v11 = vpop.f32.mrb[119].mxu1  ;;  %4124 = vmatpush1.bf16.msra.mxu0 %v4123_v45 }
0x1154   : > { %v3433_v33 = vadd.f32 %v3432_v11, %v3332_v1 }
0x1155   : > { %v3441_v3 = vmax.f32 %v3431_v47, 0.0 }
0x1156   : > { %v3442_v15 = vmax.f32 %v3433_v33, 0.0 }
0x1157   : > { %v4127_v13 = vpack.c.bf16 %v3441_v3, %v3439_v17 }
0x1158   : > { %v4125_v23 = vpack.c.bf16 %v3442_v15, %v3440_v0 }
0x115a   : > { %4126 = vmatprep.subr.bf16.mxu0 %v4125_v23 }
0x115b   : > { %4128 = vmatpush1.bf16.msra.mxu0 %v4127_v13 }
0x115e   : > { %3950 = vmatmul.mubr.msk.f32.vlgmr.msra.gmra.mrb[120].mxu0 %vm564_vm2, %v3946_v20 }
0x115f   : > { %3546 = vmatprep.mubr.f32.mxu0 %v6433_v49 }
0x1162   : > { %3951 = vmatmul.mubr.msk.f32.gmra.mrb[122].mxu0 %vm564_vm2, %v3947_v43 }
0x1163   : > { %3552 = vmatprep.mubr.f32.mxu0 %v6433_v49 }
0x1166   : > { %3952 = vmatmul.mubr.msk.f32.gmra.mrb[124].mxu0 %vm564_vm2, %v3948_v37 }
0x1167   : > { %3558 = vmatprep.mubr.f32.mxu0 %v6433_v49 }
0x116a   : > { %3953 = vmatmul.mubr.msk.f32.gmra.mrb[126].mxu0 %vm564_vm2, %v3949_v22 }
0x1231   : > { %v3542_v63 = vpop.f32.mrb[120].mxu0 }
0x1232   : > { %v3544_v31 = vpop.f32.mrb[121].mxu0  ;;  %v3543_v40 = vadd.f32 %v3542_v63, %v3450_v36 }
0x1233   : > { %v3545_v28 = vadd.f32 %v3544_v31, %v3450_v36 }
0x1234   : > { %v3565_v48 = vmax.f32 %v3543_v40, 0.0 }
0x1235   : > { %v3548_v27 = vpop.f32.mrb[122].mxu0  ;;  %v3566_v16 = vmax.f32 %v3545_v28, 0.0 }
0x1236   : > { %v3549_v62 = vadd.f32 %v3548_v27, %v3454_v39  ;;  %v3550_v26 = vpop.f32.mrb[123].mxu0 }
0x1237   : > { %v3551_v60 = vadd.f32 %v3550_v26, %v3454_v39 }
0x1238   : > { %v3567_v50 = vmax.f32 %v3549_v62, 0.0 }
0x1239   : > { %v3568_v5 = vmax.f32 %v3551_v60, 0.0  ;;  %v3554_v59 = vpop.f32.mrb[124].mxu0 }
0x123a   : > { %v4131_v41 = vpack.c.bf16 %v3567_v50, %v3565_v48  ;;  %v3556_v12 = vpop.f32.mrb[125].mxu0  ;;  %v3555_v57 = vadd.f32 %v3554_v59, %v3458_v21 }
0x123b   : > { %v4129_v35 = vpack.c.bf16 %v3568_v5, %v3566_v16  ;;  %v3557_v55 = vadd.f32 %v3556_v12, %v3458_v21 }
0x123c   : > { %v3569_v29 = vmax.f32 %v3555_v57, 0.0 }
0x123d   : > { %v3560_v46 = vpop.f32.mrb[126].mxu0  ;;  %4130 = vmatprep.subr.bf16.mxu1 %v4129_v35  ;;  %v3570_v58 = vmax.f32 %v3557_v55, 0.0 }
0x123e   : > { %v3561_v44 = vadd.f32 %v3560_v46, %v3462_v9  ;;  %v3562_v32 = vpop.f32.mrb[127].mxu0  ;;  %4132 = vmatpush1.bf16.msra.mxu1 %v4131_v41 }
0x123f   : > { %v3563_v8 = vadd.f32 %v3562_v32, %v3462_v9 }
0x1240   : > { %v3571_v51 = vmax.f32 %v3561_v44, 0.0 }
0x1241   : > { %v3572_v2 = vmax.f32 %v3563_v8, 0.0 }
0x1242   : > { %v4135_v25 = vpack.c.bf16 %v3571_v51, %v3569_v29 }
0x1243   : > { %v4133_v52 = vpack.c.bf16 %v3572_v2, %v3570_v58 }
0x1245   : > { %4134 = vmatprep.subr.bf16.mxu1 %v4133_v52 }
0x1246   : > { %4136 = vmatpush1.bf16.msra.mxu1 %v4135_v25 }
0x1249   : > { %3958 = vmatmul.mubr.msk.f32.vlgmr.msra.gmra.mrb[120].mxu1 %vm564_vm2, %v3954_v19 }
0x124a   : > { %3673 = vmatprep.mubr.f32.mxu1 %v6433_v49 }
0x124d   : > { %3959 = vmatmul.mubr.msk.f32.gmra.mrb[122].mxu1 %vm564_vm2, %v3955_v24 }
0x124e   : > { %3677 = vmatprep.mubr.f32.mxu1 %v6433_v49 }
0x1251   : > { %3960 = vmatmul.mubr.msk.f32.gmra.mrb[124].mxu1 %vm564_vm2, %v3956_v42 }
0x1252   : > { %3681 = vmatprep.mubr.f32.mxu1 %v6433_v49 }
0x1255   : > { %3961 = vmatmul.mubr.msk.f32.gmra.mrb[126].mxu1 %vm564_vm2, %v3957_v56 }
0x131c   : > { %v3669_v7 = vpop.f32.mrb[120].mxu1 }
0x131d   : > { %v3670_v18 = vadd.f32 %v3669_v7, %v3580_v6  ;;  %v3671_v45 = vpop.f32.mrb[121].mxu1 }
0x131e   : > { %v3672_v30 = vadd.f32 %v3671_v45, %v3580_v6 }
0x131f   : > { %v3692_v49 = vsel %vm325_vm0, %v3670_v18, %v3688_v14 }
0x1320   : > { %v3693_v61 = vsel %vm325_vm0, %v3672_v30, %v3689_v10  ;;  %v3675_v34 = vpop.f32.mrb[122].mxu1 }
0x1321   : > { %v3676_v4 = vpop.f32.mrb[123].mxu1  ;;  %v3696_v1 = vcombine.low %v3692_v49, %v3693_v61 }
0x1323   : > { %3698 = vst [vmem:[%s257_s10] sm:$0xff] %v3696_v1 }
0x1324   : > { %v3679_v53 = vpop.f32.mrb[124].mxu1 }
0x1325   : > { %4602 = shalt.err (!%p4599_p7)
}
0x1326   : > { %s4603_s26 = scalar_lea.hbm %s6215_s14, 128  ;;  %s4607_s9 = scalar_lea.hbm %s6273_s5, 1024 }
0x1327   : > { %p4604_p9 = scmp.ne.s32.totalorder %s6215_s14, %s4603_s26  ;;  %p4608_p12 = scmp.lt.u32.totalorder %s6215_s14, %s6273_s5 }
0x1328   : > { %p4609_p13 = scmp.lt.u32.totalorder %s4607_s9, %s4603_s26  ;;  %p4611_p1 = scmp.lt.u32.totalorder %s4603_s26, %s6215_s14 }
0x1329   : > { %p4605_p10 = pnand %p4604_p9, %p4777_p3 }
0x132a   : > { %p4610_p0 = por %p4609_p13, %p4608_p12 }
0x132b   : > { %p4606_p11 = pneg %p4605_p10 }
0x132c   : > { %p4612_p2 = por %p4611_p1, %p4610_p0 }
0x132e   : > { %p4613_p4 = pnand %p4612_p2, %p4606_p11 }
0x1330   : > { %4616 = shalt.err (!%p4613_p4)
}
0x1331   : > { %4137 = dma.vmem_to_hbm [thread:$0]  (%p4777_p3), %s6217_s13, 128, %s6215_s14, %s3700_s15   ;;  %v3680_v54 = vpop.f32.mrb[125].mxu1 }
0x1332   : > { %v3683_v47 = vpop.f32.mrb[126].mxu1 }
0x1333   : > { %v3684_v11 = vpop.f32.mrb[127].mxu1 }
0x1334 PF: > { %p4143_p5 = scmp.ge.s32.totalorder %s4683_s25, 2  ;;  %s3728_s12 = sand.u32 1, %s4655_s18  }
0x1335   : > { %s3729_s16 = scalar_lea.sflag [#allocation3], %s3728_s12 }
0x1336   : > { %p4140_p6 = pnand %p4143_p5, %p4786_p8 }
0x1338   : > { %4650 = dma.done.wait (!%p4140_p6), %s3729_s16, 128  }
0x1339   : > { %4652 = vsyncadd (!%p4140_p6), %s3729_s16, 4294967168  ;;  %s18_s25 = sadd.s32 1, %s4683_s25   ;;  %s6609_s18 = smov %s4659_s19 }
0x133a   : > { %p15_p7 = scmp.ge.s32.totalorder %s18_s25, 10   ;;  %s6610_s19 = smov %s4663_s20 }
0x133b   : > { %s6611_s20 = smov %s4795_s11  ;;  %s6612_s21 = smov %s4675_s23 }
0x133c   : > { %s6613_s22 = smov %s4679_s24  ;;  %s6614_s23 = smov %s6617_s28 }
0x133d   : > { %s6615_s24 = smov %s6621_s29  ;;  %17 = sbr.rel (!%p15_p7) target bundleno = 5 (0x5), region = 81 }
0x1344   :  { %3734 = vsyncpa [#allocation3], 1 }
0x1345   :  { %3736 = vsyncpa [#allocation3 + $0x1], 1 }

</bundles_post_ra>
